<compile_context>
chip_gen: v5e
topology: v5e:2x2
jax: 0.10.0
libtpu: 0.0.40
codegen_flags: <defaults>
</compile_context>

<pallas_src>
import functools
import numpy as np
import jax
import jax.numpy as jnp
from jax.experimental import pallas as pl
from jax.experimental.pallas import tpu as pltpu

# ----- SH coefficients (compile-time Python scalars, identical to the torch module) ---
C0 = 0.28209479177387814
C1 = 0.4886025119029199
C2 = (1.0925484305920792, -1.0925484305920792, 0.31539156525252005,
      -1.0925484305920792, 0.5462742152960396)
C3 = (-0.5900435899266435, 2.890611442640554, -0.4570457994644658,
      0.3731763325901154, -0.4570457994644658, 1.445305721320277,
      -0.5900435899266435)
C4 = (2.5033429417967046, -1.7701307697799304, 0.9461746957575601,
      -0.6690465435572892, 0.10578554691520431, -0.6690465435572892,
      0.47308734787878004, -1.7701307697799304, 0.6258357354491761)


def _sh_columns(x, y, z, degree):
    """SH basis columns in the exact order of SHEncoder.forward. Shapes follow x."""
    cols = [jnp.full_like(x, C0)]                                  # l = 0
    if degree > 1:                                                 # l = 1
        cols += [-C1 * y, C1 * z, -C1 * x]
        if degree > 2:                                             # l = 2
            xx, yy, zz = x * x, y * y, z * z
            xy, yz, xz = x * y, y * z, x * z
            cols += [C2[0] * xy,
                     C2[1] * yz,
                     C2[2] * (2.0 * zz - xx - yy),
                     C2[3] * xz,
                     C2[4] * (xx - yy)]
            if degree > 3:                                         # l = 3
                cols += [C3[0] * y * (3.0 * xx - yy),
                         C3[1] * xy * z,
                         C3[2] * y * (4.0 * zz - xx - yy),
                         C3[3] * z * (2.0 * zz - 3.0 * xx - 3.0 * yy),
                         C3[4] * x * (4.0 * zz - xx - yy),
                         C3[5] * z * (xx - yy),
                         C3[6] * x * (xx - 3.0 * yy)]
                if degree > 4:                                     # l = 4
                    cols += [C4[0] * xy * (xx - yy),
                             C4[1] * yz * (3.0 * xx - yy),
                             C4[2] * xy * (7.0 * zz - 1.0),
                             C4[3] * yz * (7.0 * zz - 3.0),
                             C4[4] * (zz * (35.0 * zz - 30.0) + 3.0),
                             C4[5] * xz * (7.0 * zz - 3.0),
                             C4[6] * (xx - yy) * (7.0 * zz - 1.0),
                             C4[7] * xz * (xx - 3.0 * yy),
                             C4[8] * (xx * (xx - 3.0 * yy) - yy * (3.0 * xx - yy))]
    return cols


# --------------------------- Pallas kernel ----------------------------------------
def _sh_kernel(x_ref, out_ref, *, degree, out_dim):
    pts = x_ref[...]                          # (tb, 3) f32
    x = pts[:, 0:1]                           # (tb, 1)
    y = pts[:, 1:2]
    z = pts[:, 2:3]
    tb = pts.shape[0]

    cols = _sh_columns(x, y, z, degree)       # list of (tb, 1), length == out_dim

    # Assemble the full (tb, out_dim) tile in registers with lane selects
    # (pure VPU; avoids narrow masked column stores), then store it once.
    lane = jax.lax.broadcasted_iota(jnp.int32, (tb, out_dim), 1)
    out = jnp.zeros((tb, out_dim), jnp.float32)
    for i, c in enumerate(cols):
        out = jnp.where(lane == i, c, out)    # (tb,1) broadcasts across lanes
    out_ref[...] = out.astype(out_ref.dtype)


# --------------------------- wrapper ----------------------------------------------
def sh_encoder_forward(inputs, degree=4, tb=512):
    """inputs: (..., 3). Returns (..., degree**2) SH encoding (same semantics as torch)."""
    assert inputs.shape[-1] == 3
    assert 1 <= degree <= 5
    out_dim = degree * degree

    lead = inputs.shape[:-1]
    x = jnp.asarray(inputs, jnp.float32).reshape(-1, 3)
    B = x.shape[0]

    # Tile size: big enough to amortize per-step overhead, shrink for tiny batches.
    tb = max(8, min(tb, ((B + 7) // 8) * 8))
    nb = pl.cdiv(B, tb)
    Bp = nb * tb
    if Bp != B:
        x = jnp.pad(x, ((0, Bp - B), (0, 0)))

    kernel = functools.partial(_sh_kernel, degree=degree, out_dim=out_dim)

    out = pl.pallas_call(
        kernel,
        out_shape=jax.ShapeDtypeStruct((Bp, out_dim), jnp.float32),
        grid=(nb,),
        in_specs=[pl.BlockSpec((tb, 3), lambda i: (i, 0))],
        out_specs=pl.BlockSpec((tb, out_dim), lambda i: (i, 0)),
        compiler_params=pltpu.CompilerParams(
            dimension_semantics=("parallel",)),
    )(x)

    out = out[:B].reshape(*lead, out_dim)
    return out.astype(inputs.dtype)


# --------------------------- pure-JAX reference ------------------------------------
def reference_sh(inputs, degree=4):
    inputs = jnp.asarray(inputs, jnp.float32)
    x, y, z = inputs[..., 0], inputs[..., 1], inputs[..., 2]
    cols = _sh_columns(x, y, z, degree)
    return jnp.stack(cols, axis=-1)


# --------------------------- demo ---------------------------------------------------
if __name__ == "__main__":
    degree = 4                                  # out_dim = 16
    key = jax.random.PRNGKey(0)
    # Small input consistent with the module: (..., 3) direction vectors.
    inputs = jax.random.normal(key, (2, 4, 16, 3), dtype=jnp.float32)

    feats = sh_encoder_forward(inputs, degree=degree)
    feats = jax.block_until_ready(feats)

    ref = reference_sh(inputs, degree=degree)

    assert feats.shape == (2, 4, 16, degree * degree)
    np.testing.assert_allclose(np.asarray(feats), np.asarray(ref),
                               rtol=1e-6, atol=1e-6)

    # Also exercise a non-tile-multiple flattened batch to check the padding path.
    inputs2 = jax.random.normal(jax.random.PRNGKey(0), (37, 3), dtype=jnp.float32)
    feats2 = jax.block_until_ready(sh_encoder_forward(inputs2, degree=degree))
    np.testing.assert_allclose(np.asarray(feats2),
                               np.asarray(reference_sh(inputs2, degree=degree)),
                               rtol=1e-6, atol=1e-6)

    print("KERNEL_OK")
</pallas_src>

<mosaic_0001>
module attributes {stable_mosaic.version = 11 : i64} {
  func.func @_sh_kernel(%arg0: i32, %arg1: memref<128x3xf32, #tpu.memory_space<vmem>>, %arg2: memref<128x16xf32, #tpu.memory_space<vmem>>) attributes {dimension_semantics = [#tpu.dimension_semantics<parallel>], iteration_bounds = array<i64: 1>, scalar_prefetch = 0 : i64, scratch_operands = 0 : i64, tpu.core_type = #tpu.core_type<tc>, window_params = [{transform_indices = @transform_0, window_bounds = array<i64: 128, 3>}, {transform_indices = @transform_1, window_bounds = array<i64: 128, 16>}]} {
    %c0 = arith.constant 0 : index
    %c0_0 = arith.constant 0 : index
    %0 = vector.load %arg1[%c0, %c0_0] : memref<128x3xf32, #tpu.memory_space<vmem>>, vector<128x3xf32>
    %1 = vector.extract_strided_slice %0 {offsets = [0, 0], sizes = [128, 1], strides = [1, 1]} : vector<128x3xf32> to vector<128x1xf32>
    %2 = vector.extract_strided_slice %0 {offsets = [0, 1], sizes = [128, 1], strides = [1, 1]} : vector<128x3xf32> to vector<128x1xf32>
    %3 = vector.extract_strided_slice %0 {offsets = [0, 2], sizes = [128, 1], strides = [1, 1]} : vector<128x3xf32> to vector<128x1xf32>
    %cst = arith.constant 0.282094806 : f32
    %4 = vector.broadcast %cst : f32 to vector<128x1xf32>
    %cst_1 = arith.constant -0.488602519 : f32
    %5 = vector.broadcast %cst_1 : f32 to vector<128x1xf32>
    %6 = arith.mulf %5, %2 : vector<128x1xf32>
    %cst_2 = arith.constant 0.488602519 : f32
    %7 = vector.broadcast %cst_2 : f32 to vector<128x1xf32>
    %8 = arith.mulf %7, %3 : vector<128x1xf32>
    %cst_3 = arith.constant -0.488602519 : f32
    %9 = vector.broadcast %cst_3 : f32 to vector<128x1xf32>
    %10 = arith.mulf %9, %1 : vector<128x1xf32>
    %11 = arith.mulf %1, %1 : vector<128x1xf32>
    %12 = arith.mulf %2, %2 : vector<128x1xf32>
    %13 = arith.mulf %3, %3 : vector<128x1xf32>
    %14 = arith.mulf %1, %2 : vector<128x1xf32>
    %15 = arith.mulf %2, %3 : vector<128x1xf32>
    %16 = arith.mulf %1, %3 : vector<128x1xf32>
    %cst_4 = arith.constant 1.09254849 : f32
    %17 = vector.broadcast %cst_4 : f32 to vector<128x1xf32>
    %18 = arith.mulf %17, %14 : vector<128x1xf32>
    %cst_5 = arith.constant -1.09254849 : f32
    %19 = vector.broadcast %cst_5 : f32 to vector<128x1xf32>
    %20 = arith.mulf %19, %15 : vector<128x1xf32>
    %cst_6 = arith.constant 2.000000e+00 : f32
    %21 = vector.broadcast %cst_6 : f32 to vector<128x1xf32>
    %22 = arith.mulf %21, %13 : vector<128x1xf32>
    %23 = arith.subf %22, %11 : vector<128x1xf32>
    %24 = arith.subf %23, %12 : vector<128x1xf32>
    %cst_7 = arith.constant 0.31539157 : f32
    %25 = vector.broadcast %cst_7 : f32 to vector<128x1xf32>
    %26 = arith.mulf %25, %24 : vector<128x1xf32>
    %cst_8 = arith.constant -1.09254849 : f32
    %27 = vector.broadcast %cst_8 : f32 to vector<128x1xf32>
    %28 = arith.mulf %27, %16 : vector<128x1xf32>
    %29 = arith.subf %11, %12 : vector<128x1xf32>
    %cst_9 = arith.constant 0.546274245 : f32
    %30 = vector.broadcast %cst_9 : f32 to vector<128x1xf32>
    %31 = arith.mulf %30, %29 : vector<128x1xf32>
    %cst_10 = arith.constant -0.590043604 : f32
    %32 = vector.broadcast %cst_10 : f32 to vector<128x1xf32>
    %33 = arith.mulf %32, %2 : vector<128x1xf32>
    %cst_11 = arith.constant 3.000000e+00 : f32
    %34 = vector.broadcast %cst_11 : f32 to vector<128x1xf32>
    %35 = arith.mulf %34, %11 : vector<128x1xf32>
    %36 = arith.subf %35, %12 : vector<128x1xf32>
    %37 = arith.mulf %33, %36 : vector<128x1xf32>
    %cst_12 = arith.constant 2.89061141 : f32
    %38 = vector.broadcast %cst_12 : f32 to vector<128x1xf32>
    %39 = arith.mulf %38, %14 : vector<128x1xf32>
    %40 = arith.mulf %39, %3 : vector<128x1xf32>
    %cst_13 = arith.constant -0.457045794 : f32
    %41 = vector.broadcast %cst_13 : f32 to vector<128x1xf32>
    %42 = arith.mulf %41, %2 : vector<128x1xf32>
    %cst_14 = arith.constant 4.000000e+00 : f32
    %43 = vector.broadcast %cst_14 : f32 to vector<128x1xf32>
    %44 = arith.mulf %43, %13 : vector<128x1xf32>
    %45 = arith.subf %44, %11 : vector<128x1xf32>
    %46 = arith.subf %45, %12 : vector<128x1xf32>
    %47 = arith.mulf %42, %46 : vector<128x1xf32>
    %cst_15 = arith.constant 0.373176336 : f32
    %48 = vector.broadcast %cst_15 : f32 to vector<128x1xf32>
    %49 = arith.mulf %48, %3 : vector<128x1xf32>
    %cst_16 = arith.constant 2.000000e+00 : f32
    %50 = vector.broadcast %cst_16 : f32 to vector<128x1xf32>
    %51 = arith.mulf %50, %13 : vector<128x1xf32>
    %cst_17 = arith.constant 3.000000e+00 : f32
    %52 = vector.broadcast %cst_17 : f32 to vector<128x1xf32>
    %53 = arith.mulf %52, %11 : vector<128x1xf32>
    %54 = arith.subf %51, %53 : vector<128x1xf32>
    %cst_18 = arith.constant 3.000000e+00 : f32
    %55 = vector.broadcast %cst_18 : f32 to vector<128x1xf32>
    %56 = arith.mulf %55, %12 : vector<128x1xf32>
    %57 = arith.subf %54, %56 : vector<128x1xf32>
    %58 = arith.mulf %49, %57 : vector<128x1xf32>
    %cst_19 = arith.constant -0.457045794 : f32
    %59 = vector.broadcast %cst_19 : f32 to vector<128x1xf32>
    %60 = arith.mulf %59, %1 : vector<128x1xf32>
    %cst_20 = arith.constant 4.000000e+00 : f32
    %61 = vector.broadcast %cst_20 : f32 to vector<128x1xf32>
    %62 = arith.mulf %61, %13 : vector<128x1xf32>
    %63 = arith.subf %62, %11 : vector<128x1xf32>
    %64 = arith.subf %63, %12 : vector<128x1xf32>
    %65 = arith.mulf %60, %64 : vector<128x1xf32>
    %cst_21 = arith.constant 1.44530571 : f32
    %66 = vector.broadcast %cst_21 : f32 to vector<128x1xf32>
    %67 = arith.mulf %66, %3 : vector<128x1xf32>
    %68 = arith.subf %11, %12 : vector<128x1xf32>
    %69 = arith.mulf %67, %68 : vector<128x1xf32>
    %cst_22 = arith.constant -0.590043604 : f32
    %70 = vector.broadcast %cst_22 : f32 to vector<128x1xf32>
    %71 = arith.mulf %70, %1 : vector<128x1xf32>
    %cst_23 = arith.constant 3.000000e+00 : f32
    %72 = vector.broadcast %cst_23 : f32 to vector<128x1xf32>
    %73 = arith.mulf %72, %12 : vector<128x1xf32>
    %74 = arith.subf %11, %73 : vector<128x1xf32>
    %75 = arith.mulf %71, %74 : vector<128x1xf32>
    %76 = tpu.iota {dimensions = array<i32: 1>} : vector<128x16xi32>
    %cst_24 = arith.constant 0.000000e+00 : f32
    %77 = vector.broadcast %cst_24 : f32 to vector<128x16xf32>
    %c0_i32 = arith.constant 0 : i32
    %78 = vector.broadcast %c0_i32 : i32 to vector<128x16xi32>
    %79 = arith.cmpi eq, %76, %78 : vector<128x16xi32>
    %80 = vector.shape_cast %4 : vector<128x1xf32> to vector<128x1xf32>
    %81 = vector.broadcast %80 : vector<128x1xf32> to vector<128x16xf32>
    %82 = arith.select %79, %81, %77 : vector<128x16xi1>, vector<128x16xf32>
    %c1_i32 = arith.constant 1 : i32
    %83 = vector.broadcast %c1_i32 : i32 to vector<128x16xi32>
    %84 = arith.cmpi eq, %76, %83 : vector<128x16xi32>
    %85 = vector.shape_cast %6 : vector<128x1xf32> to vector<128x1xf32>
    %86 = vector.broadcast %85 : vector<128x1xf32> to vector<128x16xf32>
    %87 = arith.select %84, %86, %82 : vector<128x16xi1>, vector<128x16xf32>
    %c2_i32 = arith.constant 2 : i32
    %88 = vector.broadcast %c2_i32 : i32 to vector<128x16xi32>
    %89 = arith.cmpi eq, %76, %88 : vector<128x16xi32>
    %90 = vector.shape_cast %8 : vector<128x1xf32> to vector<128x1xf32>
    %91 = vector.broadcast %90 : vector<128x1xf32> to vector<128x16xf32>
    %92 = arith.select %89, %91, %87 : vector<128x16xi1>, vector<128x16xf32>
    %c3_i32 = arith.constant 3 : i32
    %93 = vector.broadcast %c3_i32 : i32 to vector<128x16xi32>
    %94 = arith.cmpi eq, %76, %93 : vector<128x16xi32>
    %95 = vector.shape_cast %10 : vector<128x1xf32> to vector<128x1xf32>
    %96 = vector.broadcast %95 : vector<128x1xf32> to vector<128x16xf32>
    %97 = arith.select %94, %96, %92 : vector<128x16xi1>, vector<128x16xf32>
    %c4_i32 = arith.constant 4 : i32
    %98 = vector.broadcast %c4_i32 : i32 to vector<128x16xi32>
    %99 = arith.cmpi eq, %76, %98 : vector<128x16xi32>
    %100 = vector.shape_cast %18 : vector<128x1xf32> to vector<128x1xf32>
    %101 = vector.broadcast %100 : vector<128x1xf32> to vector<128x16xf32>
    %102 = arith.select %99, %101, %97 : vector<128x16xi1>, vector<128x16xf32>
    %c5_i32 = arith.constant 5 : i32
    %103 = vector.broadcast %c5_i32 : i32 to vector<128x16xi32>
    %104 = arith.cmpi eq, %76, %103 : vector<128x16xi32>
    %105 = vector.shape_cast %20 : vector<128x1xf32> to vector<128x1xf32>
    %106 = vector.broadcast %105 : vector<128x1xf32> to vector<128x16xf32>
    %107 = arith.select %104, %106, %102 : vector<128x16xi1>, vector<128x16xf32>
    %c6_i32 = arith.constant 6 : i32
    %108 = vector.broadcast %c6_i32 : i32 to vector<128x16xi32>
    %109 = arith.cmpi eq, %76, %108 : vector<128x16xi32>
    %110 = vector.shape_cast %26 : vector<128x1xf32> to vector<128x1xf32>
    %111 = vector.broadcast %110 : vector<128x1xf32> to vector<128x16xf32>
    %112 = arith.select %109, %111, %107 : vector<128x16xi1>, vector<128x16xf32>
    %c7_i32 = arith.constant 7 : i32
    %113 = vector.broadcast %c7_i32 : i32 to vector<128x16xi32>
    %114 = arith.cmpi eq, %76, %113 : vector<128x16xi32>
    %115 = vector.shape_cast %28 : vector<128x1xf32> to vector<128x1xf32>
    %116 = vector.broadcast %115 : vector<128x1xf32> to vector<128x16xf32>
    %117 = arith.select %114, %116, %112 : vector<128x16xi1>, vector<128x16xf32>
    %c8_i32 = arith.constant 8 : i32
    %118 = vector.broadcast %c8_i32 : i32 to vector<128x16xi32>
    %119 = arith.cmpi eq, %76, %118 : vector<128x16xi32>
    %120 = vector.shape_cast %31 : vector<128x1xf32> to vector<128x1xf32>
    %121 = vector.broadcast %120 : vector<128x1xf32> to vector<128x16xf32>
    %122 = arith.select %119, %121, %117 : vector<128x16xi1>, vector<128x16xf32>
    %c9_i32 = arith.constant 9 : i32
    %123 = vector.broadcast %c9_i32 : i32 to vector<128x16xi32>
    %124 = arith.cmpi eq, %76, %123 : vector<128x16xi32>
    %125 = vector.shape_cast %37 : vector<128x1xf32> to vector<128x1xf32>
    %126 = vector.broadcast %125 : vector<128x1xf32> to vector<128x16xf32>
    %127 = arith.select %124, %126, %122 : vector<128x16xi1>, vector<128x16xf32>
    %c10_i32 = arith.constant 10 : i32
    %128 = vector.broadcast %c10_i32 : i32 to vector<128x16xi32>
    %129 = arith.cmpi eq, %76, %128 : vector<128x16xi32>
    %130 = vector.shape_cast %40 : vector<128x1xf32> to vector<128x1xf32>
    %131 = vector.broadcast %130 : vector<128x1xf32> to vector<128x16xf32>
    %132 = arith.select %129, %131, %127 : vector<128x16xi1>, vector<128x16xf32>
    %c11_i32 = arith.constant 11 : i32
    %133 = vector.broadcast %c11_i32 : i32 to vector<128x16xi32>
    %134 = arith.cmpi eq, %76, %133 : vector<128x16xi32>
    %135 = vector.shape_cast %47 : vector<128x1xf32> to vector<128x1xf32>
    %136 = vector.broadcast %135 : vector<128x1xf32> to vector<128x16xf32>
    %137 = arith.select %134, %136, %132 : vector<128x16xi1>, vector<128x16xf32>
    %c12_i32 = arith.constant 12 : i32
    %138 = vector.broadcast %c12_i32 : i32 to vector<128x16xi32>
    %139 = arith.cmpi eq, %76, %138 : vector<128x16xi32>
    %140 = vector.shape_cast %58 : vector<128x1xf32> to vector<128x1xf32>
    %141 = vector.broadcast %140 : vector<128x1xf32> to vector<128x16xf32>
    %142 = arith.select %139, %141, %137 : vector<128x16xi1>, vector<128x16xf32>
    %c13_i32 = arith.constant 13 : i32
    %143 = vector.broadcast %c13_i32 : i32 to vector<128x16xi32>
    %144 = arith.cmpi eq, %76, %143 : vector<128x16xi32>
    %145 = vector.shape_cast %65 : vector<128x1xf32> to vector<128x1xf32>
    %146 = vector.broadcast %145 : vector<128x1xf32> to vector<128x16xf32>
    %147 = arith.select %144, %146, %142 : vector<128x16xi1>, vector<128x16xf32>
    %c14_i32 = arith.constant 14 : i32
    %148 = vector.broadcast %c14_i32 : i32 to vector<128x16xi32>
    %149 = arith.cmpi eq, %76, %148 : vector<128x16xi32>
    %150 = vector.shape_cast %69 : vector<128x1xf32> to vector<128x1xf32>
    %151 = vector.broadcast %150 : vector<128x1xf32> to vector<128x16xf32>
    %152 = arith.select %149, %151, %147 : vector<128x16xi1>, vector<128x16xf32>
    %c15_i32 = arith.constant 15 : i32
    %153 = vector.broadcast %c15_i32 : i32 to vector<128x16xi32>
    %154 = arith.cmpi eq, %76, %153 : vector<128x16xi32>
    %155 = vector.shape_cast %75 : vector<128x1xf32> to vector<128x1xf32>
    %156 = vector.broadcast %155 : vector<128x1xf32> to vector<128x16xf32>
    %157 = arith.select %154, %156, %152 : vector<128x16xi1>, vector<128x16xf32>
    %c0_25 = arith.constant 0 : index
    %c0_26 = arith.constant 0 : index
    %158 = vector.load %arg2[%c0_25, %c0_26] : memref<128x16xf32, #tpu.memory_space<vmem>>, vector<128x16xf32>
    tpu.vector_store %arg2[%c0_25, %c0_26], %157 {strides = array<i32>} : memref<128x16xf32, #tpu.memory_space<vmem>>, vector<128x16xf32>,
    return
  }
  func.func @transform_0(%arg0: i32) -> (i32, i32) {
    %c0_i32 = arith.constant 0 : i32
    %c0_i32_0 = arith.constant 0 : i32
    return %arg0, %c0_i32 : i32, i32
  }
  func.func @transform_1(%arg0: i32) -> (i32, i32) {
    %c0_i32 = arith.constant 0 : i32
    %c0_i32_0 = arith.constant 0 : i32
    return %arg0, %c0_i32 : i32, i32
  }
}

</mosaic_0001>

<bundles_post_ra>
// kernel: tpu_custom_call.1
= control target key start
LH: loop header
LB: loop body
LE: loop exit
PB: predicated region body
PF: predicated region fallthrough
CT: control target
= control target key end

     0   :  { %s2773_s12 = smov 127   ;;  %s2774_s10 = smov 126   ;;  %s5886_s0 = inlined_call_operand.vmem [shape: f32[128,3], index: 0, kind: input, shape index: {}]   ;;  %s5887_s1 = inlined_call_operand.vmem [shape: f32[128,16], index: 1, kind: output, shape index: {}]  }
   0x1   :  { %v2794_v0 = vld [vmem:[%s5886_s0 + $0x20] sm:$0xff]  ;;  %v2799_v1 = vld [vmem:[%s5886_s0 + $0x10] sm:$0xff]  ;;  %v2815_v3 = vld [vmem:[%s5886_s0 + $0x28] sm:$0xff]  ;;  %s2775_s11 = smov 2   ;;  %s2776_s13 = smov 1  }
   0x2   :  { %6076 = vst [vmem:[#allocation2_spill] sm:$0xff] %v2794_v0  ;;  %v2804_v2 = vld [vmem:[%s5886_s0] sm:$0xff]  ;;  %96 = vrot.lane.b32.xlu2 %v2794_v0, %s2773_s12  ;;  %92 = vrot.lane.b32.xlu1 %v2799_v1, %s2773_s12  ;;  %v2820_v4 = vld [vmem:[%s5886_s0 + $0x18] sm:$0xff]  ;;  %v2943_v17 = vmul.f32 %v2799_v1, %v2799_v1  ;;  %v2963_v21 = vmul.f32 %v2815_v3, %v2815_v3 }
   0x3   :  { %6077 = vst [vmem:[#allocation3_spill] sm:$0xff] %v2799_v1  ;;  %88 = vrot.lane.b32.xlu0 %v2804_v2, %s2773_s12  ;;  %v2825_v5 = vld [vmem:[%s5886_s0 + $0x8] sm:$0xff]  ;;  %v2836_v6 = vld [vmem:[%s5886_s0 + $0x40] sm:$0xff]  ;;  %v2841_v7 = vld [vmem:[%s5886_s0 + $0x38] sm:$0xff]  ;;  %v2933_v16 = vmul.f32 %v2804_v2, %v2804_v2  ;;  %v2947_v18 = vmul.f32 %v2820_v4, %v2820_v4  ;;  %v2971_v23 = vmul.f32 %v2794_v0, %v2794_v0 }
   0x4   :  { %6078 = vst [vmem:[#allocation4_spill] sm:$0xff] %v2804_v2  ;;  %v2846_v8 = vld [vmem:[%s5886_s0 + $0x30] sm:$0xff]  ;;  %v2857_v9 = vld [vmem:[%s5886_s0 + $0x58] sm:$0xff]  ;;  %v2867_v11 = vld [vmem:[%s5886_s0 + $0x48] sm:$0xff]  ;;  %v2951_v19 = vmul.f32 %v2825_v5, %v2825_v5  ;;  %v2983_v25 = vmul.f32 %v2836_v6, %v2836_v6  ;;  %v2991_v27 = vmul.f32 %v2841_v7, %v2841_v7 }
   0x5   :  { %6079 = vst [vmem:[#allocation5_spill] sm:$0xff] %v2815_v3  ;;  %v2862_v10 = vld [vmem:[%s5886_s0 + $0x50] sm:$0xff]  ;;  %v2883_v13 = vld [vmem:[%s5886_s0 + $0x68] sm:$0xff]  ;;  %v2888_v14 = vld [vmem:[%s5886_s0 + $0x60] sm:$0xff]  ;;  %v2967_v22 = vmul.f32 %v2846_v8, %v2846_v8  ;;  %v2987_v26 = vmul.f32 %v2867_v11, %v2867_v11  ;;  %v3003_v29 = vmul.f32 %v2857_v9, %v2857_v9 }
   0x6   :  { %6080 = vst [vmem:[#allocation6_spill] sm:$0xff] %v2820_v4  ;;  %v2878_v12 = vld [vmem:[%s5886_s0 + $0x70] sm:$0xff]  ;;  %v2899_v15 = vld [vmem:[%s5886_s0 + $0x78] sm:$0xff]  ;;  %v3007_v30 = vmul.f32 %v2888_v14, %v2888_v14  ;;  %v3011_v31 = vmul.f32 %v2862_v10, %v2862_v10  ;;  %v3035_v37 = vmul.f32 %v2883_v13, %v2883_v13 }
   0x7   :  { %6081 = vst [vmem:[#allocation7_spill] sm:$0xff] %v2825_v5  ;;  %v3027_v35 = vmul.f32 %v2878_v12, %v2878_v12  ;;  %v3031_v36 = vmul.f32 %v2899_v15, %v2899_v15 }
   0x8   :  { %6082 = vst [vmem:[#allocation8_spill] sm:$0xff] %v2836_v6 }
   0x9   :  { %6083 = vst [vmem:[#allocation9_spill] sm:$0xff] %v2841_v7 }
   0xa   :  { %98 = vrot.lane.b32.xlu2 %v2815_v3, %s2773_s12  ;;  %94 = vrot.lane.b32.xlu1 %v2820_v4, %s2773_s12  ;;  %6084 = vst [vmem:[#allocation10_spill] sm:$0xff] %v2846_v8 }
   0xb   :  { %90 = vrot.lane.b32.xlu0 %v2825_v5, %s2773_s12  ;;  %6085 = vst [vmem:[#allocation11_spill] sm:$0xff] %v2857_v9 }
   0xc   :  { %6086 = vst [vmem:[#allocation12_spill] sm:$0xff] %v2862_v10 }
   0xd   :  { %6087 = vst [vmem:[#allocation13_spill] sm:$0xff] %v2867_v11 }
   0xe   :  { %6088 = vst [vmem:[#allocation14_spill] sm:$0xff] %v2878_v12 }
   0xf   :  { %6089 = vst [vmem:[#allocation15_spill] sm:$0xff] %v2883_v13 }
  0x10   :  { %6090 = vst [vmem:[#allocation16_spill] sm:$0xff] %v2888_v14 }
  0x11   :  { %6091 = vst [vmem:[#allocation17_spill] sm:$0xff] %v2899_v15 }
  0x12   :  { %104 = vrot.lane.b32.xlu2 %v2836_v6, %s2773_s12  ;;  %102 = vrot.lane.b32.xlu1 %v2841_v7, %s2773_s12  ;;  %6092 = vst [vmem:[#allocation18_spill] sm:$0xff] %v2933_v16 }
  0x13   :  { %100 = vrot.lane.b32.xlu0 %v2846_v8, %s2773_s12  ;;  %6093 = vst [vmem:[#allocation19_spill] sm:$0xff] %v2943_v17 }
  0x14   :  { %6094 = vst [vmem:[#allocation20_spill] sm:$0xff] %v2947_v18 }
  0x15   :  { %6095 = vst [vmem:[#allocation21_spill] sm:$0xff] %v2951_v19 }
  0x16   :  { %6097 = vst [vmem:[#allocation23_spill] sm:$0xff] %v2963_v21 }
  0x17   :  { %6098 = vst [vmem:[#allocation24_spill] sm:$0xff] %v2967_v22 }
  0x18   :  { %6099 = vst [vmem:[#allocation25_spill] sm:$0xff] %v2971_v23 }
  0x19   :  { %6101 = vst [vmem:[#allocation27_spill] sm:$0xff] %v2983_v25 }
  0x1a   :  { %110 = vrot.lane.b32.xlu2 %v2857_v9, %s2773_s12  ;;  %108 = vrot.lane.b32.xlu1 %v2862_v10, %s2773_s12  ;;  %6102 = vst [vmem:[#allocation28_spill] sm:$0xff] %v2987_v26 }
  0x1b   :  { %106 = vrot.lane.b32.xlu0 %v2867_v11, %s2773_s12  ;;  %6103 = vst [vmem:[#allocation29_spill] sm:$0xff] %v2991_v27 }
  0x1c   :  { %6105 = vst [vmem:[#allocation31_spill] sm:$0xff] %v3003_v29 }
  0x1d   :  { %6106 = vst [vmem:[#allocation32_spill] sm:$0xff] %v3007_v30 }
  0x1e   :  { %6107 = vst [vmem:[#allocation33_spill] sm:$0xff] %v3011_v31 }
  0x1f   :  { %6111 = vst [vmem:[#allocation37_spill] sm:$0xff] %v3027_v35 }
  0x20   :  { %6112 = vst [vmem:[#allocation38_spill] sm:$0xff] %v3031_v36 }
  0x21   :  { %6113 = vst [vmem:[#allocation39_spill] sm:$0xff] %v3035_v37 }
  0x22   :  { %116 = vrot.lane.b32.xlu2 %v2878_v12, %s2773_s12  ;;  %114 = vrot.lane.b32.xlu1 %v2883_v13, %s2773_s12 }
  0x23   :  { %112 = vrot.lane.b32.xlu0 %v2888_v14, %s2773_s12 }
  0x2a   :  { %154 = vrot.lane.b32.xlu2 %v2825_v5, %s2774_s10  ;;  %152 = vrot.lane.b32.xlu1 %v2804_v2, %s2774_s10 }
  0x2b   :  { %118 = vrot.lane.b32.xlu0 %v2899_v15, %s2773_s12 }
  0x32   :  { %160 = vrot.lane.b32.xlu2 %v2794_v0, %s2774_s10  ;;  %158 = vrot.lane.b32.xlu1 %v2820_v4, %s2774_s10  ;;  %v3246_v0 = vmul.f32 3.0, %v2933_v16 }
  0x33   :  { %156 = vrot.lane.b32.xlu0 %v2799_v1, %s2774_s10 }
  0x3a   :  { %166 = vrot.lane.b32.xlu2 %v2841_v7, %s2774_s10  ;;  %164 = vrot.lane.b32.xlu1 %v2846_v8, %s2774_s10  ;;  %v3234_v8 = vmul.f32 3.0, %v2991_v27 }
  0x3b   :  { %162 = vrot.lane.b32.xlu0 %v2815_v3, %s2774_s10  ;;  %v3270_v3 = vmul.f32 3.0, %v2943_v17 }
  0x42   :  { %172 = vrot.lane.b32.xlu2 %v2862_v10, %s2774_s10  ;;  %170 = vrot.lane.b32.xlu1 %v2867_v11, %s2774_s10 }
  0x43   :  { %168 = vrot.lane.b32.xlu0 %v2836_v6, %s2774_s10  ;;  %v3267_v6 = vmul.f32 3.0, %v3035_v37 }
  0x4a   :  { %178 = vrot.lane.b32.xlu2 %v2883_v13, %s2774_s10  ;;  %176 = vrot.lane.b32.xlu1 %v2888_v14, %s2774_s10 }
  0x4b   :  { %174 = vrot.lane.b32.xlu0 %v2857_v9, %s2774_s10 }
  0x52   :  { %182 = vrot.lane.b32.xlu1 %v2899_v15, %s2774_s10  ;;  %280 = vrot.lane.b32.xlu2 %v2933_v16, %s2775_s11 }
  0x53   :  { %180 = vrot.lane.b32.xlu0 %v2878_v12, %s2774_s10 }
  0x5a   :  { %284 = vrot.lane.b32.xlu1 %v2943_v17, %s2775_s11  ;;  %286 = vrot.lane.b32.xlu2 %v2947_v18, %s2775_s11 }
  0x5b   :  { %282 = vrot.lane.b32.xlu0 %v2951_v19, %s2775_s11 }
  0x5c   :  { %v2959_v20 = vpop.permute.xlu2 %96 }
  0x5d   :  { %6096 = vst [vmem:[#allocation22_spill] sm:$0xff] %v2959_v20 }
  0x62   :  { %290 = vrot.lane.b32.xlu1 %v2963_v21, %s2775_s11  ;;  %292 = vrot.lane.b32.xlu2 %v2967_v22, %s2775_s11 }
  0x63   :  { %288 = vrot.lane.b32.xlu0 %v2971_v23, %s2775_s11 }
  0x64   :  { %v2979_v24 = vpop.permute.xlu2 %98 }
  0x65   :  { %6100 = vst [vmem:[#allocation26_spill] sm:$0xff] %v2979_v24  ;;  %v3210_v24 = vmul.f32 3.0, %v2951_v19 }
  0x6a   :  { %296 = vrot.lane.b32.xlu1 %v2983_v25, %s2775_s11  ;;  %298 = vrot.lane.b32.xlu2 %v2987_v26, %s2775_s11 }
  0x6b   :  { %294 = vrot.lane.b32.xlu0 %v2991_v27, %s2775_s11 }
  0x6c   :  { %v2999_v28 = vpop.permute.xlu2 %104 }
  0x6d   :  { %6104 = vst [vmem:[#allocation30_spill] sm:$0xff] %v2999_v28 }
  0x72   :  { %302 = vrot.lane.b32.xlu1 %v3003_v29, %s2775_s11  ;;  %304 = vrot.lane.b32.xlu2 %v3007_v30, %s2775_s11 }
  0x73   :  { %300 = vrot.lane.b32.xlu0 %v3011_v31, %s2775_s11 }
  0x74   :  { %v3019_v32 = vpop.permute.xlu2 %110  ;;  %v3021_v33 = vpop.permute.xlu1 %92 }
  0x75   :  { %6108 = vst [vmem:[#allocation34_spill] sm:$0xff] %v3019_v32  ;;  %v3023_v34 = vpop.permute.xlu0 %88 }
  0x76   :  { %6109 = vst [vmem:[#allocation35_spill] sm:$0xff] %v3021_v33  ;;  %v3249_v33 = vmul.f32 3.0, %v3011_v31 }
  0x77   :  { %6110 = vst [vmem:[#allocation36_spill] sm:$0xff] %v3023_v34 }
  0x78   :  { %6166 = vst [vmem:[#allocation92_spill] sm:$0xff] %v3249_v33 }
  0x7a   :  { %308 = vrot.lane.b32.xlu1 %v3027_v35, %s2775_s11  ;;  %310 = vrot.lane.b32.xlu2 %v3031_v36, %s2775_s11 }
  0x7b   :  { %306 = vrot.lane.b32.xlu0 %v3035_v37, %s2775_s11 }
  0x7c   :  { %v3043_v38 = vpop.permute.xlu2 %116  ;;  %v3045_v39 = vpop.permute.xlu1 %94 }
  0x7d   :  { %6114 = vst [vmem:[#allocation40_spill] sm:$0xff] %v3043_v38  ;;  %v3047_v40 = vpop.permute.xlu0 %90 }
  0x7e   :  { %6115 = vst [vmem:[#allocation41_spill] sm:$0xff] %v3045_v39 }
  0x7f   :  { %6116 = vst [vmem:[#allocation42_spill] sm:$0xff] %v3047_v40 }
  0x82   :  { %346 = vrot.lane.b32.xlu1 %v2951_v19, %s2776_s13  ;;  %348 = vrot.lane.b32.xlu2 %v2943_v17, %s2776_s13 }
  0x83   :  { %344 = vrot.lane.b32.xlu0 %v2933_v16, %s2776_s13 }
  0x84   :  { %v3055_v41 = vpop.permute.xlu1 %102  ;;  %v3057_v42 = vpop.permute.xlu2 %154 }
  0x85   :  { %6117 = vst [vmem:[#allocation43_spill] sm:$0xff] %v3055_v41  ;;  %v3059_v43 = vpop.permute.xlu0 %100 }
  0x86   :  { %6118 = vst [vmem:[#allocation44_spill] sm:$0xff] %v3057_v42 }
  0x87   :  { %6119 = vst [vmem:[#allocation45_spill] sm:$0xff] %v3059_v43 }
  0x8a   :  { %352 = vrot.lane.b32.xlu1 %v2971_v23, %s2776_s13  ;;  %354 = vrot.lane.b32.xlu2 %v2963_v21, %s2776_s13 }
  0x8b   :  { %350 = vrot.lane.b32.xlu0 %v2947_v18, %s2776_s13 }
  0x8c   :  { %v3067_v44 = vpop.permute.xlu1 %108  ;;  %v3069_v45 = vpop.permute.xlu2 %160 }
  0x8d   :  { %6120 = vst [vmem:[#allocation46_spill] sm:$0xff] %v3067_v44  ;;  %v3071_v46 = vpop.permute.xlu0 %106 }
  0x8e   :  { %6121 = vst [vmem:[#allocation47_spill] sm:$0xff] %v3069_v45 }
  0x8f   :  { %6122 = vst [vmem:[#allocation48_spill] sm:$0xff] %v3071_v46 }
  0x92   :  { %358 = vrot.lane.b32.xlu1 %v2991_v27, %s2776_s13  ;;  %360 = vrot.lane.b32.xlu2 %v2983_v25, %s2776_s13 }
  0x93   :  { %356 = vrot.lane.b32.xlu0 %v2967_v22, %s2776_s13 }
  0x94   :  { %v3079_v47 = vpop.permute.xlu1 %114  ;;  %v3081_v48 = vpop.permute.xlu2 %166 }
  0x95   :  { %6123 = vst [vmem:[#allocation49_spill] sm:$0xff] %v3079_v47  ;;  %v3083_v49 = vpop.permute.xlu0 %112  ;;  %v3222_v47 = vmul.f32 3.0, %v2971_v23 }
  0x96   :  { %6124 = vst [vmem:[#allocation50_spill] sm:$0xff] %v3081_v48 }
  0x97   :  { %6125 = vst [vmem:[#allocation51_spill] sm:$0xff] %v3083_v49 }
  0x9a   :  { %364 = vrot.lane.b32.xlu1 %v3011_v31, %s2776_s13  ;;  %366 = vrot.lane.b32.xlu2 %v3003_v29, %s2776_s13 }
  0x9b   :  { %362 = vrot.lane.b32.xlu0 %v2987_v26, %s2776_s13 }
  0x9c   :  { %v3091_v50 = vpop.permute.xlu2 %172  ;;  %v3093_v51 = vpop.permute.xlu1 %152 }
  0x9d   :  { %6126 = vst [vmem:[#allocation52_spill] sm:$0xff] %v3091_v50  ;;  %v3095_v52 = vpop.permute.xlu0 %118 }
  0x9e   :  { %6127 = vst [vmem:[#allocation53_spill] sm:$0xff] %v3093_v51 }
  0x9f   :  { %6128 = vst [vmem:[#allocation54_spill] sm:$0xff] %v3095_v52 }
  0xa2   :  { %370 = vrot.lane.b32.xlu1 %v3035_v37, %s2776_s13  ;;  %372 = vrot.lane.b32.xlu2 %v3027_v35, %s2776_s13 }
  0xa3   :  { %368 = vrot.lane.b32.xlu0 %v3007_v30, %s2776_s13 }
  0xa4   :  { %v3103_v53 = vpop.permute.xlu2 %178  ;;  %v3105_v54 = vpop.permute.xlu1 %158 }
  0xa5   :  { %6129 = vst [vmem:[#allocation55_spill] sm:$0xff] %v3103_v53  ;;  %v3107_v55 = vpop.permute.xlu0 %156 }
  0xa6   :  { %6130 = vst [vmem:[#allocation56_spill] sm:$0xff] %v3105_v54 }
  0xa7   :  { %6131 = vst [vmem:[#allocation57_spill] sm:$0xff] %v3107_v55 }
  0xaa   :  { %440 = vrot.lane.b32.xlu1 %v2933_v16, %s2773_s12  ;;  %442 = vrot.lane.b32.xlu2 %v2951_v19, %s2773_s12 }
  0xab   :  { %374 = vrot.lane.b32.xlu0 %v3031_v36, %s2776_s13 }
  0xac   :  { %v3115_v56 = vpop.permute.xlu1 %164  ;;  %v3117_v57 = vpop.permute.xlu2 %280 }
  0xad   :  { %6132 = vst [vmem:[#allocation58_spill] sm:$0xff] %v3115_v56  ;;  %v3119_v58 = vpop.permute.xlu0 %162 }
  0xae   :  { %6133 = vst [vmem:[#allocation59_spill] sm:$0xff] %v3117_v57 }
  0xaf   :  { %6134 = vst [vmem:[#allocation60_spill] sm:$0xff] %v3119_v58 }
  0xb2   :  { %446 = vrot.lane.b32.xlu1 %v2947_v18, %s2773_s12  ;;  %448 = vrot.lane.b32.xlu2 %v2971_v23, %s2773_s12 }
  0xb3   :  { %444 = vrot.lane.b32.xlu0 %v2943_v17, %s2773_s12 }
  0xb4   :  { %v3127_v59 = vpop.permute.xlu1 %170  ;;  %v3129_v60 = vpop.permute.xlu2 %286 }
  0xb5   :  { %6135 = vst [vmem:[#allocation61_spill] sm:$0xff] %v3127_v59  ;;  %v3131_v61 = vpop.permute.xlu0 %168 }
  0xb6   :  { %6136 = vst [vmem:[#allocation62_spill] sm:$0xff] %v3129_v60 }
  0xb7   :  { %6137 = vst [vmem:[#allocation63_spill] sm:$0xff] %v3131_v61 }
  0xba   :  { %452 = vrot.lane.b32.xlu1 %v2967_v22, %s2773_s12  ;;  %454 = vrot.lane.b32.xlu2 %v2991_v27, %s2773_s12 }
  0xbb   :  { %450 = vrot.lane.b32.xlu0 %v2963_v21, %s2773_s12 }
  0xbc   :  { %v3139_v62 = vpop.permute.xlu1 %176  ;;  %v3141_v63 = vpop.permute.xlu2 %292 }
  0xbd   :  { %6138 = vst [vmem:[#allocation64_spill] sm:$0xff] %v3139_v62  ;;  %v3143_v56 = vpop.permute.xlu0 %174 }
  0xbe   :  { %6139 = vst [vmem:[#allocation65_spill] sm:$0xff] %v3141_v63 }
  0xbf   :  { %6140 = vst [vmem:[#allocation66_spill] sm:$0xff] %v3143_v56 }
  0xc2   :  { %458 = vrot.lane.b32.xlu1 %v2987_v26, %s2773_s12  ;;  %460 = vrot.lane.b32.xlu2 %v3011_v31, %s2773_s12 }
  0xc3   :  { %456 = vrot.lane.b32.xlu0 %v2983_v25, %s2773_s12 }
  0xc4   :  { %v3151_v59 = vpop.permute.xlu1 %182  ;;  %v3153_v42 = vpop.permute.xlu2 %298 }
  0xc5   :  { %6141 = vst [vmem:[#allocation67_spill] sm:$0xff] %v3151_v59  ;;  %v3155_v53 = vpop.permute.xlu0 %180 }
  0xc6   :  { %6142 = vst [vmem:[#allocation68_spill] sm:$0xff] %v3153_v42 }
  0xc7   :  { %6143 = vst [vmem:[#allocation69_spill] sm:$0xff] %v3155_v53 }
  0xca   :  { %464 = vrot.lane.b32.xlu1 %v3007_v30, %s2773_s12  ;;  %466 = vrot.lane.b32.xlu2 %v3035_v37, %s2773_s12 }
  0xcb   :  { %462 = vrot.lane.b32.xlu0 %v3003_v29, %s2773_s12 }
  0xcc   :  { %v3163_v62 = vpop.permute.xlu1 %284  ;;  %v3165_v50 = vpop.permute.xlu2 %304 }
  0xcd   :  { %6144 = vst [vmem:[#allocation70_spill] sm:$0xff] %v3163_v62  ;;  %v3167_v56 = vpop.permute.xlu0 %282 }
  0xce   :  { %6145 = vst [vmem:[#allocation71_spill] sm:$0xff] %v3165_v50 }
  0xcf   :  { %6146 = vst [vmem:[#allocation72_spill] sm:$0xff] %v3167_v56 }
  0xd2   :  { %470 = vrot.lane.b32.xlu1 %v3031_v36, %s2773_s12 }
  0xd3   :  { %468 = vrot.lane.b32.xlu0 %v3027_v35, %s2773_s12 }
  0xd4   :  { %v3173_v59 = vpop.permute.xlu1 %290  ;;  %v3175_v53 = vpop.permute.xlu2 %310 }
  0xd5   :  { %6147 = vst [vmem:[#allocation73_spill] sm:$0xff] %v3175_v53  ;;  %v3177_v48 = vpop.permute.xlu0 %288 }
  0xd6   :  { %6148 = vst [vmem:[#allocation74_spill] sm:$0xff] %v3177_v48 }
  0xdc   :  { %v3179_v61 = vpop.permute.xlu1 %296  ;;  %v3181_v45 = vpop.permute.xlu2 %348 }
  0xdd   :  { %6149 = vst [vmem:[#allocation75_spill] sm:$0xff] %v3181_v45  ;;  %v3183_v58 = vpop.permute.xlu0 %294 }
  0xde   :  { %6150 = vst [vmem:[#allocation76_spill] sm:$0xff] %v3183_v58 }
  0xe4   :  { %v3185_v55 = vpop.permute.xlu1 %302  ;;  %v3187_v54 = vpop.permute.xlu2 %354 }
  0xe5   :  { %v3189_v51 = vpop.permute.xlu0 %300 }
  0xe6   :  { %6151 = vst [vmem:[#allocation77_spill] sm:$0xff] %v3189_v51 }
  0xec   :  { %v3191_v52 = vpop.permute.xlu1 %308  ;;  %v3193_v49 = vpop.permute.xlu2 %360 }
  0xed   :  { %v3195_v46 = vpop.permute.xlu0 %306 }
  0xee   :  { %6152 = vst [vmem:[#allocation78_spill] sm:$0xff] %v3195_v46 }
  0xf4   :  { %v3197_v43 = vpop.permute.xlu1 %346  ;;  %v3199_v39 = vpop.permute.xlu2 %366 }
  0xf5   :  { %6153 = vst [vmem:[#allocation79_spill] sm:$0xff] %v3197_v43  ;;  %v3201_v34 = vpop.permute.xlu0 %344 }
  0xf6   :  { %6154 = vst [vmem:[#allocation80_spill] sm:$0xff] %v3201_v34 }
  0xfc   :  { %v3203_v38 = vpop.permute.xlu1 %352  ;;  %v3205_v32 = vpop.permute.xlu2 %372 }
  0xfd   :  { %6155 = vst [vmem:[#allocation81_spill] sm:$0xff] %v3203_v38  ;;  %v3207_v28 = vpop.permute.xlu0 %350 }
  0xfe   :  { %6156 = vst [vmem:[#allocation82_spill] sm:$0xff] %v3207_v28 }
 0x104   :  { %v3212_v20 = vpop.permute.xlu1 %358  ;;  %v3214_v40 = vpop.permute.xlu2 %442 }
 0x105   :  { %6157 = vst [vmem:[#allocation83_spill] sm:$0xff] %v3212_v20  ;;  %v3216_v15 = vpop.permute.xlu0 %356  ;;  %v553_v14 = vsub.f32 %v3210_v24, %v3214_v40 }
 0x106   :  { %6158 = vst [vmem:[#allocation84_spill] sm:$0xff] %v3214_v40 }
 0x107   :  { %6159 = vst [vmem:[#allocation85_spill] sm:$0xff] %v3216_v15  ;;  %586 = vrot.lane.b32.xlu0 %v553_v14, %s2776_s13 }
 0x10c   :  { %v3224_v13 = vpop.permute.xlu1 %364  ;;  %v3226_v11 = vpop.permute.xlu2 %448 }
 0x10d   :  { %6160 = vst [vmem:[#allocation86_spill] sm:$0xff] %v3224_v13  ;;  %v3228_v44 = vpop.permute.xlu0 %362  ;;  %v556_v10 = vsub.f32 %v3222_v47, %v3226_v11 }
 0x10e   :  { %6161 = vst [vmem:[#allocation87_spill] sm:$0xff] %v3226_v11  ;;  %v696_v11 = vmul.f32 4.0, %v2933_v16  ;;  %v3290_v16 = vmul.f32 3.0, %v2967_v22 }
 0x10f   :  { %6162 = vst [vmem:[#allocation88_spill] sm:$0xff] %v3228_v44  ;;  %592 = vrot.lane.b32.xlu0 %v556_v10, %s2776_s13 }
 0x110   :  { %v712_v40 = vsub.f32 %v696_v11, %v3117_v57 }
 0x114   :  { %v3236_v41 = vpop.permute.xlu1 %370  ;;  %v3238_v14 = vpop.permute.xlu2 %454 }
 0x115   :  { %6163 = vst [vmem:[#allocation89_spill] sm:$0xff] %v3236_v41  ;;  %v3240_v7 = vpop.permute.xlu0 %368  ;;  %v559_v4 = vsub.f32 %v3234_v8, %v3238_v14 }
 0x116   :  { %6164 = vst [vmem:[#allocation90_spill] sm:$0xff] %v3238_v14 }
 0x117   :  { %6165 = vst [vmem:[#allocation91_spill] sm:$0xff] %v3240_v7  ;;  %598 = vrot.lane.b32.xlu0 %v559_v4, %s2776_s13  ;;  %v3264_v4 = vmul.f32 3.0, %v2947_v18 }
 0x11c   :  { %v3251_v10 = vpop.permute.xlu1 %440  ;;  %v3253_v5 = vpop.permute.xlu2 %460 }
 0x11d   :  { %6167 = vst [vmem:[#allocation93_spill] sm:$0xff] %v3251_v10  ;;  %v552_v12 = vsub.f32 %v3246_v0, %v3251_v10  ;;  %v3257_v1 = vpop.permute.xlu0 %374  ;;  %v562_v9 = vsub.f32 %v3249_v33, %v3253_v5 }
 0x11e   :  { %6168 = vst [vmem:[#allocation94_spill] sm:$0xff] %v3253_v5 }
 0x11f   :  { %6169 = vst [vmem:[#allocation95_spill] sm:$0xff] %v3257_v1  ;;  %604 = vrot.lane.b32.xlu0 %v562_v9, %s2776_s13  ;;  %584 = vrot.lane.b32.xlu2 %v552_v12, %s2776_s13 }
 0x124   :  { %v3272_v2 = vpop.permute.xlu1 %446  ;;  %v3274_v14 = vpop.permute.xlu2 %466 }
 0x125   :  { %6170 = vst [vmem:[#allocation96_spill] sm:$0xff] %v3272_v2  ;;  %v555_v9 = vsub.f32 %v3264_v4, %v3272_v2  ;;  %v3279_v5 = vpop.permute.xlu0 %444  ;;  %v565_v12 = vsub.f32 %v3267_v6, %v3274_v14  ;;  %v3293_v2 = vmul.f32 3.0, %v2963_v21 }
 0x126   :  { %6171 = vst [vmem:[#allocation97_spill] sm:$0xff] %v3274_v14  ;;  %v554_v10 = vsub.f32 %v3270_v3, %v3279_v5  ;;  %v699_v14 = vmul.f32 4.0, %v2947_v18 }
 0x127   :  { %6172 = vst [vmem:[#allocation98_spill] sm:$0xff] %v3279_v5  ;;  %610 = vrot.lane.b32.xlu0 %v565_v12, %s2776_s13  ;;  %590 = vrot.lane.b32.xlu2 %v555_v9, %s2776_s13  ;;  %v3299_v5 = vsub.f32 %v712_v40, %v3201_v34  ;;  %v3313_v40 = vmul.f32 3.0, %v2987_v26  ;;  %v3316_v34 = vmul.f32 3.0, %v2983_v25 }
 0x128   :  { %588 = vrot.lane.b32.xlu1 %v554_v10, %s2776_s13  ;;  %v715_v10 = vsub.f32 %v699_v14, %v3129_v60 }
 0x12a   :  { %v3322_v18 = vsub.f32 %v715_v10, %v3207_v28  ;;  %v3336_v10 = vmul.f32 3.0, %v3007_v30  ;;  %v3339_v28 = vmul.f32 3.0, %v3003_v29 }
 0x12c   :  { %v3295_v33 = vpop.permute.xlu1 %452 }
 0x12d   :  { %6173 = vst [vmem:[#allocation99_spill] sm:$0xff] %v3295_v33  ;;  %v558_v9 = vsub.f32 %v3290_v16, %v3295_v33  ;;  %v3303_v12 = vpop.permute.xlu0 %450  ;;  %v702_v33 = vmul.f32 4.0, %v2967_v22 }
 0x12e   :  { %6174 = vst [vmem:[#allocation100_spill] sm:$0xff] %v3303_v12  ;;  %v557_v11 = vsub.f32 %v3293_v2, %v3303_v12 }
 0x12f   :  { %760 = vrot.lane.b32.xlu0 %v3299_v5, %s2773_s12  ;;  %596 = vrot.lane.b32.xlu2 %v558_v9, %s2776_s13 }
 0x130   :  { %594 = vrot.lane.b32.xlu1 %v557_v11, %s2776_s13  ;;  %v718_v11 = vsub.f32 %v702_v33, %v3141_v63 }
 0x132   :  { %v3345_v22 = vsub.f32 %v718_v11, %v3216_v15  ;;  %v3359_v11 = vmul.f32 3.0, %v3031_v36  ;;  %v3362_v15 = vmul.f32 3.0, %v3027_v35 }
 0x134   :  { %v3318_v57 = vpop.permute.xlu1 %458 }
 0x135   :  { %6175 = vst [vmem:[#allocation101_spill] sm:$0xff] %v3318_v57  ;;  %v561_v9 = vsub.f32 %v3313_v40, %v3318_v57  ;;  %v3326_v12 = vpop.permute.xlu0 %456  ;;  %v705_v57 = vmul.f32 4.0, %v2987_v26  ;;  %v708_v26 = vmul.f32 4.0, %v3007_v30  ;;  %v701_v30 = vmul.f32 4.0, %v2963_v21 }
 0x136   :  { %6176 = vst [vmem:[#allocation102_spill] sm:$0xff] %v3326_v12  ;;  %v560_v14 = vsub.f32 %v3316_v34, %v3326_v12 }
 0x137   :  { %766 = vrot.lane.b32.xlu0 %v3322_v18, %s2773_s12  ;;  %602 = vrot.lane.b32.xlu2 %v561_v9, %s2776_s13 }
 0x138   :  { %600 = vrot.lane.b32.xlu1 %v560_v14, %s2776_s13  ;;  %v721_v14 = vsub.f32 %v705_v57, %v3153_v42  ;;  %v697_v42 = vmul.f32 4.0, %v2951_v19 }
 0x13c   :  { %v3341_v60 = vpop.permute.xlu1 %464 }
 0x13d   :  { %6177 = vst [vmem:[#allocation103_spill] sm:$0xff] %v3341_v60  ;;  %v564_v9 = vsub.f32 %v3336_v10, %v3341_v60  ;;  %v3349_v12 = vpop.permute.xlu0 %462  ;;  %v698_v60 = vmul.f32 4.0, %v2943_v17  ;;  %v711_v17 = vmul.f32 4.0, %v3031_v36 }
 0x13e   :  { %6178 = vst [vmem:[#allocation104_spill] sm:$0xff] %v3349_v12  ;;  %v563_v33 = vsub.f32 %v3339_v28, %v3349_v12  ;;  %v3369_v12 = vsub.f32 %v721_v14, %v3228_v44  ;;  %v724_v44 = vsub.f32 %v708_v26, %v3165_v50  ;;  %v700_v26 = vmul.f32 4.0, %v2971_v23 }
 0x13f   :  { %772 = vrot.lane.b32.xlu0 %v3345_v22, %s2773_s12  ;;  %608 = vrot.lane.b32.xlu2 %v564_v9, %s2776_s13  ;;  %v714_v14 = vsub.f32 %v698_v60, %v3163_v62  ;;  %v727_v60 = vsub.f32 %v711_v17, %v3175_v53  ;;  %v703_v17 = vmul.f32 4.0, %v2991_v27  ;;  %v709_v50 = vmul.f32 4.0, %v3035_v37 }
 0x140   :  { %606 = vrot.lane.b32.xlu1 %v563_v33, %s2776_s13  ;;  %6180 = vst [vmem:[#allocation106_spill] sm:$0xff] %v3369_v12 }
 0x144   :  { %v3364_v63 = vpop.permute.xlu1 %470 }
 0x145   :  { %6179 = vst [vmem:[#allocation105_spill] sm:$0xff] %v3364_v63  ;;  %v567_v9 = vsub.f32 %v3359_v11, %v3364_v63  ;;  %v3373_v33 = vpop.permute.xlu0 %468  ;;  %v713_v63 = vsub.f32 %v697_v42, %v3167_v56  ;;  %v717_v42 = vsub.f32 %v701_v30, %v3173_v59 }
 0x146   :  { %6181 = vst [vmem:[#allocation107_spill] sm:$0xff] %v3373_v33  ;;  %v566_v57 = vsub.f32 %v3362_v15, %v3373_v33  ;;  %v3388_v33 = vsub.f32 %v714_v14, %v3181_v45  ;;  %v3411_v14 = vsub.f32 %v727_v60, %v3257_v1  ;;  %v706_v1 = vmul.f32 4.0, %v3011_v31 }
 0x147   :  { %778 = vrot.lane.b32.xlu0 %v3369_v12, %s2773_s12  ;;  %614 = vrot.lane.b32.xlu2 %v567_v9, %s2776_s13  ;;  %v3391_v12 = vsub.f32 %v724_v44, %v3240_v7  ;;  %v3394_v9 = vsub.f32 %v713_v63, %v3197_v43  ;;  %v716_v44 = vsub.f32 %v700_v26, %v3177_v48  ;;  %v704_v63 = vmul.f32 4.0, %v2983_v25 }
 0x148   :  { %612 = vrot.lane.b32.xlu1 %v566_v57, %s2776_s13  ;;  %v3408_v57 = vsub.f32 %v717_v42, %v3187_v54  ;;  %v719_v26 = vsub.f32 %v703_v17, %v3183_v58  ;;  %v707_v42 = vmul.f32 4.0, %v3003_v29  ;;  %v722_v17 = vsub.f32 %v706_v1, %v3189_v51 }
 0x149   :  { %v3414_v7 = vsub.f32 %v716_v44, %v3203_v38  ;;  %v720_v30 = vsub.f32 %v704_v63, %v3179_v61  ;;  %v6009_v45 = vmov 2  }
 0x14a   :  { %v3430_v44 = vsub.f32 %v719_v26, %v3212_v20  ;;  %v723_v63 = vsub.f32 %v707_v42, %v3185_v55  ;;  %v3446_v53 = vsub.f32 %v722_v17, %v3224_v13  ;;  %v725_v42 = vsub.f32 %v709_v50, %v3195_v46 }
 0x14b   :  { %v3427_v60 = vsub.f32 %v720_v30, %v3193_v49  ;;  %v710_v30 = vmul.f32 4.0, %v3027_v35 }
 0x14c   :  { %v3443_v26 = vsub.f32 %v723_v63, %v3199_v39  ;;  %v3461_v17 = vsub.f32 %v725_v42, %v3236_v41 }
 0x14d   :  { %v726_v1 = vsub.f32 %v710_v30, %v3191_v52 }
 0x14f   :  { %784 = vrot.lane.b32.xlu0 %v3391_v12, %s2773_s12  ;;  %764 = vrot.lane.b32.xlu2 %v3388_v33, %s2773_s12  ;;  %v3458_v63 = vsub.f32 %v726_v1, %v3205_v32 }
 0x150   :  { %762 = vrot.lane.b32.xlu1 %v3394_v9, %s2773_s12 }
 0x157   :  { %790 = vrot.lane.b32.xlu0 %v3411_v14, %s2773_s12  ;;  %770 = vrot.lane.b32.xlu2 %v3408_v57, %s2773_s12 }
 0x158   :  { %768 = vrot.lane.b32.xlu1 %v3414_v7, %s2773_s12 }
 0x15f   :  { %860 = vrot.lane.b32.xlu0 %v3270_v3, %s2775_s11  ;;  %776 = vrot.lane.b32.xlu2 %v3427_v60, %s2773_s12 }
 0x160   :  { %774 = vrot.lane.b32.xlu1 %v3430_v44, %s2773_s12 }
 0x167   :  { %866 = vrot.lane.b32.xlu0 %v3293_v2, %s2775_s11  ;;  %782 = vrot.lane.b32.xlu2 %v3443_v26, %s2773_s12 }
 0x168   :  { %780 = vrot.lane.b32.xlu1 %v3446_v53, %s2773_s12 }
 0x16f   :  { %872 = vrot.lane.b32.xlu0 %v3316_v34, %s2775_s11  ;;  %788 = vrot.lane.b32.xlu2 %v3458_v63, %s2773_s12 }
 0x170   :  { %786 = vrot.lane.b32.xlu1 %v3461_v17, %s2773_s12 }
 0x177   :  { %878 = vrot.lane.b32.xlu0 %v3339_v28, %s2775_s11  ;;  %858 = vrot.lane.b32.xlu2 %v3210_v24, %s2775_s11 }
 0x178   :  { %856 = vrot.lane.b32.xlu1 %v3246_v0, %s2775_s11 }
 0x179   :  { %v3475_v50 = vpop.permute.xlu0 %586  ;;  %v3477_v30 = vpop.permute.xlu2 %584 }
 0x17a   :  { %6182 = vst [vmem:[#allocation108_spill] sm:$0xff] %v3477_v30 }
 0x17f   :  { %884 = vrot.lane.b32.xlu0 %v3362_v15, %s2775_s11  ;;  %864 = vrot.lane.b32.xlu2 %v3222_v47, %s2775_s11 }
 0x180   :  { %862 = vrot.lane.b32.xlu1 %v3264_v4, %s2775_s11 }
 0x181   :  { %v3485_v1 = vpop.permute.xlu0 %592  ;;  %v3487_v42 = vpop.permute.xlu2 %590 }
 0x182   :  { %6183 = vst [vmem:[#allocation109_spill] sm:$0xff] %v3485_v1  ;;  %v6186_v1 = vld [vmem:[#allocation92_spill] sm:$0xff] }
 0x183   :  { %6184 = vst [vmem:[#allocation110_spill] sm:$0xff] %v3487_v42 }
 0x187   :  { %922 = vrot.lane.b32.xlu0 %v3210_v24, %s2776_s13  ;;  %870 = vrot.lane.b32.xlu2 %v3234_v8, %s2775_s11 }
 0x188   :  { %868 = vrot.lane.b32.xlu1 %v3290_v16, %s2775_s11 }
 0x189   :  { %v3495_v30 = vpop.permute.xlu0 %598  ;;  %v3497_v41 = vpop.permute.xlu2 %596 }
 0x18a   :  { %6185 = vst [vmem:[#allocation111_spill] sm:$0xff] %v3495_v30 }
 0x18f   :  { %928 = vrot.lane.b32.xlu0 %v3222_v47, %s2776_s13  ;;  %876 = vrot.lane.b32.xlu2 %v6186_v1, %s2775_s11 }
 0x190   :  { %874 = vrot.lane.b32.xlu1 %v3313_v40, %s2775_s11 }
 0x191   :  { %v3505_v42 = vpop.permute.xlu0 %604  ;;  %v3507_v46 = vpop.permute.xlu2 %602 }
 0x192   :  { %6187 = vst [vmem:[#allocation92_spill] sm:$0xff] %v3505_v42 }
 0x197   :  { %934 = vrot.lane.b32.xlu0 %v3234_v8, %s2776_s13  ;;  %882 = vrot.lane.b32.xlu2 %v3267_v6, %s2775_s11 }
 0x198   :  { %880 = vrot.lane.b32.xlu1 %v3336_v10, %s2775_s11 }
 0x199   :  { %v3515_v30 = vpop.permute.xlu0 %610  ;;  %v3517_v13 = vpop.permute.xlu2 %608 }
 0x19a   :  { %6188 = vst [vmem:[#allocation112_spill] sm:$0xff] %v3515_v30  ;;  %v3519_v51 = vpop.permute.xlu1 %588 }
 0x19b   :  { %6189 = vst [vmem:[#allocation113_spill] sm:$0xff] %v3519_v51 }
 0x19f   :  { %940 = vrot.lane.b32.xlu0 %v6186_v1, %s2776_s13  ;;  %920 = vrot.lane.b32.xlu2 %v3246_v0, %s2776_s13 }
 0x1a0   :  { %886 = vrot.lane.b32.xlu1 %v3359_v11, %s2775_s11 }
 0x1a1   :  { %v3527_v42 = vpop.permute.xlu0 %760  ;;  %v3529_v20 = vpop.permute.xlu2 %614 }
 0x1a2   :  { %v3531_v58 = vpop.permute.xlu1 %594 }
 0x1a3   :  { %6190 = vst [vmem:[#allocation114_spill] sm:$0xff] %v3531_v58 }
 0x1a7   :  { %946 = vrot.lane.b32.xlu0 %v3267_v6, %s2776_s13  ;;  %926 = vrot.lane.b32.xlu2 %v3264_v4, %s2776_s13 }
 0x1a8   :  { %924 = vrot.lane.b32.xlu1 %v3270_v3, %s2776_s13 }
 0x1a9   :  { %v3539_v30 = vpop.permute.xlu0 %766  ;;  %v3541_v51 = vpop.permute.xlu2 %764 }
 0x1aa   :  { %6191 = vst [vmem:[#allocation115_spill] sm:$0xff] %v3539_v30  ;;  %v3543_v38 = vpop.permute.xlu1 %600 }
 0x1ab   :  { %6192 = vst [vmem:[#allocation116_spill] sm:$0xff] %v3541_v51 }
 0x1ac   :  { %6193 = vst [vmem:[#allocation117_spill] sm:$0xff] %v3543_v38 }
 0x1af   :  { %1000 = vrot.lane.b32.xlu0 %v3299_v5, %s2774_s10  ;;  %932 = vrot.lane.b32.xlu2 %v3290_v16, %s2776_s13 }
 0x1b0   :  { %930 = vrot.lane.b32.xlu1 %v3293_v2, %s2776_s13 }
 0x1b1   :  { %v3551_v58 = vpop.permute.xlu0 %772  ;;  %v3553_v48 = vpop.permute.xlu2 %770 }
 0x1b2   :  { %6194 = vst [vmem:[#allocation118_spill] sm:$0xff] %v3551_v58  ;;  %v3555_v43 = vpop.permute.xlu1 %606 }
 0x1b3   :  { %6195 = vst [vmem:[#allocation119_spill] sm:$0xff] %v3555_v43 }
 0x1b7   :  { %1006 = vrot.lane.b32.xlu0 %v3322_v18, %s2774_s10  ;;  %938 = vrot.lane.b32.xlu2 %v3313_v40, %s2776_s13 }
 0x1b8   :  { %936 = vrot.lane.b32.xlu1 %v3316_v34, %s2776_s13 }
 0x1b9   :  { %v3563_v5 = vpop.permute.xlu0 %778  ;;  %v3565_v30 = vpop.permute.xlu2 %776 }
 0x1ba   :  { %6196 = vst [vmem:[#allocation120_spill] sm:$0xff] %v3563_v5  ;;  %v3567_v51 = vpop.permute.xlu1 %612  ;;  %v6200_v5 = vld [vmem:[#allocation106_spill] sm:$0xff] }
 0x1bb   :  { %6197 = vst [vmem:[#allocation121_spill] sm:$0xff] %v3567_v51 }
 0x1bf   :  { %1012 = vrot.lane.b32.xlu0 %v3345_v22, %s2774_s10  ;;  %944 = vrot.lane.b32.xlu2 %v3336_v10, %s2776_s13 }
 0x1c0   :  { %942 = vrot.lane.b32.xlu1 %v3339_v28, %s2776_s13 }
 0x1c1   :  { %v3575_v18 = vpop.permute.xlu0 %784  ;;  %v3577_v58 = vpop.permute.xlu2 %782 }
 0x1c2   :  { %6198 = vst [vmem:[#allocation122_spill] sm:$0xff] %v3575_v18  ;;  %v3579_v43 = vpop.permute.xlu1 %762 }
 0x1c3   :  { %6199 = vst [vmem:[#allocation123_spill] sm:$0xff] %v3579_v43 }
 0x1c7   :  { %1018 = vrot.lane.b32.xlu0 %v6200_v5, %s2774_s10  ;;  %950 = vrot.lane.b32.xlu2 %v3359_v11, %s2776_s13 }
 0x1c8   :  { %948 = vrot.lane.b32.xlu1 %v3362_v15, %s2776_s13 }
 0x1c9   :  { %v3587_v22 = vpop.permute.xlu0 %790  ;;  %v3589_v51 = vpop.permute.xlu2 %788 }
 0x1ca   :  { %6201 = vst [vmem:[#allocation106_spill] sm:$0xff] %v3587_v22  ;;  %v3591_v38 = vpop.permute.xlu1 %768  ;;  %v6209_v22 = vld [vmem:[#allocation19_spill] sm:$0xff] }
 0x1cb   :  { %6202 = vst [vmem:[#allocation124_spill] sm:$0xff] %v3591_v38 }
 0x1cf   :  { %1024 = vrot.lane.b32.xlu0 %v3391_v12, %s2774_s10  ;;  %1004 = vrot.lane.b32.xlu2 %v3388_v33, %s2774_s10 }
 0x1d0   :  { %1002 = vrot.lane.b32.xlu1 %v3394_v9, %s2774_s10 }
 0x1d1   :  { %v3599_v5 = vpop.permute.xlu0 %860  ;;  %v3601_v18 = vpop.permute.xlu2 %858 }
 0x1d2   :  { %6203 = vst [vmem:[#allocation125_spill] sm:$0xff] %v3599_v5  ;;  %v3603_v43 = vpop.permute.xlu1 %774  ;;  %v6208_v5 = vld [vmem:[#allocation98_spill] sm:$0xff] }
 0x1d3   :  { %6204 = vst [vmem:[#allocation126_spill] sm:$0xff] %v3603_v43  ;;  %v3619_v38 = vsub.f32 %v6209_v22, %v6208_v5  ;;  %v6236_v43 = vld [vmem:[#allocation96_spill] sm:$0xff] }
 0x1d5   :  { %6210 = vst [vmem:[#allocation98_spill] sm:$0xff] %v3619_v38 }
 0x1d7   :  { %1030 = vrot.lane.b32.xlu0 %v3411_v14, %s2774_s10  ;;  %1010 = vrot.lane.b32.xlu2 %v3408_v57, %s2774_s10 }
 0x1d8   :  { %1008 = vrot.lane.b32.xlu1 %v3414_v7, %s2774_s10 }
 0x1d9   :  { %v3611_v12 = vpop.permute.xlu0 %866  ;;  %v3613_v33 = vpop.permute.xlu2 %864 }
 0x1da   :  { %6205 = vst [vmem:[#allocation127_spill] sm:$0xff] %v3611_v12  ;;  %v3615_v9 = vpop.permute.xlu1 %780 }
 0x1db   :  { %6206 = vst [vmem:[#allocation128_spill] sm:$0xff] %v3613_v33  ;;  %v6214_v33 = vld [vmem:[#allocation100_spill] sm:$0xff] }
 0x1dc   :  { %6207 = vst [vmem:[#allocation129_spill] sm:$0xff] %v3615_v9  ;;  %v3635_v12 = vsub.f32 %v2963_v21, %v6214_v33  ;;  %v6229_v9 = vld [vmem:[#allocation18_spill] sm:$0xff] }
 0x1de   :  { %6215 = vst [vmem:[#allocation100_spill] sm:$0xff] %v3635_v12 }
 0x1df   :  { %1100 = vrot.lane.b32.xlu0 %v3619_v38, %s2775_s11  ;;  %1016 = vrot.lane.b32.xlu2 %v3427_v60, %s2774_s10 }
 0x1e0   :  { %1014 = vrot.lane.b32.xlu1 %v3430_v44, %s2774_s10 }
 0x1e1   :  { %v3627_v7 = vpop.permute.xlu0 %872  ;;  %v3629_v57 = vpop.permute.xlu2 %870 }
 0x1e2   :  { %6211 = vst [vmem:[#allocation130_spill] sm:$0xff] %v3627_v7  ;;  %v3631_v14 = vpop.permute.xlu1 %786 }
 0x1e3   :  { %6212 = vst [vmem:[#allocation131_spill] sm:$0xff] %v3629_v57  ;;  %v6219_v57 = vld [vmem:[#allocation102_spill] sm:$0xff] }
 0x1e4   :  { %6213 = vst [vmem:[#allocation132_spill] sm:$0xff] %v3631_v14  ;;  %v3651_v7 = vsub.f32 %v2983_v25, %v6219_v57  ;;  %v6226_v57 = vld [vmem:[#allocation104_spill] sm:$0xff]  ;;  %v6228_v14 = vld [vmem:[#allocation93_spill] sm:$0xff] }
 0x1e6   :  { %6220 = vst [vmem:[#allocation102_spill] sm:$0xff] %v3651_v7 }
 0x1e7   :  { %1106 = vrot.lane.b32.xlu0 %v3635_v12, %s2775_s11  ;;  %1022 = vrot.lane.b32.xlu2 %v3443_v26, %s2774_s10 }
 0x1e8   :  { %1020 = vrot.lane.b32.xlu1 %v3446_v53, %s2774_s10 }
 0x1e9   :  { %v3643_v60 = vpop.permute.xlu0 %878  ;;  %v3645_v44 = vpop.permute.xlu2 %876 }
 0x1ea   :  { %6216 = vst [vmem:[#allocation133_spill] sm:$0xff] %v3643_v60  ;;  %v3647_v5 = vpop.permute.xlu1 %856 }
 0x1eb   :  { %6217 = vst [vmem:[#allocation134_spill] sm:$0xff] %v3645_v44  ;;  %v6224_v44 = vld [vmem:[#allocation84_spill] sm:$0xff] }
 0x1ec   :  { %6218 = vst [vmem:[#allocation135_spill] sm:$0xff] %v3647_v5  ;;  %v3667_v60 = vsub.f32 %v2951_v19, %v6224_v44  ;;  %v3671_v5 = vsub.f32 %v3003_v29, %v6226_v57  ;;  %v6232_v57 = vld [vmem:[#allocation87_spill] sm:$0xff] }
 0x1ee   :  { %6225 = vst [vmem:[#allocation84_spill] sm:$0xff] %v3667_v60 }
 0x1ef   :  { %1112 = vrot.lane.b32.xlu0 %v3651_v7, %s2775_s11  ;;  %1028 = vrot.lane.b32.xlu2 %v3458_v63, %s2774_s10  ;;  %6227 = vst [vmem:[#allocation104_spill] sm:$0xff] %v3671_v5  ;;  %v3675_v63 = vsub.f32 %v6229_v9, %v6228_v14  ;;  %v6234_v14 = vld [vmem:[#allocation107_spill] sm:$0xff] }
 0x1f0   :  { %1026 = vrot.lane.b32.xlu1 %v3461_v17, %s2774_s10 }
 0x1f1   :  { %v3659_v53 = vpop.permute.xlu0 %884  ;;  %v3661_v26 = vpop.permute.xlu2 %882  ;;  %6230 = vst [vmem:[#allocation93_spill] sm:$0xff] %v3675_v63 }
 0x1f2   :  { %6221 = vst [vmem:[#allocation136_spill] sm:$0xff] %v3659_v53  ;;  %v3663_v33 = vpop.permute.xlu1 %862  ;;  %v3691_v53 = vsub.f32 %v2971_v23, %v6232_v57 }
 0x1f3   :  { %6222 = vst [vmem:[#allocation137_spill] sm:$0xff] %v3661_v26 }
 0x1f4   :  { %6223 = vst [vmem:[#allocation138_spill] sm:$0xff] %v3663_v33  ;;  %v3695_v33 = vsub.f32 %v3027_v35, %v6234_v14  ;;  %v6241_v14 = vld [vmem:[#allocation90_spill] sm:$0xff] }
 0x1f5   :  { %6233 = vst [vmem:[#allocation87_spill] sm:$0xff] %v3691_v53  ;;  %v3715_v38 = vsub.f32 %v2991_v27, %v6241_v14  ;;  %v6248_v14 = vld [vmem:[#allocation94_spill] sm:$0xff] }
 0x1f6   :  { %6235 = vst [vmem:[#allocation107_spill] sm:$0xff] %v3695_v33 }
 0x1f7   :  { %1118 = vrot.lane.b32.xlu0 %v3671_v5, %s2775_s11  ;;  %1098 = vrot.lane.b32.xlu2 %v3667_v60, %s2775_s11  ;;  %v6237_v5 = vld [vmem:[#allocation20_spill] sm:$0xff]  ;;  %6242 = vst [vmem:[#allocation90_spill] sm:$0xff] %v3715_v38 }
 0x1f8   :  { %1096 = vrot.lane.b32.xlu1 %v3675_v63, %s2775_s11  ;;  %v3699_v7 = vsub.f32 %v6237_v5, %v6236_v43  ;;  %v6243_v43 = vld [vmem:[#allocation99_spill] sm:$0xff]  ;;  %v6244_v63 = vld [vmem:[#allocation24_spill] sm:$0xff] }
 0x1f9   :  { %v3683_v17 = vpop.permute.xlu0 %922  ;;  %v3685_v44 = vpop.permute.xlu2 %920  ;;  %v3719_v60 = vsub.f32 %v6244_v63, %v6243_v43  ;;  %v6250_v43 = vld [vmem:[#allocation101_spill] sm:$0xff] }
 0x1fa   :  { %6231 = vst [vmem:[#allocation139_spill] sm:$0xff] %v3685_v44  ;;  %v3687_v26 = vpop.permute.xlu1 %868 }
 0x1fb   :  { %6238 = vst [vmem:[#allocation96_spill] sm:$0xff] %v3699_v7 }
 0x1fc   :  { %6245 = vst [vmem:[#allocation99_spill] sm:$0xff] %v3719_v60 }
 0x1ff   :  { %1124 = vrot.lane.b32.xlu0 %v3695_v33, %s2775_s11  ;;  %1104 = vrot.lane.b32.xlu2 %v3691_v53, %s2775_s11  ;;  %v6251_v53 = vld [vmem:[#allocation28_spill] sm:$0xff] }
 0x200   :  { %1102 = vrot.lane.b32.xlu1 %v3699_v7, %s2775_s11  ;;  %v3735_v7 = vsub.f32 %v3011_v31, %v6248_v14  ;;  %v3739_v27 = vsub.f32 %v6251_v53, %v6250_v43  ;;  %v6258_v31 = vld [vmem:[#allocation103_spill] sm:$0xff] }
 0x201   :  { %v3707_v44 = vpop.permute.xlu0 %928  ;;  %v3709_v57 = vpop.permute.xlu2 %926 }
 0x202   :  { %6239 = vst [vmem:[#allocation140_spill] sm:$0xff] %v3707_v44  ;;  %v3711_v12 = vpop.permute.xlu1 %874 }
 0x203   :  { %6240 = vst [vmem:[#allocation141_spill] sm:$0xff] %v3709_v57 }
 0x204   :  { %6249 = vst [vmem:[#allocation94_spill] sm:$0xff] %v3735_v7 }
 0x205   :  { %6252 = vst [vmem:[#allocation101_spill] sm:$0xff] %v3739_v27 }
 0x207   :  { %1162 = vrot.lane.b32.xlu0 %v3210_v24, %s2773_s12  ;;  %1110 = vrot.lane.b32.xlu2 %v3715_v38, %s2775_s11  ;;  %v5993_v24 = vmov 1  }
 0x208   :  { %1108 = vrot.lane.b32.xlu1 %v3719_v60, %s2775_s11  ;;  %2712 = vset.pattern.permute.xlu0 %v5993_v24  ;;  %v6256_v60 = vld [vmem:[#allocation97_spill] sm:$0xff] }
 0x209   :  { %v3727_v44 = vpop.permute.xlu0 %934  ;;  %v3729_v57 = vpop.permute.xlu2 %932  ;;  %2714 = vset.pattern.permute.xlu2 %v5993_v24  ;;  %2713 = vset.pattern.permute.xlu1 %v5993_v24  ;;  %v3758_v38 = vsub.f32 %v3035_v37, %v6256_v60  ;;  %v6264_v60 = vld [vmem:[#allocation105_spill] sm:$0xff] }
 0x20a   :  { %6246 = vst [vmem:[#allocation142_spill] sm:$0xff] %v3727_v44  ;;  %v3731_v33 = vpop.permute.xlu1 %880 }
 0x20b   :  { %6247 = vst [vmem:[#allocation143_spill] sm:$0xff] %v3731_v33 }
 0x20c   :  { %6257 = vst [vmem:[#allocation97_spill] sm:$0xff] %v3758_v38 }
 0x20f   :  { %1168 = vrot.lane.b32.xlu0 %v3222_v47, %s2773_s12  ;;  %1116 = vrot.lane.b32.xlu2 %v3735_v7, %s2775_s11  ;;  %v6259_v47 = vld [vmem:[#allocation32_spill] sm:$0xff]  ;;  %v3778_v7 = vsub.f32 %v3031_v36, %v6264_v60 }
 0x210   :  { %1114 = vrot.lane.b32.xlu1 %v3739_v27, %s2775_s11  ;;  %v3762_v23 = vsub.f32 %v6259_v47, %v6258_v31 }
 0x211   :  { %v3749_v14 = vpop.permute.xlu0 %940  ;;  %v3751_v44 = vpop.permute.xlu2 %938  ;;  %6265 = vst [vmem:[#allocation105_spill] sm:$0xff] %v3778_v7 }
 0x212   :  { %6253 = vst [vmem:[#allocation144_spill] sm:$0xff] %v3749_v14  ;;  %v3754_v43 = vpop.permute.xlu1 %886 }
 0x213   :  { %6254 = vst [vmem:[#allocation145_spill] sm:$0xff] %v3751_v44 }
 0x214   :  { %6255 = vst [vmem:[#allocation146_spill] sm:$0xff] %v3754_v43  ;;  %v6322_v43 = vld [vmem:[#allocation16_spill] sm:$0xff] }
 0x215   :  { %6260 = vst [vmem:[#allocation103_spill] sm:$0xff] %v3762_v23  ;;  %v3943_v36 = vmul.f32 -0.48860252, %v6322_v43 }
 0x217   :  { %1174 = vrot.lane.b32.xlu0 %v3234_v8, %s2773_s12  ;;  %1122 = vrot.lane.b32.xlu2 %v3758_v38, %s2775_s11 }
 0x218   :  { %1120 = vrot.lane.b32.xlu1 %v3762_v23, %s2775_s11  ;;  %v6306_v23 = vld [vmem:[#allocation10_spill] sm:$0xff] }
 0x219   :  { %v3770_v24 = vpop.permute.xlu0 %946  ;;  %v3772_v14 = vpop.permute.xlu2 %944  ;;  %v3905_v38 = vmul.f32 -0.48860252, %v6306_v23 }
 0x21a   :  { %6261 = vst [vmem:[#allocation147_spill] sm:$0xff] %v3770_v24  ;;  %v3774_v27 = vpop.permute.xlu1 %924 }
 0x21b   :  { %6262 = vst [vmem:[#allocation148_spill] sm:$0xff] %v3772_v14 }
 0x21c   :  { %6263 = vst [vmem:[#allocation149_spill] sm:$0xff] %v3774_v27 }
 0x21f   :  { %1180 = vrot.lane.b32.xlu0 %v6186_v1, %s2773_s12  ;;  %1160 = vrot.lane.b32.xlu2 %v3246_v0, %s2773_s12 }
 0x220   :  { %1126 = vrot.lane.b32.xlu1 %v3778_v7, %s2775_s11 }
 0x221   :  { %v3786_v8 = vpop.permute.xlu0 %1000  ;;  %v3788_v31 = vpop.permute.xlu2 %950 }
 0x222   :  { %6266 = vst [vmem:[#allocation150_spill] sm:$0xff] %v3786_v8  ;;  %v3790_v24 = vpop.permute.xlu1 %930  ;;  %v6272_v8 = vld [vmem:[#allocation4_spill] sm:$0xff] }
 0x223   :  { %6267 = vst [vmem:[#allocation151_spill] sm:$0xff] %v3788_v31  ;;  %v3805_v27 = vmul.f32 -0.48860252, %v6272_v8 }
 0x224   :  { %6268 = vst [vmem:[#allocation152_spill] sm:$0xff] %v3790_v24 }
 0x227   :  { %1186 = vrot.lane.b32.xlu0 %v3267_v6, %s2773_s12  ;;  %1166 = vrot.lane.b32.xlu2 %v3264_v4, %s2773_s12 }
 0x228   :  { %1164 = vrot.lane.b32.xlu1 %v3270_v3, %s2773_s12 }
 0x229   :  { %v3798_v1 = vpop.permute.xlu0 %1006  ;;  %v3800_v0 = vpop.permute.xlu2 %1004 }
 0x22a   :  { %6269 = vst [vmem:[#allocation153_spill] sm:$0xff] %v3798_v1  ;;  %v3802_v60 = vpop.permute.xlu1 %936  ;;  %v6276_v1 = vld [vmem:[#allocation5_spill] sm:$0xff] }
 0x22b   :  { %6270 = vst [vmem:[#allocation154_spill] sm:$0xff] %v3800_v0  ;;  %v3819_v24 = vmul.f32 -0.48860252, %v6276_v1 }
 0x22c   :  { %6271 = vst [vmem:[#allocation155_spill] sm:$0xff] %v3802_v60 }
 0x22f   :  { %1172 = vrot.lane.b32.xlu2 %v3290_v16, %s2773_s12  ;;  %1247 = vperm.xlu0 %2712, %v3805_v27  }
 0x230   :  { %1170 = vrot.lane.b32.xlu1 %v3293_v2, %s2773_s12 }
 0x231   :  { %v3812_v6 = vpop.permute.xlu0 %1012  ;;  %v3814_v3 = vpop.permute.xlu2 %1010 }
 0x232   :  { %6273 = vst [vmem:[#allocation4_spill] sm:$0xff] %v3812_v6  ;;  %v3816_v4 = vpop.permute.xlu1 %942 }
 0x233   :  { %6274 = vst [vmem:[#allocation156_spill] sm:$0xff] %v3814_v3  ;;  %v6280_v3 = vld [vmem:[#allocation8_spill] sm:$0xff] }
 0x234   :  { %6275 = vst [vmem:[#allocation157_spill] sm:$0xff] %v3816_v4  ;;  %v3833_v6 = vmul.f32 -0.48860252, %v6280_v3 }
 0x237   :  { %1178 = vrot.lane.b32.xlu2 %v3313_v40, %s2773_s12  ;;  %1272 = vperm.xlu0 %2712, %v3819_v24  }
 0x238   :  { %1176 = vrot.lane.b32.xlu1 %v3316_v34, %s2773_s12 }
 0x239   :  { %v3826_v16 = vpop.permute.xlu0 %1018  ;;  %v3828_v2 = vpop.permute.xlu2 %1016 }
 0x23a   :  { %6277 = vst [vmem:[#allocation5_spill] sm:$0xff] %v3826_v16  ;;  %v3830_v8 = vpop.permute.xlu1 %948 }
 0x23b   :  { %6278 = vst [vmem:[#allocation158_spill] sm:$0xff] %v3828_v2  ;;  %v6284_v2 = vld [vmem:[#allocation11_spill] sm:$0xff] }
 0x23c   :  { %6279 = vst [vmem:[#allocation159_spill] sm:$0xff] %v3830_v8  ;;  %v3847_v16 = vmul.f32 -0.48860252, %v6284_v2  ;;  %v6291_v8 = vld [vmem:[#allocation7_spill] sm:$0xff] }
 0x23d   :  { %v3867_v4 = vmul.f32 -0.48860252, %v6291_v8  ;;  %v6298_v8 = vld [vmem:[#allocation6_spill] sm:$0xff] }
 0x23e   :  { %v3886_v0 = vmul.f32 -0.48860252, %v6298_v8 }
 0x23f   :  { %1184 = vrot.lane.b32.xlu2 %v3336_v10, %s2773_s12  ;;  %1287 = vperm.xlu0 %2712, %v3833_v6  }
 0x240   :  { %1182 = vrot.lane.b32.xlu1 %v3339_v28, %s2773_s12 }
 0x241   :  { %v3840_v40 = vpop.permute.xlu0 %1024  ;;  %v3842_v34 = vpop.permute.xlu2 %1022 }
 0x242   :  { %6281 = vst [vmem:[#allocation8_spill] sm:$0xff] %v3840_v40  ;;  %v3844_v1 = vpop.permute.xlu1 %1002 }
 0x243   :  { %6282 = vst [vmem:[#allocation160_spill] sm:$0xff] %v3842_v34  ;;  %v6288_v34 = vld [vmem:[#allocation3_spill] sm:$0xff] }
 0x244   :  { %6283 = vst [vmem:[#allocation161_spill] sm:$0xff] %v3844_v1  ;;  %v3861_v40 = vmul.f32 -0.48860252, %v6288_v34  ;;  %v6290_v1 = vld [vmem:[#allocation14_spill] sm:$0xff] }
 0x245   :  { %v3864_v2 = vmul.f32 -0.48860252, %v6290_v1  ;;  %v6297_v1 = vld [vmem:[#allocation2_spill] sm:$0xff] }
 0x246   :  { %6289 = vst [vmem:[#allocation3_spill] sm:$0xff] %v3861_v40  ;;  %v3883_v60 = vmul.f32 -0.48860252, %v6297_v1 }
 0x247   :  { %1190 = vrot.lane.b32.xlu2 %v3359_v11, %s2773_s12  ;;  %1302 = vperm.xlu0 %2712, %v3847_v16  }
 0x248   :  { %1188 = vrot.lane.b32.xlu1 %v3362_v15, %s2773_s12  ;;  %v6292_v15 = vld [vmem:[#allocation35_spill] sm:$0xff] }
 0x249   :  { %v3854_v10 = vpop.permute.xlu0 %1030  ;;  %v3856_v28 = vpop.permute.xlu2 %1028  ;;  %v3874_v11 = vmul.f32 %v6292_v15, %v6288_v34  ;;  %v6299_v34 = vld [vmem:[#allocation9_spill] sm:$0xff]  ;;  %v6300_v15 = vld [vmem:[#allocation43_spill] sm:$0xff] }
 0x24a   :  { %6285 = vst [vmem:[#allocation11_spill] sm:$0xff] %v3854_v10  ;;  %v3858_v3 = vpop.permute.xlu1 %1008  ;;  %v3902_v8 = vmul.f32 -0.48860252, %v6299_v34 }
 0x24b   :  { %6286 = vst [vmem:[#allocation162_spill] sm:$0xff] %v3856_v28  ;;  %v234_v7 = vmul.f32 -1.0925485, %v3874_v11 }
 0x24c   :  { %6287 = vst [vmem:[#allocation163_spill] sm:$0xff] %v3858_v3 }
 0x24d   :  { %6293 = vst [vmem:[#allocation14_spill] sm:$0xff] %v3874_v11 }
 0x24e   :  { %6305 = vst [vmem:[#allocation165_spill] sm:$0xff] %v3902_v8 }
 0x24f   :  { %1257 = vperm.xlu2 %2714, %v3861_v40   ;;  %1317 = vperm.xlu0 %2712, %v3864_v2   ;;  %v6308_v40 = vld [vmem:[#allocation46_spill] sm:$0xff] }
 0x250   :  { %1252 = vperm.xlu1 %2713, %v3867_v4  }
 0x251   :  { %v3876_v28 = vpop.permute.xlu0 %1100  ;;  %v3878_v10 = vpop.permute.xlu2 %1098 }
 0x252   :  { %6294 = vst [vmem:[#allocation7_spill] sm:$0xff] %v3876_v28  ;;  %v3880_v3 = vpop.permute.xlu1 %1014  ;;  %v3893_v28 = vmul.f32 %v6300_v15, %v6299_v34  ;;  %v6307_v15 = vld [vmem:[#allocation12_spill] sm:$0xff] }
 0x253   :  { %6295 = vst [vmem:[#allocation35_spill] sm:$0xff] %v3878_v10  ;;  %v3912_v37 = vmul.f32 %v6308_v40, %v6307_v15  ;;  %v3921_v23 = vmul.f32 -0.48860252, %v6307_v15  ;;  %v6315_v40 = vld [vmem:[#allocation15_spill] sm:$0xff] }
 0x254   :  { %6296 = vst [vmem:[#allocation164_spill] sm:$0xff] %v3880_v3 }
 0x255   :  { %6301 = vst [vmem:[#allocation2_spill] sm:$0xff] %v3893_v28 }
 0x256   :  { %6309 = vst [vmem:[#allocation10_spill] sm:$0xff] %v3912_v37 }
 0x257   :  { %1267 = vperm.xlu2 %2714, %v3883_v60   ;;  %1629 = vperm.xlu0 %2712, %v234_v7   ;;  %v239_v7 = vmul.f32 -1.0925485, %v3893_v28  ;;  %6313 = vst [vmem:[#allocation167_spill] sm:$0xff] %v3921_v23 }
 0x258   :  { %1262 = vperm.xlu1 %2713, %v3886_v0  }
 0x259   :  { %v3895_v10 = vpop.permute.xlu0 %1106  ;;  %v3897_v3 = vpop.permute.xlu2 %1104 }
 0x25a   :  { %6302 = vst [vmem:[#allocation6_spill] sm:$0xff] %v3895_v10  ;;  %v3899_v1 = vpop.permute.xlu1 %1020  ;;  %v6314_v10 = vld [vmem:[#allocation13_spill] sm:$0xff] }
 0x25b   :  { %6303 = vst [vmem:[#allocation9_spill] sm:$0xff] %v3897_v3  ;;  %v3924_v31 = vmul.f32 -0.48860252, %v6314_v10  ;;  %v3940_v10 = vmul.f32 -0.48860252, %v6315_v40 }
 0x25c   :  { %6304 = vst [vmem:[#allocation43_spill] sm:$0xff] %v3899_v1 }
 0x25d   :  { %6321 = vst [vmem:[#allocation169_spill] sm:$0xff] %v3940_v10 }
 0x25f   :  { %1282 = vperm.xlu2 %2714, %v3902_v8   ;;  %1654 = vperm.xlu0 %2712, %v239_v7   ;;  %v242_v7 = vmul.f32 -1.0925485, %v3912_v37  ;;  %v6316_v8 = vld [vmem:[#allocation49_spill] sm:$0xff] }
 0x260   :  { %1277 = vperm.xlu1 %2713, %v3905_v38  }
 0x261   :  { %v3914_v3 = vpop.permute.xlu0 %1112  ;;  %v3916_v1 = vpop.permute.xlu2 %1110 }
 0x262   :  { %6310 = vst [vmem:[#allocation12_spill] sm:$0xff] %v3914_v3  ;;  %v3918_v34 = vpop.permute.xlu1 %1026  ;;  %v3931_v3 = vmul.f32 %v6316_v8, %v6315_v40  ;;  %v3951_v8 = vld [vmem:[%s5886_s0 + $0x8] sm:$0xff] }
 0x263   :  { %6311 = vst [vmem:[#allocation46_spill] sm:$0xff] %v3916_v1 }
 0x264   :  { %6312 = vst [vmem:[#allocation166_spill] sm:$0xff] %v3918_v34 }
 0x265   :  { %6317 = vst [vmem:[#allocation13_spill] sm:$0xff] %v3931_v3 }
 0x267   :  { %1297 = vperm.xlu2 %2714, %v3921_v23   ;;  %1669 = vperm.xlu0 %2712, %v242_v7   ;;  %v245_v7 = vmul.f32 -1.0925485, %v3931_v3 }
 0x268   :  { %1292 = vperm.xlu1 %2713, %v3924_v31  }
 0x269   :  { %v3933_v1 = vpop.permute.xlu0 %1118  ;;  %v3935_v34 = vpop.permute.xlu2 %1116 }
 0x26a   :  { %6318 = vst [vmem:[#allocation15_spill] sm:$0xff] %v3933_v1  ;;  %v3937_v15 = vpop.permute.xlu1 %1096  ;;  %v6327_v1 = vld [vmem:[#allocation17_spill] sm:$0xff] }
 0x26b   :  { %6319 = vst [vmem:[#allocation49_spill] sm:$0xff] %v3935_v34  ;;  %v3954_v34 = vmul.f32 -0.5900436, %v3951_v8 }
 0x26c   :  { %6320 = vst [vmem:[#allocation168_spill] sm:$0xff] %v3937_v15  ;;  %v3963_v15 = vmul.f32 -0.48860252, %v6327_v1  ;;  %v3978_v1 = vld [vmem:[%s5886_s0 + $0x30] sm:$0xff] }
 0x26d   :  { %6323 = vst [vmem:[#allocation16_spill] sm:$0xff] %v3954_v34  ;;  %v633_v5 = vmul.f32 %v3475_v50, %v3954_v34  ;;  %v4000_v34 = vld [vmem:[%s5886_s0 + $0x10] sm:$0xff] }
 0x26e   :  { %6332 = vst [vmem:[#allocation176_spill] sm:$0xff] %v4000_v34 }
 0x26f   :  { %1312 = vperm.xlu2 %2714, %v3940_v10   ;;  %1684 = vperm.xlu0 %2712, %v245_v7   ;;  %v3968_v7 = vld [vmem:[%s5886_s0] sm:$0xff] }
 0x270   :  { %1307 = vperm.xlu1 %2713, %v3943_v36   ;;  %v40_v10 = vmul.f32 0.48860252, %v3968_v7 }
 0x271   :  { %v3956_v40 = vpop.permute.xlu0 %1124  ;;  %v3958_v23 = vpop.permute.xlu2 %1122 }
 0x272   :  { %6324 = vst [vmem:[#allocation170_spill] sm:$0xff] %v3956_v40  ;;  %v3960_v43 = vpop.permute.xlu1 %1102 }
 0x273   :  { %6325 = vst [vmem:[#allocation171_spill] sm:$0xff] %v3958_v23  ;;  %v3981_v23 = vmul.f32 -0.5900436, %v3978_v1 }
 0x274   :  { %6326 = vst [vmem:[#allocation172_spill] sm:$0xff] %v3960_v43 }
 0x275   :  { %6328 = vst [vmem:[#allocation17_spill] sm:$0xff] %v3981_v23 }
 0x277   :  { %2715 = vset.pattern.permute.xlu2 %v6009_v45  ;;  %2012 = vperm.xlu0 %2712, %v633_v5   ;;  %v3992_v5 = vld [vmem:[%s5886_s0 + $0x18] sm:$0xff]  ;;  %v638_v45 = vmul.f32 %v3497_v41, %v3981_v23 }
 0x278   :  { %1322 = vperm.xlu1 %2713, %v3963_v15   ;;  %1344 = vperm.xlu2 %2715, %v40_v10   ;;  %v43_v10 = vmul.f32 0.48860252, %v3992_v5 }
 0x279   :  { %v3983_v43 = vpop.permute.xlu0 %1162  ;;  %v3985_v40 = vpop.permute.xlu2 %1160 }
 0x27a   :  { %6329 = vst [vmem:[#allocation173_spill] sm:$0xff] %v3983_v43  ;;  %v3987_v50 = vpop.permute.xlu1 %1108  ;;  %v42_v43 = vmul.f32 0.48860252, %v4000_v34 }
 0x27b   :  { %6330 = vst [vmem:[#allocation174_spill] sm:$0xff] %v3985_v40  ;;  %v6333_v40 = vmov 2  }
 0x27c   :  { %6331 = vst [vmem:[#allocation175_spill] sm:$0xff] %v3987_v50  ;;  %v4007_v50 = vld [vmem:[%s5886_s0 + $0x48] sm:$0xff] }
 0x27d   :  { %v4010_v56 = vmul.f32 -0.5900436, %v4007_v50 }
 0x27f   :  { %2037 = vperm.xlu0 %2712, %v638_v45   ;;  %6334 = vst [vmem:[#allocation177_spill] sm:$0xff] %v4010_v56  ;;  %v4021_v45 = vld [vmem:[%s5886_s0 + $0x28] sm:$0xff]  ;;  %v641_v34 = vmul.f32 %v3507_v46, %v4010_v56 }
 0x280   :  { %2716 = vset.pattern.permute.xlu1 %v6333_v40  ;;  %1359 = vperm.xlu2 %2715, %v43_v10   ;;  %v45_v10 = vmul.f32 0.48860252, %v4021_v45 }
 0x281   :  { %1354 = vperm.xlu1 %2716, %v42_v43   ;;  %v4012_v41 = vpop.permute.xlu0 %1168  ;;  %v4014_v23 = vpop.permute.xlu2 %1166  ;;  %v4029_v43 = vld [vmem:[%s5886_s0 + $0x20] sm:$0xff] }
 0x282   :  { %6335 = vst [vmem:[#allocation178_spill] sm:$0xff] %v4012_v41  ;;  %v4016_v14 = vpop.permute.xlu1 %1114  ;;  %v44_v41 = vmul.f32 0.48860252, %v4029_v43 }
 0x283   :  { %6336 = vst [vmem:[#allocation179_spill] sm:$0xff] %v4014_v23  ;;  %v4035_v23 = vld [vmem:[%s5886_s0 + $0x60] sm:$0xff] }
 0x284   :  { %6337 = vst [vmem:[#allocation180_spill] sm:$0xff] %v4016_v14  ;;  %v4038_v14 = vmul.f32 -0.5900436, %v4035_v23 }
 0x286   :  { %6338 = vst [vmem:[#allocation181_spill] sm:$0xff] %v4038_v14  ;;  %v644_v33 = vmul.f32 %v3517_v13, %v4038_v14 }
 0x287   :  { %2052 = vperm.xlu0 %2712, %v641_v34   ;;  %v4049_v34 = vld [vmem:[%s5886_s0 + $0x40] sm:$0xff] }
 0x288   :  { %1369 = vperm.xlu2 %2715, %v45_v10   ;;  %v48_v10 = vmul.f32 0.48860252, %v4049_v34 }
 0x289   :  { %1364 = vperm.xlu1 %2716, %v44_v41   ;;  %v4040_v62 = vpop.permute.xlu0 %1174  ;;  %v4042_v46 = vpop.permute.xlu2 %1172  ;;  %v4057_v41 = vld [vmem:[%s5886_s0 + $0x38] sm:$0xff] }
 0x28a   :  { %6339 = vst [vmem:[#allocation182_spill] sm:$0xff] %v4040_v62  ;;  %v4044_v56 = vpop.permute.xlu1 %1120  ;;  %v47_v62 = vmul.f32 0.48860252, %v4057_v41 }
 0x28b   :  { %6340 = vst [vmem:[#allocation183_spill] sm:$0xff] %v4042_v46 }
 0x28c   :  { %6341 = vst [vmem:[#allocation184_spill] sm:$0xff] %v4044_v56  ;;  %v4063_v56 = vld [vmem:[%s5886_s0 + $0x78] sm:$0xff] }
 0x28d   :  { %6342 = vst [vmem:[#allocation185_spill] sm:$0xff] %v4057_v41  ;;  %v4066_v46 = vmul.f32 -0.5900436, %v4063_v56 }
 0x28f   :  { %2067 = vperm.xlu0 %2712, %v644_v33   ;;  %6343 = vst [vmem:[#allocation186_spill] sm:$0xff] %v4066_v46  ;;  %v4077_v33 = vld [vmem:[%s5886_s0 + $0x58] sm:$0xff]  ;;  %v647_v41 = vmul.f32 %v3529_v20, %v4066_v46  ;;  %v4100_v20 = vld [vmem:[%s5886_s0 + $0x70] sm:$0xff] }
 0x290   :  { %1384 = vperm.xlu2 %2715, %v48_v10   ;;  %v51_v10 = vmul.f32 0.48860252, %v4077_v33  ;;  %v54_v46 = vmul.f32 0.48860252, %v4100_v20 }
 0x291   :  { %1379 = vperm.xlu1 %2716, %v47_v62   ;;  %v4068_v47 = vpop.permute.xlu0 %1180  ;;  %v4070_v13 = vpop.permute.xlu2 %1178  ;;  %v4085_v62 = vld [vmem:[%s5886_s0 + $0x50] sm:$0xff] }
 0x292   :  { %6344 = vst [vmem:[#allocation187_spill] sm:$0xff] %v4068_v47  ;;  %v4072_v14 = vpop.permute.xlu1 %1126  ;;  %v50_v47 = vmul.f32 0.48860252, %v4085_v62 }
 0x293   :  { %6345 = vst [vmem:[#allocation188_spill] sm:$0xff] %v4070_v13 }
 0x294   :  { %6346 = vst [vmem:[#allocation189_spill] sm:$0xff] %v4072_v14  ;;  %v4089_v14 = vmul.f32 -0.4570458, %v3968_v7 }
 0x295   :  { %6347 = vst [vmem:[#allocation190_spill] sm:$0xff] %v4085_v62 }
 0x296   :  { %6348 = vst [vmem:[#allocation191_spill] sm:$0xff] %v4089_v14 }
 0x297   :  { %2082 = vperm.xlu0 %2712, %v647_v41   ;;  %v808_v41 = vmul.f32 %v3527_v42, %v4089_v14  ;;  %v6025_v14 = vmov 0  }
 0x298   :  { %1399 = vperm.xlu2 %2715, %v51_v10  }
 0x299   :  { %1394 = vperm.xlu1 %2716, %v50_v47   ;;  %v4091_v13 = vpop.permute.xlu0 %1186  ;;  %v4093_v22 = vpop.permute.xlu2 %1184  ;;  %v4108_v47 = vld [vmem:[%s5886_s0 + $0x68] sm:$0xff] }
 0x29a   :  { %6349 = vst [vmem:[#allocation192_spill] sm:$0xff] %v4091_v13  ;;  %v4095_v44 = vpop.permute.xlu1 %1164  ;;  %v53_v10 = vmul.f32 0.48860252, %v4108_v47  ;;  %v4112_v13 = vmul.f32 -0.4570458, %v4021_v45 }
 0x29b   :  { %6350 = vst [vmem:[#allocation193_spill] sm:$0xff] %v4093_v22 }
 0x29c   :  { %6351 = vst [vmem:[#allocation194_spill] sm:$0xff] %v4095_v44  ;;  %v813_v42 = vmul.f32 %v3553_v48, %v4112_v13 }
 0x29d   :  { %6352 = vst [vmem:[#allocation195_spill] sm:$0xff] %v4112_v13  ;;  %v6375_v13 = vld [vmem:[#allocation22_spill] sm:$0xff] }
 0x29f   :  { %2201 = vperm.xlu0 %2712, %v808_v41   ;;  %v4124_v41 = vmul.f32 -0.4570458, %v4049_v34 }
 0x2a0   :  { %1414 = vperm.xlu2 %2715, %v54_v46  }
 0x2a1   :  { %1409 = vperm.xlu1 %2716, %v53_v10   ;;  %v4114_v44 = vpop.permute.xlu2 %1190  ;;  %v4116_v22 = vpop.permute.xlu0 %1247  ;;  %6356 = vst [vmem:[#allocation199_spill] sm:$0xff] %v4124_v41  ;;  %v816_v48 = vmul.f32 %v3565_v30, %v4124_v41  ;;  %v4151_v30 = vmul.f32 -0.4570458, %v4100_v20 }
 0x2a2   :  { %6353 = vst [vmem:[#allocation196_spill] sm:$0xff] %v4114_v44  ;;  %v4118_v62 = vpop.permute.xlu1 %1170 }
 0x2a3   :  { %6354 = vst [vmem:[#allocation197_spill] sm:$0xff] %v4116_v22 }
 0x2a4   :  { %6355 = vst [vmem:[#allocation198_spill] sm:$0xff] %v4118_v62 }
 0x2a5   :  { %6362 = vst [vmem:[#allocation205_spill] sm:$0xff] %v4151_v30 }
 0x2a7   :  { %2226 = vperm.xlu0 %2712, %v813_v42   ;;  %v4138_v42 = vmul.f32 -0.4570458, %v4077_v33 }
 0x2a8   :  { %2718 = vset.pattern.permute.xlu2 %v6025_v14 }
 0x2a9   :  { %2717 = vset.pattern.permute.xlu1 %v6025_v14  ;;  %v4127_v46 = vpop.permute.xlu2 %1257  ;;  %1444 = vperm.xlu2 %2718, %v3867_v4   ;;  %v4130_v10 = vpop.permute.xlu0 %1272  ;;  %6359 = vst [vmem:[#allocation202_spill] sm:$0xff] %v4138_v42 }
 0x2aa   :  { %6357 = vst [vmem:[#allocation200_spill] sm:$0xff] %v4127_v46  ;;  %v4132_v44 = vpop.permute.xlu1 %1176  ;;  %1440 = vperm.xlu1 %2717, %v3805_v27   ;;  %v819_v27 = vmul.f32 %v3577_v58, %v4138_v42  ;;  %v49_v42 = vmul.f32 0.48860252, %v4007_v50  ;;  %v6377_v46 = vld [vmem:[#allocation26_spill] sm:$0xff] }
 0x2ab   :  { %6358 = vst [vmem:[#allocation201_spill] sm:$0xff] %v4132_v44 }
 0x2af   :  { %2241 = vperm.xlu0 %2712, %v816_v48  }
 0x2b1   :  { %v4140_v62 = vpop.permute.xlu2 %1267  ;;  %1456 = vperm.xlu2 %2718, %v3883_v60   ;;  %v4143_v14 = vpop.permute.xlu0 %1287 }
 0x2b2   :  { %6360 = vst [vmem:[#allocation203_spill] sm:$0xff] %v4140_v62  ;;  %v4145_v4 = vpop.permute.xlu1 %1182  ;;  %1452 = vperm.xlu1 %2717, %v3886_v0   ;;  %v822_v0 = vmul.f32 %v3589_v51, %v4151_v30 }
 0x2b3   :  { %6361 = vst [vmem:[#allocation204_spill] sm:$0xff] %v4145_v4 }
 0x2b7   :  { %2256 = vperm.xlu0 %2712, %v819_v27  }
 0x2b9   :  { %v4153_v48 = vpop.permute.xlu2 %1282  ;;  %1464 = vperm.xlu2 %2718, %v3905_v38   ;;  %v4156_v44 = vpop.permute.xlu0 %1302  ;;  %v41_v38 = vmul.f32 0.48860252, %v3951_v8 }
 0x2ba   :  { %v4158_v60 = vpop.permute.xlu1 %1188  ;;  %1460 = vperm.xlu1 %2717, %v3819_v24  }
 0x2bb   :  { %6363 = vst [vmem:[#allocation206_spill] sm:$0xff] %v4158_v60 }
 0x2bf   :  { %2271 = vperm.xlu0 %2712, %v822_v0  }
 0x2c1   :  { %v4163_v4 = vpop.permute.xlu2 %1297  ;;  %1476 = vperm.xlu2 %2718, %v3924_v31   ;;  %v4166_v58 = vpop.permute.xlu0 %1317  ;;  %v46_v31 = vmul.f32 0.48860252, %v3978_v1 }
 0x2c2   :  { %6364 = vst [vmem:[#allocation207_spill] sm:$0xff] %v4163_v4  ;;  %v4168_v27 = vpop.permute.xlu1 %1252  ;;  %1472 = vperm.xlu1 %2717, %v3833_v6   ;;  %v6505_v4 = vld [vmem:[#allocation167_spill] sm:$0xff] }
 0x2c3   :  { %6365 = vst [vmem:[#allocation208_spill] sm:$0xff] %v4168_v27 }
 0x2c7   :  { %2731 = vset.pattern.permute.xlu0 %v6333_v40 }
 0x2c8   :  { %1349 = vperm.xlu0 %2731, %v41_v38  }
 0x2c9   :  { %v4173_v24 = vpop.permute.xlu2 %1312  ;;  %1488 = vperm.xlu2 %2718, %v3943_v36   ;;  %v4176_v51 = vpop.permute.xlu0 %1629  ;;  %v6371_v36 = vld [vmem:[#allocation42_spill] sm:$0xff] }
 0x2ca   :  { %6366 = vst [vmem:[#allocation209_spill] sm:$0xff] %v4173_v24  ;;  %v4178_v0 = vpop.permute.xlu1 %1262  ;;  %1484 = vperm.xlu1 %2717, %v3847_v16   ;;  %v4192_v30 = vmul.f32 %v3951_v8, %v6371_v36  ;;  %v218_v16 = vmul.f32 1.0925485, %v3874_v11  ;;  %v52_v36 = vmul.f32 0.48860252, %v4035_v23  ;;  %v6389_v24 = vld [vmem:[#allocation34_spill] sm:$0xff] }
 0x2cb   :  { %6367 = vst [vmem:[#allocation210_spill] sm:$0xff] %v4176_v51  ;;  %v4205_v51 = vmul.f32 %v4029_v43, %v6375_v13  ;;  %v55_v11 = vmul.f32 0.48860252, %v4063_v56 }
 0x2cc   :  { %6368 = vst [vmem:[#allocation211_spill] sm:$0xff] %v4178_v0  ;;  %v6384_v0 = vld [vmem:[#allocation59_spill] sm:$0xff] }
 0x2cd   :  { %6376 = vst [vmem:[#allocation22_spill] sm:$0xff] %v4205_v51 }
 0x2d0   :  { %1374 = vperm.xlu0 %2731, %v46_v31   ;;  %v217_v31 = vmul.f32 1.0925485, %v4192_v30 }
 0x2d1   :  { %1500 = vperm.xlu2 %2718, %v3963_v15   ;;  %v4183_v6 = vpop.permute.xlu0 %1654 }
 0x2d2   :  { %v4185_v60 = vpop.permute.xlu1 %1277  ;;  %1496 = vperm.xlu1 %2717, %v3864_v2   ;;  %v4188_v38 = vpop.permute.xlu2 %1344 }
 0x2d3   :  { %6369 = vst [vmem:[#allocation212_spill] sm:$0xff] %v4185_v60  ;;  %v4210_v60 = vmul.f32 %v4021_v45, %v6377_v46  ;;  %v6382_v46 = vld [vmem:[#allocation30_spill] sm:$0xff] }
 0x2d4   :  { %6370 = vst [vmem:[#allocation213_spill] sm:$0xff] %v4188_v38  ;;  %v223_v38 = vmul.f32 1.0925485, %v3893_v28 }
 0x2d5   :  { %6378 = vst [vmem:[#allocation26_spill] sm:$0xff] %v4210_v60 }
 0x2d8   :  { %1389 = vperm.xlu0 %2731, %v49_v42   ;;  %v221_v42 = vmul.f32 1.0925485, %v4210_v60 }
 0x2d9   :  { %1532 = vperm.xlu2 %2718, %v218_v16   ;;  %v4197_v15 = vpop.permute.xlu0 %1669  ;;  %v220_v16 = vmul.f32 1.0925485, %v4205_v51 }
 0x2da   :  { %6372 = vst [vmem:[#allocation42_spill] sm:$0xff] %v4197_v15  ;;  %v4199_v41 = vpop.permute.xlu1 %1292  ;;  %1527 = vperm.xlu1 %2717, %v217_v31   ;;  %v4201_v2 = vpop.permute.xlu2 %1359  ;;  %v4217_v31 = vmul.f32 2.0, %v6229_v9 }
 0x2db   :  { %6373 = vst [vmem:[#allocation214_spill] sm:$0xff] %v4199_v41 }
 0x2dc   :  { %6374 = vst [vmem:[#allocation215_spill] sm:$0xff] %v4201_v2  ;;  %v4226_v2 = vmul.f32 %v4049_v34, %v6382_v46 }
 0x2dd   :  { %6380 = vst [vmem:[#allocation217_spill] sm:$0xff] %v4217_v31 }
 0x2de   :  { %6383 = vst [vmem:[#allocation30_spill] sm:$0xff] %v4226_v2 }
 0x2e0   :  { %1404 = vperm.xlu0 %2731, %v52_v36   ;;  %v328_v36 = vsub.f32 %v4217_v31, %v6384_v0  ;;  %v4244_v0 = vmul.f32 %v4077_v33, %v6389_v24 }
 0x2e1   :  { %1547 = vperm.xlu2 %2718, %v221_v42   ;;  %v4214_v41 = vpop.permute.xlu0 %1684  ;;  %v224_v42 = vmul.f32 1.0925485, %v4226_v2 }
 0x2e2   :  { %6379 = vst [vmem:[#allocation216_spill] sm:$0xff] %v4214_v41  ;;  %v4219_v27 = vpop.permute.xlu1 %1307  ;;  %1542 = vperm.xlu1 %2717, %v220_v16   ;;  %v4221_v13 = vpop.permute.xlu2 %1369  ;;  %v4235_v16 = vmul.f32 2.0, %v2963_v21  ;;  %v226_v21 = vmul.f32 1.0925485, %v3912_v37 }
 0x2e3   :  { %6381 = vst [vmem:[#allocation218_spill] sm:$0xff] %v4219_v27  ;;  %v6387_v27 = vld [vmem:[#allocation80_spill] sm:$0xff] }
 0x2e4   :  { %6386 = vst [vmem:[#allocation219_spill] sm:$0xff] %v4235_v16  ;;  %v392_v22 = vsub.f32 %v328_v36, %v6387_v27 }
 0x2e5   :  { %6390 = vst [vmem:[#allocation34_spill] sm:$0xff] %v4244_v0 }
 0x2e8   :  { %1419 = vperm.xlu0 %2731, %v55_v11   ;;  %v333_v11 = vsub.f32 %v4235_v16, %v3173_v59  ;;  %v6394_v59 = vld [vmem:[#allocation40_spill] sm:$0xff] }
 0x2e9   :  { %1562 = vperm.xlu2 %2718, %v224_v42   ;;  %v4232_v9 = vpop.permute.xlu0 %2012  ;;  %v408_v42 = vmul.f32 0.31539157, %v392_v22  ;;  %v4262_v22 = vmul.f32 %v4100_v20, %v6394_v59 }
 0x2ea   :  { %6385 = vst [vmem:[#allocation59_spill] sm:$0xff] %v4232_v9  ;;  %v4238_v41 = vpop.permute.xlu1 %1322  ;;  %1557 = vperm.xlu1 %2717, %v223_v38   ;;  %v4240_v46 = vpop.permute.xlu2 %1384  ;;  %v227_v9 = vmul.f32 1.0925485, %v4244_v0  ;;  %v4253_v38 = vmul.f32 2.0, %v2983_v25  ;;  %v397_v36 = vsub.f32 %v333_v11, %v3187_v54  ;;  %v229_v25 = vmul.f32 1.0925485, %v3931_v3 }
 0x2eb   :  { %6388 = vst [vmem:[#allocation80_spill] sm:$0xff] %v4238_v41  ;;  %v6428_v3 = vld [vmem:[#allocation32_spill] sm:$0xff] }
 0x2ec   :  { %6392 = vst [vmem:[#allocation221_spill] sm:$0xff] %v4253_v38  ;;  %v4375_v37 = vmul.f32 2.0, %v6428_v3 }
 0x2ed   :  { %6395 = vst [vmem:[#allocation40_spill] sm:$0xff] %v4262_v22 }
 0x2f0   :  { %1716 = vperm.xlu0 %2731, %v408_v42   ;;  %v336_v42 = vsub.f32 %v4253_v38, %v3179_v61  ;;  %v6399_v61 = vld [vmem:[#allocation36_spill] sm:$0xff]  ;;  %v6400_v38 = vmov 1  }
 0x2f1   :  { %1577 = vperm.xlu2 %2718, %v227_v9   ;;  %v4250_v27 = vpop.permute.xlu0 %2037  ;;  %v413_v9 = vmul.f32 0.31539157, %v397_v36  ;;  %v4280_v36 = vmul.f32 %v3968_v7, %v6399_v61 }
 0x2f2   :  { %6391 = vst [vmem:[#allocation220_spill] sm:$0xff] %v4250_v27  ;;  %1572 = vperm.xlu1 %2717, %v226_v21   ;;  %v4256_v24 = vpop.permute.xlu2 %1399  ;;  %v230_v27 = vmul.f32 1.0925485, %v4262_v22  ;;  %v4271_v21 = vmul.f32 2.0, %v3003_v29  ;;  %v400_v11 = vsub.f32 %v336_v42, %v3193_v49  ;;  %v4290_v49 = vmul.f32 2.0, %v3027_v35 }
 0x2f3   :  { %v4258_v31 = vpop.permute.xlu1 %1354  ;;  %v232_v29 = vmul.f32 -1.0925485, %v4280_v36  ;;  %v236_v35 = vmul.f32 -1.0925485, %v4205_v51 }
 0x2f4   :  { %6393 = vst [vmem:[#allocation222_spill] sm:$0xff] %v4258_v31 }
 0x2f5   :  { %6397 = vst [vmem:[#allocation224_spill] sm:$0xff] %v4271_v21 }
 0x2f6   :  { %6402 = vst [vmem:[#allocation226_spill] sm:$0xff] %v4290_v49 }
 0x2f8   :  { %1741 = vperm.xlu0 %2731, %v413_v9   ;;  %v339_v9 = vsub.f32 %v4271_v21, %v3185_v55 }
 0x2f9   :  { %1592 = vperm.xlu2 %2718, %v230_v27   ;;  %v4268_v54 = vpop.permute.xlu0 %2052  ;;  %v416_v27 = vmul.f32 0.31539157, %v400_v11  ;;  %v6404_v11 = vld [vmem:[#allocation41_spill] sm:$0xff] }
 0x2fa   :  { %6396 = vst [vmem:[#allocation223_spill] sm:$0xff] %v4268_v54  ;;  %1587 = vperm.xlu1 %2717, %v229_v25   ;;  %v4274_v59 = vpop.permute.xlu2 %1414  ;;  %v233_v54 = vmul.f32 -1.0925485, %v4192_v30  ;;  %v403_v42 = vsub.f32 %v339_v9, %v3199_v39 }
 0x2fb   :  { %v4276_v31 = vpop.permute.xlu1 %1364 }
 0x2fc   :  { %6398 = vst [vmem:[#allocation225_spill] sm:$0xff] %v4276_v31  ;;  %v419_v21 = vmul.f32 0.31539157, %v403_v42  ;;  %v6510_v31 = vld [vmem:[#allocation169_spill] sm:$0xff] }
 0x300   :  { %1756 = vperm.xlu0 %2731, %v416_v27   ;;  %v4300_v27 = vmul.f32 %v3992_v5, %v6404_v11  ;;  %v6409_v11 = vld [vmem:[#allocation45_spill] sm:$0xff] }
 0x301   :  { %2720 = vset.pattern.permute.xlu2 %v6400_v38  ;;  %v4287_v25 = vpop.permute.xlu0 %2067 }
 0x302   :  { %6401 = vst [vmem:[#allocation36_spill] sm:$0xff] %v4287_v25  ;;  %2719 = vset.pattern.permute.xlu1 %v6400_v38  ;;  %1624 = vperm.xlu2 %2720, %v233_v54   ;;  %v342_v25 = vsub.f32 %v4290_v49, %v3191_v52  ;;  %v235_v39 = vmul.f32 -1.0925485, %v4300_v27  ;;  %v249_v52 = vmul.f32 2.0, %v2951_v19 }
 0x303   :  { %v4294_v61 = vpop.permute.xlu1 %1379  ;;  %1619 = vperm.xlu1 %2719, %v232_v29   ;;  %v4296_v55 = vpop.permute.xlu2 %1444  ;;  %6405 = vst [vmem:[#allocation41_spill] sm:$0xff] %v4300_v27 }
 0x304   :  { %6403 = vst [vmem:[#allocation227_spill] sm:$0xff] %v4296_v55  ;;  %v406_v54 = vsub.f32 %v342_v25, %v3205_v32  ;;  %v4315_v55 = vmul.f32 %v3978_v1, %v6409_v11  ;;  %v905_v49 = vsub.f32 %v249_v52, %v3601_v18  ;;  %v237_v32 = vmul.f32 -1.0925485, %v4210_v60 }
 0x305   :  { %v825_v25 = vmul.f32 0.37317634, %v3951_v8  ;;  %v4334_v18 = vmul.f32 2.0, %v6244_v63  ;;  %v6418_v63 = vld [vmem:[#allocation51_spill] sm:$0xff] }
 0x306   :  { %6410 = vst [vmem:[#allocation45_spill] sm:$0xff] %v4315_v55  ;;  %v422_v42 = vmul.f32 0.31539157, %v406_v54  ;;  %v6414_v54 = vld [vmem:[#allocation48_spill] sm:$0xff] }
 0x307   :  { %v4331_v19 = vmul.f32 %v4007_v50, %v6414_v54  ;;  %v910_v41 = vsub.f32 %v4334_v18, %v3687_v26  ;;  %v4353_v26 = vmul.f32 2.0, %v6251_v53  ;;  %v6423_v53 = vld [vmem:[#allocation54_spill] sm:$0xff] }
 0x308   :  { %1771 = vperm.xlu0 %2731, %v419_v21   ;;  %v238_v21 = vmul.f32 -1.0925485, %v4315_v55 }
 0x309   :  { %v4306_v9 = vpop.permute.xlu0 %2082  ;;  %6415 = vst [vmem:[#allocation48_spill] sm:$0xff] %v4331_v19 }
 0x30a   :  { %6406 = vst [vmem:[#allocation228_spill] sm:$0xff] %v4306_v9  ;;  %1639 = vperm.xlu2 %2720, %v236_v35  }
 0x30b   :  { %v4309_v29 = vpop.permute.xlu1 %1394  ;;  %1634 = vperm.xlu1 %2719, %v235_v39   ;;  %v4311_v16 = vpop.permute.xlu2 %1456  ;;  %v969_v39 = vsub.f32 %v905_v49, %v3683_v17  ;;  %v240_v17 = vmul.f32 -1.0925485, %v4226_v2 }
 0x30c   :  { %6407 = vst [vmem:[#allocation229_spill] sm:$0xff] %v4309_v29 }
 0x30d   :  { %6408 = vst [vmem:[#allocation230_spill] sm:$0xff] %v4311_v16 }
 0x310   :  { %1786 = vperm.xlu0 %2731, %v422_v42   ;;  %v985_v42 = vmul.f32 %v969_v39, %v825_v25  ;;  %v4348_v25 = vmul.f32 %v4035_v23, %v6418_v63  ;;  %v6421_v63 = vld [vmem:[#allocation145_spill] sm:$0xff] }
 0x311   :  { %v4321_v35 = vpop.permute.xlu0 %2201 }
 0x312   :  { %6411 = vst [vmem:[#allocation231_spill] sm:$0xff] %v4321_v35  ;;  %1649 = vperm.xlu2 %2720, %v238_v21   ;;  %v241_v35 = vmul.f32 -1.0925485, %v4331_v19  ;;  %v830_v21 = vmul.f32 0.37317634, %v3978_v1 }
 0x313   :  { %v4325_v9 = vpop.permute.xlu1 %1409  ;;  %1644 = vperm.xlu1 %2719, %v237_v32   ;;  %v4327_v11 = vpop.permute.xlu2 %1464  ;;  %v974_v32 = vsub.f32 %v910_v41, %v3729_v57  ;;  %v243_v57 = vmul.f32 -1.0925485, %v4244_v0 }
 0x314   :  { %6412 = vst [vmem:[#allocation232_spill] sm:$0xff] %v4325_v9 }
 0x315   :  { %6413 = vst [vmem:[#allocation233_spill] sm:$0xff] %v4327_v11  ;;  %v913_v11 = vsub.f32 %v4353_v26, %v3711_v12  ;;  %v6426_v12 = vld [vmem:[#allocation19_spill] sm:$0xff] }
 0x318   :  { %2303 = vperm.xlu0 %2731, %v985_v42   ;;  %v990_v42 = vmul.f32 %v974_v32, %v830_v21  ;;  %v4367_v21 = vmul.f32 %v4063_v56, %v6423_v53 }
 0x319   :  { %v4340_v49 = vpop.permute.xlu0 %2226 }
 0x31a   :  { %6416 = vst [vmem:[#allocation234_spill] sm:$0xff] %v4340_v49  ;;  %1664 = vperm.xlu2 %2720, %v241_v35   ;;  %v244_v49 = vmul.f32 -1.0925485, %v4348_v25  ;;  %v833_v35 = vmul.f32 0.37317634, %v4007_v50 }
 0x31b   :  { %1659 = vperm.xlu1 %2719, %v240_v17   ;;  %v4344_v54 = vpop.permute.xlu2 %1476  ;;  %v977_v17 = vsub.f32 %v913_v11, %v6421_v63  ;;  %6424 = vst [vmem:[#allocation54_spill] sm:$0xff] %v4367_v21  ;;  %v247_v28 = vmul.f32 -1.0925485, %v4367_v21  ;;  %v6429_v11 = vld [vmem:[#allocation143_spill] sm:$0xff]  ;;  %v6430_v63 = vld [vmem:[#allocation70_spill] sm:$0xff] }
 0x31c   :  { %6417 = vst [vmem:[#allocation235_spill] sm:$0xff] %v4344_v54  ;;  %v4350_v39 = vpop.permute.xlu1 %1440 }
 0x31d   :  { %6419 = vst [vmem:[#allocation51_spill] sm:$0xff] %v4350_v39 }
 0x320   :  { %2328 = vperm.xlu0 %2731, %v990_v42   ;;  %v4372_v42 = vmul.f32 2.0, %v6426_v12  ;;  %v836_v12 = vmul.f32 0.37317634, %v4035_v23 }
 0x321   :  { %v4359_v41 = vpop.permute.xlu0 %2241 }
 0x322   :  { %6420 = vst [vmem:[#allocation236_spill] sm:$0xff] %v4359_v41  ;;  %1679 = vperm.xlu2 %2720, %v244_v49   ;;  %v993_v41 = vmul.f32 %v977_v17, %v833_v35  ;;  %v916_v49 = vsub.f32 %v4375_v37, %v6429_v11  ;;  %v330_v53 = vsub.f32 %v4372_v42, %v6430_v63  ;;  %v6434_v17 = vld [vmem:[#allocation72_spill] sm:$0xff]  ;;  %v6438_v63 = vld [vmem:[#allocation38_spill] sm:$0xff] }
 0x323   :  { %1674 = vperm.xlu1 %2719, %v243_v57   ;;  %v4363_v54 = vpop.permute.xlu2 %1488  ;;  %6427 = vst [vmem:[#allocation238_spill] sm:$0xff] %v4372_v42  ;;  %v246_v57 = vmul.f32 -1.0925485, %v4262_v22  ;;  %v329_v3 = vsub.f32 %v249_v52, %v6434_v17  ;;  %v6436_v22 = vld [vmem:[#allocation20_spill] sm:$0xff]  ;;  %v4397_v42 = vmul.f32 2.0, %v6438_v63 }
 0x324   :  { %6422 = vst [vmem:[#allocation145_spill] sm:$0xff] %v4363_v54  ;;  %v4369_v32 = vpop.permute.xlu1 %1452  ;;  %v4394_v2 = vmul.f32 2.0, %v6436_v22  ;;  %v839_v63 = vmul.f32 0.37317634, %v4063_v56 }
 0x325   :  { %6425 = vst [vmem:[#allocation237_spill] sm:$0xff] %v4369_v32  ;;  %v6432_v32 = vld [vmem:[#allocation148_spill] sm:$0xff] }
 0x326   :  { %v980_v0 = vsub.f32 %v916_v49, %v6432_v32  ;;  %6437 = vst [vmem:[#allocation148_spill] sm:$0xff] %v4394_v2  ;;  %v6440_v32 = vld [vmem:[#allocation25_spill] sm:$0xff]  ;;  %v6442_v49 = vld [vmem:[#allocation146_spill] sm:$0xff] }
 0x328   :  { %2343 = vperm.xlu0 %2731, %v993_v41   ;;  %v6435_v41 = vld [vmem:[#allocation75_spill] sm:$0xff]  ;;  %v996_v60 = vmul.f32 %v980_v0, %v836_v12  ;;  %v6448_v12 = vld [vmem:[#allocation81_spill] sm:$0xff] }
 0x329   :  { %v4383_v54 = vpop.permute.xlu0 %2256  ;;  %v394_v11 = vsub.f32 %v330_v53, %v6435_v41  ;;  %v6444_v53 = vld [vmem:[#allocation62_spill] sm:$0xff] }
 0x32a   :  { %6431 = vst [vmem:[#allocation143_spill] sm:$0xff] %v4383_v54  ;;  %1694 = vperm.xlu2 %2720, %v247_v28   ;;  %v6439_v54 = vld [vmem:[#allocation79_spill] sm:$0xff]  ;;  %v4401_v28 = vmul.f32 2.0, %v6440_v32  ;;  %v331_v41 = vsub.f32 %v4394_v2, %v6444_v53  ;;  %v6450_v32 = vld [vmem:[#allocation29_spill] sm:$0xff] }
 0x32b   :  { %1689 = vperm.xlu1 %2719, %v246_v57   ;;  %v4387_v35 = vpop.permute.xlu2 %1500  ;;  %v393_v9 = vsub.f32 %v329_v3, %v6439_v54  ;;  %v919_v57 = vsub.f32 %v4397_v42, %v6442_v49  ;;  %v410_v52 = vmul.f32 0.31539157, %v394_v11  ;;  %v6446_v3 = vld [vmem:[#allocation74_spill] sm:$0xff] }
 0x32c   :  { %6433 = vst [vmem:[#allocation70_spill] sm:$0xff] %v4387_v35  ;;  %v4390_v39 = vpop.permute.xlu1 %1460  ;;  %v6445_v35 = vld [vmem:[#allocation151_spill] sm:$0xff]  ;;  %v332_v0 = vsub.f32 %v4401_v28, %v6446_v3 }
 0x32d   :  { %6441 = vst [vmem:[#allocation72_spill] sm:$0xff] %v4401_v28  ;;  %v409_v22 = vmul.f32 0.31539157, %v393_v9  ;;  %v983_v15 = vsub.f32 %v919_v57, %v6445_v35  ;;  %v6449_v9 = vld [vmem:[#allocation82_spill] sm:$0xff]  ;;  %v4422_v35 = vmul.f32 2.0, %v6450_v32  ;;  %v6460_v32 = vld [vmem:[#allocation68_spill] sm:$0xff] }
 0x32e   :  { %v396_v11 = vsub.f32 %v332_v0, %v6448_v12  ;;  %v395_v49 = vsub.f32 %v331_v41, %v6449_v9  ;;  %v6456_v12 = vld [vmem:[#allocation85_spill] sm:$0xff]  ;;  %v6457_v9 = vld [vmem:[#allocation168_spill] sm:$0xff] }
 0x32f   :  { %v999_v53 = vmul.f32 %v983_v15, %v839_v63  ;;  %6451 = vst [vmem:[#allocation146_spill] sm:$0xff] %v4422_v35  ;;  %v6455_v63 = vld [vmem:[#allocation83_spill] sm:$0xff] }
 0x330   :  { %2358 = vperm.xlu0 %2731, %v996_v60   ;;  %v412_v57 = vmul.f32 0.31539157, %v396_v11  ;;  %v411_v28 = vmul.f32 0.31539157, %v395_v49 }
 0x331   :  { %v4405_v17 = vpop.permute.xlu0 %2271 }
 0x332   :  { %6443 = vst [vmem:[#allocation75_spill] sm:$0xff] %v4405_v17  ;;  %2722 = vset.pattern.permute.xlu2 %v6333_v40  ;;  %v6452_v17 = vld [vmem:[#allocation65_spill] sm:$0xff] }
 0x333   :  { %2721 = vset.pattern.permute.xlu1 %v6333_v40  ;;  %1726 = vperm.xlu2 %2722, %v410_v52   ;;  %v4415_v60 = vpop.permute.xlu2 %1532  ;;  %v334_v3 = vsub.f32 %v4334_v18, %v6452_v17  ;;  %v1064_v52 = vmul.f32 1.4453057, %v3968_v7  ;;  %v6458_v17 = vld [vmem:[#allocation33_spill] sm:$0xff] }
 0x334   :  { %6447 = vst [vmem:[#allocation79_spill] sm:$0xff] %v4415_v60  ;;  %1721 = vperm.xlu1 %2721, %v409_v22   ;;  %v4417_v54 = vpop.permute.xlu1 %1472  ;;  %v6454_v22 = vld [vmem:[#allocation76_spill] sm:$0xff]  ;;  %v4439_v49 = vmul.f32 2.0, %v6458_v17  ;;  %v6462_v40 = vld [vmem:[#allocation77_spill] sm:$0xff] }
 0x335   :  { %v335_v2 = vsub.f32 %v4422_v35, %v6454_v22  ;;  %v398_v11 = vsub.f32 %v334_v3, %v6456_v12  ;;  %v1144_v18 = vmul.f32 %v6457_v9, %v1064_v52  ;;  %v337_v22 = vsub.f32 %v4353_v26, %v6460_v32  ;;  %v6466_v32 = vld [vmem:[#allocation39_spill] sm:$0xff] }
 0x336   :  { %6459 = vst [vmem:[#allocation151_spill] sm:$0xff] %v4439_v49  ;;  %v1069_v35 = vmul.f32 1.4453057, %v4021_v45 }
 0x337   :  { %v399_v41 = vsub.f32 %v335_v2, %v6455_v63  ;;  %v338_v2 = vsub.f32 %v4439_v49, %v6462_v40  ;;  %v6463_v63 = vld [vmem:[#allocation86_spill] sm:$0xff]  ;;  %v1072_v49 = vmul.f32 1.4453057, %v4049_v34 }
 0x338   :  { %2373 = vperm.xlu0 %2731, %v999_v53  }
 0x339   :  { %v415_v53 = vmul.f32 0.31539157, %v399_v41  ;;  %v402_v12 = vsub.f32 %v338_v2, %v6463_v63  ;;  %v6464_v41 = vld [vmem:[#allocation88_spill] sm:$0xff]  ;;  %v6472_v63 = vld [vmem:[#allocation89_spill] sm:$0xff] }
 0x33a   :  { %v4427_v60 = vpop.permute.xlu0 %1349  ;;  %v401_v9 = vsub.f32 %v337_v22, %v6464_v41 }
 0x33b   :  { %6453 = vst [vmem:[#allocation62_spill] sm:$0xff] %v4427_v60  ;;  %1736 = vperm.xlu2 %2722, %v412_v57   ;;  %v4431_v0 = vpop.permute.xlu2 %1547  ;;  %v414_v57 = vmul.f32 0.31539157, %v398_v11  ;;  %v4456_v11 = vmul.f32 2.0, %v6466_v32  ;;  %v418_v17 = vmul.f32 0.31539157, %v402_v12 }
 0x33c   :  { %1731 = vperm.xlu1 %2721, %v411_v28   ;;  %v4433_v15 = vpop.permute.xlu1 %1484  ;;  %v6470_v60 = vld [vmem:[#allocation78_spill] sm:$0xff]  ;;  %v6473_v12 = vld [vmem:[#allocation91_spill] sm:$0xff] }
 0x33d   :  { %6467 = vst [vmem:[#allocation81_spill] sm:$0xff] %v4456_v11  ;;  %v341_v2 = vsub.f32 %v4456_v11, %v6470_v60  ;;  %v1075_v60 = vmul.f32 1.4453057, %v4077_v33 }
 0x33f   :  { %v405_v41 = vsub.f32 %v341_v2, %v6472_v63  ;;  %v6478_v2 = vld [vmem:[#allocation53_spill] sm:$0xff] }
 0x340   :  { %2492 = vperm.xlu0 %2731, %v1144_v18   ;;  %v6465_v18 = vld [vmem:[#allocation6_spill] sm:$0xff] }
 0x341   :  { %v1149_v26 = vmul.f32 %v6465_v18, %v1069_v35 }
 0x342   :  { %v4444_v28 = vpop.permute.xlu0 %1374 }
 0x343   :  { %6461 = vst [vmem:[#allocation74_spill] sm:$0xff] %v4444_v28  ;;  %1751 = vperm.xlu2 %2722, %v415_v53   ;;  %v4448_v3 = vpop.permute.xlu2 %1562  ;;  %v6468_v28 = vld [vmem:[#allocation71_spill] sm:$0xff]  ;;  %v417_v53 = vmul.f32 0.31539157, %v401_v9  ;;  %v6475_v9 = vld [vmem:[#allocation73_spill] sm:$0xff] }
 0x344   :  { %1746 = vperm.xlu1 %2721, %v414_v57   ;;  %v4450_v52 = vpop.permute.xlu1 %1496  ;;  %v340_v40 = vsub.f32 %v4375_v37, %v6468_v28  ;;  %v421_v28 = vmul.f32 0.31539157, %v405_v41  ;;  %v343_v32 = vsub.f32 %v4397_v42, %v6475_v9  ;;  %v6480_v41 = vld [vmem:[#allocation15_spill] sm:$0xff] }
 0x346   :  { %v404_v18 = vsub.f32 %v340_v40, %v6473_v12  ;;  %v200_v40 = vmul.f32 %v3968_v7, %v6478_v2  ;;  %v1155_v12 = vmul.f32 %v6480_v41, %v1075_v60  ;;  %v6486_v41 = vld [vmem:[#allocation57_spill] sm:$0xff] }
 0x348   :  { %2517 = vperm.xlu0 %2731, %v1149_v26   ;;  %v6474_v26 = vld [vmem:[#allocation12_spill] sm:$0xff]  ;;  %v424_v42 = vmul.f32 -1.0925485, %v200_v40 }
 0x349   :  { %v1152_v37 = vmul.f32 %v6474_v26, %v1072_v49  ;;  %v6479_v49 = vld [vmem:[#allocation95_spill] sm:$0xff]  ;;  %v1078_v26 = vmul.f32 1.4453057, %v4100_v20  ;;  %v6487_v40 = vld [vmem:[#allocation176_spill] sm:$0xff] }
 0x34a   :  { %v4461_v57 = vpop.permute.xlu0 %1389  ;;  %v407_v63 = vsub.f32 %v343_v32, %v6479_v49  ;;  %v6485_v49 = vld [vmem:[#allocation170_spill] sm:$0xff] }
 0x34b   :  { %6469 = vst [vmem:[#allocation82_spill] sm:$0xff] %v4461_v57  ;;  %1766 = vperm.xlu2 %2722, %v418_v17   ;;  %v4465_v22 = vpop.permute.xlu2 %1577  ;;  %v420_v57 = vmul.f32 0.31539157, %v404_v18  ;;  %v1158_v60 = vmul.f32 %v6485_v49, %v1078_v26  ;;  %v6492_v26 = vld [vmem:[#allocation47_spill] sm:$0xff] }
 0x34c   :  { %1761 = vperm.xlu1 %2721, %v417_v53   ;;  %v4467_v35 = vpop.permute.xlu1 %1527  ;;  %v423_v18 = vmul.f32 0.31539157, %v407_v63  ;;  %v202_v63 = vmul.f32 %v6487_v40, %v6486_v41  ;;  %v204_v49 = vmul.f32 %v4029_v43, %v6492_v26 }
 0x34d   :  { %6471 = vst [vmem:[#allocation65_spill] sm:$0xff] %v4467_v35 }
 0x34e   :  { %v428_v41 = vmul.f32 -1.0925485, %v204_v49 }
 0x350   :  { %2532 = vperm.xlu0 %2731, %v1152_v37  }
 0x352   :  { %v4475_v17 = vpop.permute.xlu0 %1404 }
 0x353   :  { %6476 = vst [vmem:[#allocation76_spill] sm:$0xff] %v4475_v17  ;;  %1781 = vperm.xlu2 %2722, %v421_v28   ;;  %v4477_v53 = vpop.permute.xlu2 %1592  ;;  %v6482_v28 = vmov 0   ;;  %v6484_v17 = vld [vmem:[#allocation56_spill] sm:$0xff] }
 0x354   :  { %1776 = vperm.xlu1 %2721, %v420_v57   ;;  %v4479_v11 = vpop.permute.xlu1 %1542  ;;  %v203_v32 = vmul.f32 %v3992_v5, %v6484_v17 }
 0x355   :  { %6477 = vst [vmem:[#allocation83_spill] sm:$0xff] %v4479_v11  ;;  %v6499_v11 = vld [vmem:[#allocation165_spill] sm:$0xff] }
 0x358   :  { %2547 = vperm.xlu0 %2731, %v1155_v12   ;;  %v427_v12 = vmul.f32 -1.0925485, %v203_v32  ;;  %v6493_v32 = vld [vmem:[#allocation3_spill] sm:$0xff] }
 0x35a   :  { %v4486_v37 = vpop.permute.xlu0 %1419 }
 0x35b   :  { %6481 = vst [vmem:[#allocation85_spill] sm:$0xff] %v4486_v37  ;;  %2723 = vset.pattern.permute.xlu2 %v6482_v28  ;;  %v426_v37 = vmul.f32 -1.0925485, %v202_v63 }
 0x35c   :  { %1791 = vperm.xlu1 %2721, %v423_v18   ;;  %v4489_v57 = vpop.permute.xlu1 %1557  ;;  %1813 = vperm.xlu2 %2723, %v424_v42   ;;  %v4491_v9 = vpop.permute.xlu2 %1624 }
 0x35d   :  { %6483 = vst [vmem:[#allocation168_spill] sm:$0xff] %v4491_v9  ;;  %v6491_v9 = vld [vmem:[#allocation60_spill] sm:$0xff] }
 0x35e   :  { %v205_v17 = vmul.f32 %v4021_v45, %v6491_v9 }
 0x360   :  { %2562 = vperm.xlu0 %2731, %v1158_v60   ;;  %v429_v60 = vmul.f32 -1.0925485, %v205_v17 }
 0x362   :  { %v4498_v35 = vpop.permute.xlu0 %1716 }
 0x363   :  { %6488 = vst [vmem:[#allocation68_spill] sm:$0xff] %v4498_v35 }
 0x364   :  { %2724 = vset.pattern.permute.xlu1 %v6482_v28  ;;  %v4501_v18 = vpop.permute.xlu1 %1572  ;;  %1828 = vperm.xlu2 %2723, %v427_v12   ;;  %v4503_v42 = vpop.permute.xlu2 %1639 }
 0x365   :  { %6489 = vst [vmem:[#allocation77_spill] sm:$0xff] %v4501_v18  ;;  %1823 = vperm.xlu1 %2724, %v426_v37   ;;  %v6496_v37 = vld [vmem:[#allocation63_spill] sm:$0xff]  ;;  %v6497_v18 = vld [vmem:[#allocation50_spill] sm:$0xff] }
 0x366   :  { %6490 = vst [vmem:[#allocation86_spill] sm:$0xff] %v4503_v42  ;;  %v208_v9 = vmul.f32 %v4049_v34, %v6496_v37  ;;  %v6498_v42 = vld [vmem:[#allocation185_spill] sm:$0xff]  ;;  %v6504_v37 = vld [vmem:[#allocation190_spill] sm:$0xff] }
 0x367   :  { %v207_v26 = vmul.f32 %v6498_v42, %v6497_v18 }
 0x368   :  { %2738 = vset.pattern.permute.xlu0 %v6482_v28  ;;  %v432_v29 = vmul.f32 -1.0925485, %v208_v9 }
 0x369   :  { %1448 = vperm.xlu0 %2738, %v6493_v32   ;;  %v431_v17 = vmul.f32 -1.0925485, %v207_v26 }
 0x36a   :  { %v4511_v63 = vpop.permute.xlu0 %1741 }
 0x36c   :  { %v4513_v35 = vpop.permute.xlu1 %1587  ;;  %1838 = vperm.xlu2 %2723, %v429_v60   ;;  %v4515_v12 = vpop.permute.xlu2 %1649 }
 0x36d   :  { %6494 = vst [vmem:[#allocation88_spill] sm:$0xff] %v4513_v35  ;;  %1833 = vperm.xlu1 %2724, %v428_v41   ;;  %v6503_v35 = vld [vmem:[#allocation52_spill] sm:$0xff] }
 0x36e   :  { %6495 = vst [vmem:[#allocation6_spill] sm:$0xff] %v4515_v12  ;;  %v6502_v12 = vld [vmem:[#allocation66_spill] sm:$0xff]  ;;  %v210_v16 = vmul.f32 %v6504_v37, %v6503_v35 }
 0x36f   :  { %v211_v41 = vmul.f32 %v4077_v33, %v6502_v12 }
 0x370   :  { %v434_v9 = vmul.f32 -1.0925485, %v210_v16 }
 0x371   :  { %1468 = vperm.xlu0 %2738, %v6499_v11   ;;  %v435_v18 = vmul.f32 -1.0925485, %v211_v41 }
 0x372   :  { %v4522_v32 = vpop.permute.xlu0 %1756 }
 0x374   :  { %1853 = vperm.xlu2 %2723, %v432_v29   ;;  %v4524_v49 = vpop.permute.xlu2 %1664 }
 0x375   :  { %6500 = vst [vmem:[#allocation71_spill] sm:$0xff] %v4524_v49  ;;  %1848 = vperm.xlu1 %2724, %v431_v17   ;;  %v4526_v60 = vpop.permute.xlu1 %1619  ;;  %v6508_v17 = vld [vmem:[#allocation69_spill] sm:$0xff] }
 0x376   :  { %6501 = vst [vmem:[#allocation78_spill] sm:$0xff] %v4526_v60  ;;  %v214_v49 = vmul.f32 %v4100_v20, %v6508_v17  ;;  %v6509_v60 = vld [vmem:[#allocation55_spill] sm:$0xff] }
 0x377   :  { %v213_v12 = vmul.f32 %v4108_v47, %v6509_v60  ;;  %v6514_v60 = vld [vmem:[#allocation93_spill] sm:$0xff] }
 0x378   :  { %v438_v35 = vmul.f32 -1.0925485, %v214_v49  ;;  %v504_v62 = vmul.f32 0.54627424, %v6514_v60  ;;  %v6516_v49 = vld [vmem:[#allocation87_spill] sm:$0xff] }
 0x379   :  { %1480 = vperm.xlu0 %2738, %v6505_v4   ;;  %v437_v41 = vmul.f32 -1.0925485, %v213_v12 }
 0x37a   :  { %v4533_v11 = vpop.permute.xlu0 %1771 }
 0x37c   :  { %1868 = vperm.xlu2 %2723, %v435_v18   ;;  %v4535_v26 = vpop.permute.xlu2 %1679 }
 0x37d   :  { %6506 = vst [vmem:[#allocation89_spill] sm:$0xff] %v4535_v26  ;;  %1863 = vperm.xlu1 %2724, %v434_v9   ;;  %v4537_v29 = vpop.permute.xlu1 %1634  ;;  %v216_v9 = vmul.f32 1.0925485, %v4280_v36  ;;  %v6512_v26 = vld [vmem:[#allocation84_spill] sm:$0xff] }
 0x37e   :  { %6507 = vst [vmem:[#allocation91_spill] sm:$0xff] %v4537_v29  ;;  %v505_v17 = vmul.f32 0.54627424, %v6512_v26 }
 0x381   :  { %1492 = vperm.xlu0 %2738, %v6510_v31  }
 0x382   :  { %v4544_v4 = vpop.permute.xlu0 %1786 }
 0x384   :  { %1883 = vperm.xlu2 %2723, %v438_v35   ;;  %v4546_v16 = vpop.permute.xlu2 %1694  ;;  %v219_v35 = vmul.f32 1.0925485, %v4300_v27 }
 0x385   :  { %6511 = vst [vmem:[#allocation12_spill] sm:$0xff] %v4546_v16  ;;  %1878 = vperm.xlu1 %2724, %v437_v41   ;;  %v4548_v18 = vpop.permute.xlu1 %1644  ;;  %v508_v41 = vmul.f32 0.54627424, %v6516_v49 }
 0x389   :  { %1522 = vperm.xlu0 %2738, %v216_v9   ;;  %v6518_v9 = vld [vmem:[#allocation96_spill] sm:$0xff] }
 0x38a   :  { %v4552_v29 = vpop.permute.xlu0 %2303  ;;  %v507_v51 = vmul.f32 0.54627424, %v6518_v9 }
 0x38b   :  { %6513 = vst [vmem:[#allocation73_spill] sm:$0xff] %v4552_v29 }
 0x38c   :  { %1915 = vperm.xlu2 %2723, %v505_v17   ;;  %v6520_v17 = vld [vmem:[#allocation90_spill] sm:$0xff] }
 0x38d   :  { %1910 = vperm.xlu1 %2724, %v504_v62   ;;  %v4555_v31 = vpop.permute.xlu1 %1659  ;;  %v4557_v12 = vpop.permute.xlu2 %1726  ;;  %v222_v62 = vmul.f32 1.0925485, %v4315_v55  ;;  %v511_v29 = vmul.f32 0.54627424, %v6520_v17 }
 0x38e   :  { %6515 = vst [vmem:[#allocation53_spill] sm:$0xff] %v4557_v12 }
 0x391   :  { %1537 = vperm.xlu0 %2738, %v219_v35   ;;  %v6522_v35 = vld [vmem:[#allocation99_spill] sm:$0xff] }
 0x392   :  { %v4561_v16 = vpop.permute.xlu0 %2328  ;;  %v510_v27 = vmul.f32 0.54627424, %v6522_v35 }
 0x393   :  { %6517 = vst [vmem:[#allocation95_spill] sm:$0xff] %v4561_v16 }
 0x394   :  { %1930 = vperm.xlu2 %2723, %v508_v41   ;;  %v6524_v41 = vld [vmem:[#allocation94_spill] sm:$0xff] }
 0x395   :  { %1925 = vperm.xlu1 %2724, %v507_v51   ;;  %v4564_v26 = vpop.permute.xlu1 %1674  ;;  %v4566_v60 = vpop.permute.xlu2 %1736  ;;  %v225_v51 = vmul.f32 1.0925485, %v4331_v19  ;;  %v514_v16 = vmul.f32 0.54627424, %v6524_v41 }
 0x396   :  { %6519 = vst [vmem:[#allocation15_spill] sm:$0xff] %v4566_v60 }
 0x399   :  { %1552 = vperm.xlu0 %2738, %v222_v62   ;;  %v6526_v62 = vld [vmem:[#allocation101_spill] sm:$0xff] }
 0x39a   :  { %v4570_v12 = vpop.permute.xlu0 %2343  ;;  %v513_v55 = vmul.f32 0.54627424, %v6526_v62 }
 0x39b   :  { %6521 = vst [vmem:[#allocation170_spill] sm:$0xff] %v4570_v12 }
 0x39c   :  { %1945 = vperm.xlu2 %2723, %v511_v29   ;;  %v6528_v29 = vld [vmem:[#allocation97_spill] sm:$0xff] }
 0x39d   :  { %1940 = vperm.xlu1 %2724, %v510_v27   ;;  %v4573_v49 = vpop.permute.xlu1 %1689  ;;  %v4575_v9 = vpop.permute.xlu2 %1751  ;;  %v228_v27 = vmul.f32 1.0925485, %v4348_v25  ;;  %v517_v12 = vmul.f32 0.54627424, %v6528_v29  ;;  %v6534_v29 = vld [vmem:[#allocation44_spill] sm:$0xff] }
 0x39e   :  { %6523 = vst [vmem:[#allocation176_spill] sm:$0xff] %v4575_v9 }
 0x3a1   :  { %1567 = vperm.xlu0 %2738, %v225_v51   ;;  %v6530_v51 = vld [vmem:[#allocation103_spill] sm:$0xff] }
 0x3a2   :  { %v4579_v60 = vpop.permute.xlu0 %2358  ;;  %v516_v19 = vmul.f32 0.54627424, %v6530_v51 }
 0x3a3   :  { %6525 = vst [vmem:[#allocation3_spill] sm:$0xff] %v4579_v60  ;;  %v1240_v60 = vlaneseq }
 0x3a4   :  { %1960 = vperm.xlu2 %2723, %v514_v16   ;;  %v4597_v16 = vmul.f32 -0.5900436, %v3968_v7 }
 0x3a5   :  { %1955 = vperm.xlu1 %2724, %v513_v55   ;;  %v4582_v17 = vpop.permute.xlu2 %1766  ;;  %v231_v55 = vmul.f32 1.0925485, %v4367_v21 }
 0x3a6   :  { %v4584_v35 = vpop.permute.xlu1 %1721  ;;  %6532 = vst [vmem:[#allocation167_spill] sm:$0xff] %v4597_v16 }
 0x3a7   :  { %6527 = vst [vmem:[#allocation185_spill] sm:$0xff] %v4584_v35  ;;  %v6535_v35 = vld [vmem:[#allocation105_spill] sm:$0xff] }
 0x3a8   :  { %v519_v51 = vmul.f32 0.54627424, %v6535_v35 }
 0x3a9   :  { %1582 = vperm.xlu0 %2738, %v228_v27  }
 0x3aa   :  { %v4588_v9 = vpop.permute.xlu0 %2373 }
 0x3ab   :  { %6529 = vst [vmem:[#allocation165_spill] sm:$0xff] %v4588_v9  ;;  %v201_v9 = vmul.f32 %v3951_v8, %v6534_v29  ;;  %v4617_v8 = vmul.f32 -0.5900436, %v6487_v40 }
 0x3ac   :  { %1975 = vperm.xlu2 %2723, %v517_v12  }
 0x3ad   :  { %1970 = vperm.xlu1 %2724, %v516_v19   ;;  %v4591_v41 = vpop.permute.xlu2 %1781  ;;  %v6536_v19 = vld [vmem:[#allocation108_spill] sm:$0xff]  ;;  %6539 = vst [vmem:[#allocation87_spill] sm:$0xff] %v4617_v8 }
 0x3ae   :  { %v4593_v62 = vpop.permute.xlu1 %1731  ;;  %v632_v12 = vmul.f32 %v6536_v19, %v4597_v16  ;;  %v6542_v19 = vld [vmem:[#allocation110_spill] sm:$0xff]  ;;  %v6543_v16 = vld [vmem:[#allocation113_spill] sm:$0xff] }
 0x3af   :  { %6531 = vst [vmem:[#allocation190_spill] sm:$0xff] %v4593_v62  ;;  %v4607_v62 = vand.u32 127, %v1240_v60  ;;  %v6541_v60 = vld [vmem:[#allocation58_spill] sm:$0xff] }
 0x3b1   :  { %1597 = vperm.xlu0 %2738, %v231_v55   ;;  %v425_v55 = vmul.f32 -1.0925485, %v201_v9  ;;  %vm1242_vm0 = vcmp.eq.s32.totalorder %v4607_v62, 0  ;;  %v634_v9 = vmul.f32 %v6543_v16, %v4617_v8  ;;  %vm1244_vm1 = vcmp.eq.s32.totalorder %v4607_v62, 1  ;;  %v6660_v8 = vld [vmem:[#allocation166_spill] sm:$0xff] }
 0x3b2   :  { %v4599_v27 = vpop.permute.xlu0 %2492  ;;  %v4641_v16 = vmul.f32 -0.5900436, %v4021_v45  ;;  %vm1341_vm2 = vcmp.eq.s32.totalorder %v4607_v62, 2  ;;  %vm1519_vm3 = vcmp.eq.s32.totalorder %v4607_v62, 4  ;;  %vm1438_vm4 = vcmp.eq.s32.totalorder %v4607_v62, 3 }
 0x3b3   :  { %6533 = vst [vmem:[#allocation169_spill] sm:$0xff] %v4599_v27  ;;  %v4614_v27 = vmul.f32 -0.5900436, %v3992_v5  ;;  %vm1616_vm5 = vcmp.eq.s32.totalorder %v4607_v62, 5  ;;  %vm1713_vm6 = vcmp.eq.s32.totalorder %v4607_v62, 6  ;;  %vm1810_vm7 = vcmp.eq.s32.totalorder %v4607_v62, 7 }
 0x3b4   :  { %2725 = vset.pattern.permute.xlu2 %v6400_v38  ;;  %6544 = vst [vmem:[#allocation90_spill] sm:$0xff] %v4641_v16  ;;  %vm1907_vm8 = vcmp.eq.s32.totalorder %v4607_v62, 8  ;;  %vm2004_vm9 = vcmp.eq.s32.totalorder %v4607_v62, 9  ;;  %vm2101_vm10 = vcmp.eq.s32.totalorder %v4607_v62, 10  ;;  %vm2198_vm11 = vcmp.eq.s32.totalorder %v4607_v62, 11 }
 0x3b5   :  { %1985 = vperm.xlu1 %2724, %v519_v51   ;;  %2007 = vperm.xlu2 %2725, %v632_v12   ;;  %6538 = vst [vmem:[#allocation93_spill] sm:$0xff] %v4614_v27  ;;  %v206_v51 = vmul.f32 %v3978_v1, %v6541_v60  ;;  %v635_v12 = vmul.f32 %v6542_v19, %v4614_v27  ;;  %v6662_v27 = vld [vmem:[#allocation138_spill] sm:$0xff]  ;;  %vm2295_vm12 = vcmp.eq.s32.totalorder %v4607_v62, 12  ;;  %vm2392_vm13 = vcmp.eq.s32.totalorder %v4607_v62, 13 }
 0x3b6   :  { %v4609_v7 = vpop.permute.xlu1 %1746  ;;  %v4611_v21 = vpop.permute.xlu2 %1813  ;;  %vm2489_vm14 = vcmp.eq.s32.totalorder %v4607_v62, 14  ;;  %vm2586_vm15 = vcmp.eq.s32.totalorder %v4607_v62, 15 }
 0x3b7   :  { %6537 = vst [vmem:[#allocation84_spill] sm:$0xff] %v4609_v7  ;;  %v2780_v7 = vmov 0.0   ;;  %v430_v19 = vmul.f32 -1.0925485, %v206_v51 }
 0x3b8   :  { %v4628_v5 = vsel %vm1242_vm0, 0.2820948, %v2780_v7  ;;  %v4646_v7 = vmul.f32 -0.5900436, %v4029_v43  ;;  %v6547_v43 = vld [vmem:[#allocation61_spill] sm:$0xff]  ;;  %vm2683_vm0 = vcmask 130048  }
 0x3b9   :  { %1818 = vperm.xlu0 %2738, %v425_v55   ;;  %v1330_v40 = vsel %vm1244_vm1, %v4130_v10, %v4628_v5 }
 0x3ba   :  { %v4620_v35 = vpop.permute.xlu0 %2517  ;;  %6545 = vst [vmem:[#allocation99_spill] sm:$0xff] %v4646_v7  ;;  %v1427_v10 = vsel %vm1341_vm2, %v4221_v13, %v1330_v40  ;;  %v6548_v13 = vld [vmem:[#allocation114_spill] sm:$0xff] }
 0x3bb   :  { %6540 = vst [vmem:[#allocation96_spill] sm:$0xff] %v4620_v35  ;;  %v1508_v51 = vsel %vm1438_vm4, %v4390_v39, %v1427_v10  ;;  %v637_v40 = vmul.f32 %v6548_v13, %v4641_v16  ;;  %v6549_v39 = vld [vmem:[#allocation109_spill] sm:$0xff] }
 0x3bc   :  { %v1605_v45 = vsel %vm1519_vm3, %v4431_v0, %v1508_v51  ;;  %v1333_v0 = vsel %vm1244_vm1, %v4143_v14, %v4628_v5 }
 0x3bd   :  { %2726 = vset.pattern.permute.xlu1 %v6400_v38  ;;  %2022 = vperm.xlu2 %2725, %v635_v12   ;;  %v1702_v35 = vsel %vm1616_vm5, %v4548_v18, %v1605_v45  ;;  %v4682_v45 = vmul.f32 -0.5900436, %v4049_v34  ;;  %v1430_v14 = vsel %vm1341_vm2, %v4240_v46, %v1333_v0  ;;  %v6555_v0 = vld [vmem:[#allocation111_spill] sm:$0xff] }
 0x3be   :  { %2017 = vperm.xlu1 %2726, %v634_v9   ;;  %v4636_v1 = vpop.permute.xlu1 %1761  ;;  %v4638_v55 = vpop.permute.xlu2 %1828  ;;  %v209_v9 = vmul.f32 %v4007_v50, %v6547_v43  ;;  %v1799_v18 = vsel %vm1713_vm6, %v4511_v63, %v1702_v35  ;;  %v6553_v35 = vld [vmem:[#allocation64_spill] sm:$0xff] }
 0x3bf   :  { %6550 = vst [vmem:[#allocation101_spill] sm:$0xff] %v4682_v45 }
 0x3c0   :  { %v433_v51 = vmul.f32 -1.0925485, %v209_v9  ;;  %v212_v9 = vmul.f32 %v4035_v23, %v6553_v35 }
 0x3c1   :  { %1843 = vperm.xlu0 %2738, %v430_v19   ;;  %v636_v19 = vmul.f32 %v6549_v39, %v4646_v7  ;;  %v4689_v39 = vmul.f32 -0.5900436, %v6498_v42  ;;  %v6554_v42 = vld [vmem:[#allocation117_spill] sm:$0xff]  ;;  %v6648_v7 = vld [vmem:[#allocation43_spill] sm:$0xff] }
 0x3c2   :  { %v4659_v12 = vpop.permute.xlu0 %2532 }
 0x3c3   :  { %6546 = vst [vmem:[#allocation94_spill] sm:$0xff] %v4659_v12  ;;  %v6636_v12 = vld [vmem:[#allocation185_spill] sm:$0xff] }
 0x3c4   :  { %6551 = vst [vmem:[#allocation97_spill] sm:$0xff] %v4689_v39 }
 0x3c5   :  { %2032 = vperm.xlu2 %2725, %v637_v40   ;;  %v1511_v40 = vsel %vm1438_vm4, %v4417_v54, %v1430_v14  ;;  %v639_v54 = vmul.f32 %v6555_v0, %v4689_v39 }
 0x3c6   :  { %2027 = vperm.xlu1 %2726, %v636_v19   ;;  %v4676_v50 = vpop.permute.xlu1 %1776  ;;  %v1839_v10 = vpop.permute.xlu2 %1838  ;;  %v1608_v34 = vsel %vm1519_vm3, %v4448_v3, %v1511_v40  ;;  %v640_v19 = vmul.f32 %v6554_v42, %v4682_v45  ;;  %v1336_v3 = vsel %vm1244_vm1, %v4156_v44, %v4628_v5  ;;  %v4728_v40 = vmul.f32 -0.5900436, %v6504_v37  ;;  %v6560_v37 = vld [vmem:[#allocation119_spill] sm:$0xff] }
 0x3c7   :  { %v4686_v13 = vsel %vm1810_vm7, %v1839_v10, %v1799_v18  ;;  %v1705_v46 = vsel %vm1616_vm5, %v4555_v31, %v1608_v34  ;;  %v4721_v31 = vmul.f32 -0.5900436, %v4077_v33  ;;  %v1433_v44 = vsel %vm1341_vm2, %v4256_v24, %v1336_v3 }
 0x3c8   :  { %v1802_v18 = vsel %vm1713_vm6, %v4522_v32, %v1705_v46  ;;  %6557 = vst [vmem:[#allocation105_spill] sm:$0xff] %v4728_v40  ;;  %v1514_v34 = vsel %vm1438_vm4, %v4433_v15, %v1433_v44  ;;  %v6561_v46 = vld [vmem:[#allocation92_spill] sm:$0xff]  ;;  %v4758_v3 = vmul.f32 -0.5900436, %v4100_v20 }
 0x3c9   :  { %1858 = vperm.xlu0 %2738, %v433_v51   ;;  %v436_v51 = vmul.f32 -1.0925485, %v212_v9  ;;  %6556 = vst [vmem:[#allocation44_spill] sm:$0xff] %v4721_v31  ;;  %v1611_v33 = vsel %vm1519_vm3, %v4465_v22, %v1514_v34  ;;  %v6559_v9 = vld [vmem:[#allocation67_spill] sm:$0xff]  ;;  %v642_v15 = vmul.f32 %v6561_v46, %v4728_v40  ;;  %v1339_v22 = vsel %vm1244_vm1, %v4166_v58, %v4628_v5 }
 0x3ca   :  { %v4700_v63 = vpop.permute.xlu0 %2547  ;;  %v215_v42 = vmul.f32 %v4063_v56, %v6559_v9  ;;  %v1708_v24 = vsel %vm1616_vm5, %v4564_v26, %v1611_v33  ;;  %6562 = vst [vmem:[#allocation58_spill] sm:$0xff] %v4758_v3  ;;  %v1436_v58 = vsel %vm1341_vm2, %v4274_v59, %v1339_v22  ;;  %v6565_v59 = vld [vmem:[#allocation112_spill] sm:$0xff]  ;;  %v1332_v46 = vsel %vm1244_vm1, %v4153_v48, %v4628_v5 }
 0x3cb   :  { %6552 = vst [vmem:[#allocation103_spill] sm:$0xff] %v4700_v63  ;;  %v1805_v56 = vsel %vm1713_vm6, %v4533_v11, %v1708_v24  ;;  %v1517_v11 = vsel %vm1438_vm4, %v4450_v52, %v1436_v58 }
 0x3cc   :  { %v1614_v20 = vsel %vm1519_vm3, %v4477_v53, %v1517_v11  ;;  %v6566_v53 = vld [vmem:[#allocation98_spill] sm:$0xff] }
 0x3cd   :  { %2047 = vperm.xlu2 %2725, %v640_v19   ;;  %v643_v19 = vmul.f32 %v6560_v37, %v4721_v31  ;;  %v506_v37 = vmul.f32 0.54627424, %v6566_v53 }
 0x3ce   :  { %2042 = vperm.xlu1 %2726, %v639_v54   ;;  %v4715_v10 = vpop.permute.xlu1 %1791  ;;  %v1854_v23 = vpop.permute.xlu2 %1853  ;;  %v439_v54 = vmul.f32 -1.0925485, %v215_v42 }
 0x3cf   :  { %v4725_v14 = vsel %vm1810_vm7, %v1854_v23, %v1802_v18  ;;  %v4767_v18 = vmul.f32 -0.5900436, %v4108_v47  ;;  %v1711_v47 = vsel %vm1616_vm5, %v4573_v49, %v1614_v20  ;;  %v649_v49 = vmul.f32 2.8906114, %v4192_v30 }
 0x3d0   :  { %v1808_v42 = vsel %vm1713_vm6, %v4544_v4, %v1711_v47  ;;  %v1429_v4 = vsel %vm1341_vm2, %v4294_v61, %v1332_v46  ;;  %v6567_v61 = vld [vmem:[#allocation100_spill] sm:$0xff]  ;;  %v6575_v46 = vld [vmem:[#allocation229_spill] sm:$0xff] }
 0x3d1   :  { %1873 = vperm.xlu0 %2738, %v436_v51   ;;  %6563 = vst [vmem:[#allocation110_spill] sm:$0xff] %v4767_v18  ;;  %v6564_v51 = vld [vmem:[#allocation121_spill] sm:$0xff]  ;;  %v645_v33 = vmul.f32 %v6565_v59, %v4767_v18 }
 0x3d2   :  { %v4739_v32 = vpop.permute.xlu0 %2562  ;;  %v646_v44 = vmul.f32 %v6564_v51, %v4758_v3  ;;  %v6570_v51 = vld [vmem:[#allocation203_spill] sm:$0xff]  ;;  %v6571_v59 = vld [vmem:[#allocation225_spill] sm:$0xff] }
 0x3d3   :  { %6558 = vst [vmem:[#allocation108_spill] sm:$0xff] %v4739_v32  ;;  %v6637_v18 = vld [vmem:[#allocation233_spill] sm:$0xff] }
 0x3d5   :  { %2062 = vperm.xlu2 %2725, %v643_v19  }
 0x3d6   :  { %2057 = vperm.xlu1 %2726, %v642_v15   ;;  %v1869_v0 = vpop.permute.xlu2 %1868  ;;  %v648_v15 = vmul.f32 2.8906114, %v4280_v36 }
 0x3d7   :  { %v4762_v26 = vsel %vm1810_vm7, %v1869_v0, %v1805_v56  ;;  %v4764_v23 = vpop.permute.xlu1 %1823  ;;  %v665_v0 = vmul.f32 %v649_v49, %v6534_v29  ;;  %v509_v29 = vmul.f32 0.54627424, %v6567_v61 }
 0x3d9   :  { %1888 = vperm.xlu0 %2738, %v439_v54   ;;  %v664_v54 = vmul.f32 %v648_v15, %v6478_v2  ;;  %v6568_v2 = vld [vmem:[#allocation176_spill] sm:$0xff] }
 0x3db   :  { %v4783_v34 = vpop.permute.xlu0 %1448 }
 0x3dd   :  { %2077 = vperm.xlu2 %2725, %v646_v44   ;;  %v1329_v44 = vsel %vm1244_vm1, %v6570_v51, %v4628_v5 }
 0x3de   :  { %2072 = vperm.xlu1 %2726, %v645_v33   ;;  %v1884_v52 = vpop.permute.xlu2 %1883  ;;  %v6572_v33 = vld [vmem:[#allocation207_spill] sm:$0xff] }
 0x3df   :  { %v4793_v19 = vsel %vm1810_vm7, %v1884_v52, %v1808_v42  ;;  %v1834_v24 = vpop.permute.xlu1 %1833  ;;  %v1335_v52 = vsel %vm1244_vm1, %v6572_v33, %v4628_v5  ;;  %v6573_v42 = vld [vmem:[#allocation230_spill] sm:$0xff] }
 0x3e0   :  { %v1432_v15 = vsel %vm1341_vm2, %v6575_v46, %v1335_v52  ;;  %v6583_v33 = vld [vmem:[#allocation102_spill] sm:$0xff] }
 0x3e1   :  { %1920 = vperm.xlu0 %2738, %v506_v37   ;;  %v6574_v37 = vld [vmem:[#allocation41_spill] sm:$0xff]  ;;  %v512_v52 = vmul.f32 0.54627424, %v6583_v33 }
 0x3e2   :  { %v651_v49 = vmul.f32 2.8906114, %v6574_v37 }
 0x3e3   :  { %v1469_v22 = vpop.permute.xlu0 %1468 }
 0x3e4   :  { %v1510_v56 = vsel %vm1438_vm4, %v1469_v22, %v1429_v4  ;;  %v6576_v4 = vld [vmem:[#allocation83_spill] sm:$0xff] }
 0x3e5   :  { %v1607_v30 = vsel %vm1519_vm3, %v4489_v57, %v1510_v56  ;;  %2728 = vset.pattern.permute.xlu2 %v6482_v28  ;;  %v6569_v57 = vld [vmem:[#allocation22_spill] sm:$0xff]  ;;  %v6577_v56 = vld [vmem:[#allocation47_spill] sm:$0xff] }
 0x3e6   :  { %2727 = vset.pattern.permute.xlu1 %v6482_v28  ;;  %2109 = vperm.xlu2 %2728, %v665_v0   ;;  %v4813_v48 = vpop.permute.xlu2 %1915  ;;  %v1704_v36 = vsel %vm1616_vm5, %v4183_v6, %v1607_v30  ;;  %v652_v20 = vmul.f32 2.8906114, %v6569_v57  ;;  %v1426_v6 = vsel %vm1341_vm2, %v6571_v59, %v1329_v44  ;;  %v6578_v30 = vld [vmem:[#allocation86_spill] sm:$0xff]  ;;  %v6581_v57 = vld [vmem:[#allocation77_spill] sm:$0xff] }
 0x3e7   :  { %2104 = vperm.xlu1 %2727, %v664_v54   ;;  %v1849_v58 = vpop.permute.xlu1 %1848  ;;  %v1801_v11 = vsel %vm1713_vm6, %v6568_v2, %v1704_v36  ;;  %v1507_v53 = vsel %vm1438_vm4, %v6573_v42, %v1426_v6  ;;  %v6580_v2 = vld [vmem:[#allocation15_spill] sm:$0xff]  ;;  %v6582_v59 = vld [vmem:[#allocation42_spill] sm:$0xff] }
 0x3e8   :  { %v1898_v47 = vsel %vm1810_vm7, %v1849_v58, %v1801_v11  ;;  %v1604_v22 = vsel %vm1519_vm3, %v6576_v4, %v1507_v53  ;;  %v668_v54 = vmul.f32 %v652_v20, %v6577_v56  ;;  %v6587_v56 = vld [vmem:[#allocation232_spill] sm:$0xff] }
 0x3e9   :  { %1935 = vperm.xlu0 %2738, %v509_v29   ;;  %v1701_v36 = vsel %vm1616_vm5, %v6578_v30, %v1604_v22  ;;  %v6579_v29 = vld [vmem:[#allocation56_spill] sm:$0xff]  ;;  %v6586_v22 = vld [vmem:[#allocation209_spill] sm:$0xff] }
 0x3ea   :  { %v667_v58 = vmul.f32 %v651_v49, %v6579_v29  ;;  %v1798_v11 = vsel %vm1713_vm6, %v6580_v2, %v1701_v36  ;;  %v6584_v49 = vld [vmem:[#allocation26_spill] sm:$0xff] }
 0x3eb   :  { %v1481_v0 = vpop.permute.xlu0 %1480  ;;  %v1895_v20 = vsel %vm1810_vm7, %v1834_v24, %v1798_v11  ;;  %v653_v46 = vmul.f32 2.8906114, %v6584_v49 }
 0x3ec   :  { %v1513_v61 = vsel %vm1438_vm4, %v1481_v0, %v1432_v15  ;;  %v6585_v15 = vld [vmem:[#allocation45_spill] sm:$0xff]  ;;  %v1338_v0 = vsel %vm1244_vm1, %v6586_v22, %v4628_v5 }
 0x3ed   :  { %v1610_v51 = vsel %vm1519_vm3, %v6581_v57, %v1513_v61  ;;  %v654_v4 = vmul.f32 2.8906114, %v6585_v15  ;;  %v6588_v61 = vld [vmem:[#allocation60_spill] sm:$0xff] }
 0x3ee   :  { %2124 = vperm.xlu2 %2728, %v668_v54   ;;  %v1931_v44 = vpop.permute.xlu2 %1930  ;;  %v1707_v6 = vsel %vm1616_vm5, %v6582_v59, %v1610_v51  ;;  %v1435_v54 = vsel %vm1341_vm2, %v6587_v56, %v1338_v0  ;;  %v669_v29 = vmul.f32 %v653_v46, %v6588_v61  ;;  %v6590_v57 = vld [vmem:[#allocation216_spill] sm:$0xff]  ;;  %v6592_v59 = vld [vmem:[#allocation197_spill] sm:$0xff] }
 0x3ef   :  { %v4868_v42 = vsel %vm1907_vm8, %v1931_v44, %v1895_v20  ;;  %2119 = vperm.xlu1 %2727, %v667_v58   ;;  %v1864_v53 = vpop.permute.xlu1 %1863  ;;  %v1804_v37 = vsel %vm1713_vm6, %v4582_v17, %v1707_v6  ;;  %v670_v17 = vmul.f32 %v654_v4, %v6541_v60  ;;  %v6589_v58 = vld [vmem:[#allocation88_spill] sm:$0xff]  ;;  %v1325_v60 = vsel %vm1244_vm1, %v6592_v59, %v4628_v5  ;;  %v6595_v4 = vld [vmem:[#allocation213_spill] sm:$0xff]  ;;  %v6601_v59 = vld [vmem:[#allocation34_spill] sm:$0xff] }
 0x3f0   :  { %v1901_v24 = vsel %vm1810_vm7, %v1864_v53, %v1804_v37  ;;  %v6591_v20 = vld [vmem:[#allocation104_spill] sm:$0xff]  ;;  %v6593_v37 = vld [vmem:[#allocation30_spill] sm:$0xff]  ;;  %v1422_v22 = vsel %vm1341_vm2, %v6595_v4, %v1325_v60  ;;  %v659_v60 = vmul.f32 2.8906114, %v6601_v59 }
 0x3f1   :  { %1950 = vperm.xlu0 %2738, %v512_v52   ;;  %v515_v44 = vmul.f32 0.54627424, %v6591_v20  ;;  %v656_v49 = vmul.f32 2.8906114, %v6593_v37  ;;  %v6594_v46 = vld [vmem:[#allocation48_spill] sm:$0xff]  ;;  %v6603_v37 = vld [vmem:[#allocation215_spill] sm:$0xff] }
 0x3f2   :  { %v657_v15 = vmul.f32 2.8906114, %v6594_v46  ;;  %v6604_v46 = vld [vmem:[#allocation237_spill] sm:$0xff] }
 0x3f3   :  { %v1493_v30 = vpop.permute.xlu0 %1492 }
 0x3f4   :  { %v1516_v36 = vsel %vm1438_vm4, %v1493_v30, %v1435_v54  ;;  %v673_v54 = vmul.f32 %v657_v15, %v6547_v43  ;;  %v6597_v30 = vld [vmem:[#allocation63_spill] sm:$0xff] }
 0x3f5   :  { %v1613_v2 = vsel %vm1519_vm3, %v6589_v58, %v1516_v36  ;;  %v6598_v36 = vld [vmem:[#allocation78_spill] sm:$0xff]  ;;  %v6599_v58 = vld [vmem:[#allocation68_spill] sm:$0xff] }
 0x3f6   :  { %2134 = vperm.xlu2 %2728, %v670_v17   ;;  %v1946_v11 = vpop.permute.xlu2 %1945  ;;  %v1710_v51 = vsel %vm1616_vm5, %v6590_v57, %v1613_v2  ;;  %v672_v17 = vmul.f32 %v656_v49, %v6597_v30 }
 0x3f7   :  { %v4901_v6 = vsel %vm1907_vm8, %v1946_v11, %v1898_v47  ;;  %2129 = vperm.xlu1 %2727, %v669_v29   ;;  %v1879_v33 = vpop.permute.xlu1 %1878  ;;  %v1807_v52 = vsel %vm1713_vm6, %v4591_v41, %v1710_v51  ;;  %v6596_v47 = vld [vmem:[#allocation51_spill] sm:$0xff] }
 0x3f8   :  { %v1904_v53 = vsel %vm1810_vm7, %v1879_v33, %v1807_v52  ;;  %v1503_v0 = vsel %vm1438_vm4, %v6596_v47, %v1422_v22  ;;  %v6600_v11 = vld [vmem:[#allocation107_spill] sm:$0xff]  ;;  %v6605_v47 = vld [vmem:[#allocation14_spill] sm:$0xff] }
 0x3f9   :  { %1965 = vperm.xlu0 %2738, %v515_v44   ;;  %v518_v57 = vmul.f32 0.54627424, %v6600_v11  ;;  %v6602_v33 = vld [vmem:[#allocation211_spill] sm:$0xff] }
 0x3fa   :  { %v1328_v52 = vsel %vm1244_vm1, %v6602_v33, %v4628_v5 }
 0x3fb   :  { %v1523_v56 = vpop.permute.xlu0 %1522  ;;  %v1425_v49 = vsel %vm1341_vm2, %v6603_v37, %v1328_v52 }
 0x3fc   :  { %v1600_v41 = vsel %vm1519_vm3, %v1523_v56, %v1503_v0  ;;  %v650_v0 = vmul.f32 2.8906114, %v6605_v47  ;;  %v6606_v56 = vld [vmem:[#allocation66_spill] sm:$0xff] }
 0x3fd   :  { %v1697_v61 = vsel %vm1616_vm5, %v6598_v36, %v1600_v41  ;;  %v6607_v41 = vld [vmem:[#allocation91_spill] sm:$0xff] }
 0x3fe   :  { %2149 = vperm.xlu2 %2728, %v673_v54   ;;  %v1961_v29 = vpop.permute.xlu2 %1960  ;;  %v1794_v2 = vsel %vm1713_vm6, %v6599_v58, %v1697_v61  ;;  %v675_v54 = vmul.f32 %v659_v60, %v6606_v56  ;;  %v6609_v61 = vld [vmem:[#allocation57_spill] sm:$0xff]  ;;  %v6612_v60 = vld [vmem:[#allocation2_spill] sm:$0xff] }
 0x3ff   :  { %v4929_v43 = vsel %vm1907_vm8, %v1961_v29, %v1901_v24  ;;  %2144 = vperm.xlu1 %2727, %v672_v17   ;;  %v1911_v51 = vpop.permute.xlu1 %1910  ;;  %v1891_v20 = vsel %vm1810_vm7, %v4611_v21, %v1794_v2  ;;  %v660_v24 = vmul.f32 2.8906114, %v4348_v25  ;;  %v1506_v21 = vsel %vm1438_vm4, %v6604_v46, %v1425_v49  ;;  %v6608_v17 = vld [vmem:[#allocation190_spill] sm:$0xff] }
 0x400   :  { %v1988_v44 = vsel %vm1907_vm8, %v1911_v51, %v1891_v20  ;;  %v666_v29 = vmul.f32 %v650_v0, %v6609_v61  ;;  %v6611_v20 = vld [vmem:[#allocation54_spill] sm:$0xff]  ;;  %v655_v33 = vmul.f32 2.8906114, %v6612_v60  ;;  %v6620_v60 = vld [vmem:[#allocation124_spill] sm:$0xff] }
 0x401   :  { %1980 = vperm.xlu0 %2738, %v518_v57   ;;  %v676_v4 = vmul.f32 %v660_v24, %v6553_v35  ;;  %v6610_v57 = vld [vmem:[#allocation40_spill] sm:$0xff]  ;;  %v663_v59 = vmul.f32 2.8906114, %v6611_v20  ;;  %v6613_v24 = vld [vmem:[#allocation69_spill] sm:$0xff]  ;;  %v6615_v0 = vld [vmem:[#allocation10_spill] sm:$0xff] }
 0x402   :  { %v662_v51 = vmul.f32 2.8906114, %v6610_v57  ;;  %v658_v56 = vmul.f32 2.8906114, %v6615_v0 }
 0x403   :  { %v1538_v15 = vpop.permute.xlu0 %1537 }
 0x404   :  { %v1603_v22 = vsel %vm1519_vm3, %v1538_v15, %v1506_v21  ;;  %v678_v37 = vmul.f32 %v662_v51, %v6613_v24 }
 0x405   :  { %v1700_v25 = vsel %vm1616_vm5, %v6607_v41, %v1603_v22  ;;  %v4993_v22 = vld [vmem:[%s5886_s0 + $0x8] sm:$0xff] }
 0x406   :  { %2164 = vperm.xlu2 %2728, %v676_v4   ;;  %v1976_v30 = vpop.permute.xlu2 %1975  ;;  %v1797_v36 = vsel %vm1713_vm6, %v6608_v17, %v1700_v25  ;;  %v4987_v4 = vld [vmem:[%s5886_s0 + $0x10] sm:$0xff]  ;;  %v4996_v47 = vmul.f32 -0.4570458, %v4993_v22  ;;  %v6617_v25 = vld [vmem:[#allocation123_spill] sm:$0xff] }
 0x407   :  { %v4962_v35 = vsel %vm1907_vm8, %v1976_v30, %v1904_v53  ;;  %2159 = vperm.xlu1 %2727, %v675_v54   ;;  %v1926_v58 = vpop.permute.xlu1 %1925  ;;  %v1894_v2 = vsel %vm1810_vm7, %v4638_v55, %v1797_v36  ;;  %v679_v53 = vmul.f32 %v663_v59, %v6559_v9  ;;  %v6614_v55 = vld [vmem:[#allocation50_spill] sm:$0xff]  ;;  %v682_v9 = vmul.f32 -0.4570458, %v4987_v4  ;;  %v6616_v54 = vld [vmem:[#allocation116_spill] sm:$0xff] }
 0x408   :  { %v1991_v11 = vsel %vm1907_vm8, %v1926_v58, %v1894_v2  ;;  %v671_v49 = vmul.f32 %v655_v33, %v6614_v55  ;;  %v809_v30 = vmul.f32 %v6617_v25, %v4996_v47  ;;  %v6618_v17 = vld [vmem:[#allocation52_spill] sm:$0xff]  ;;  %v5016_v2 = vld [vmem:[%s5886_s0 + $0x20] sm:$0xff]  ;;  %v5051_v25 = vld [vmem:[%s5886_s0 + $0x38] sm:$0xff] }
 0x409   :  { %2114 = vperm.xlu0 %2738, %v666_v29   ;;  %v810_v41 = vmul.f32 %v6616_v54, %v682_v9  ;;  %v674_v36 = vmul.f32 %v658_v56, %v6618_v17  ;;  %v5019_v57 = vmul.f32 -0.4570458, %v5016_v2  ;;  %v6624_v54 = vld [vmem:[#allocation85_spill] sm:$0xff]  ;;  %v5057_v17 = vld [vmem:[%s5886_s0 + $0x30] sm:$0xff] }
 0x40b   :  { %v4972_v52 = vpop.permute.xlu0 %1552  ;;  %v812_v33 = vmul.f32 %v6620_v60, %v5019_v57  ;;  %v6626_v60 = vld [vmem:[#allocation208_spill] sm:$0xff] }
 0x40e   :  { %2179 = vperm.xlu2 %2728, %v679_v53   ;;  %v6621_v53 = vld [vmem:[#allocation115_spill] sm:$0xff] }
 0x40f   :  { %2174 = vperm.xlu1 %2727, %v678_v37   ;;  %v4978_v46 = vpop.permute.xlu1 %1940  ;;  %v2008_v21 = vpop.permute.xlu2 %2007  ;;  %v6622_v37 = vld [vmem:[#allocation55_spill] sm:$0xff] }
 0x410   :  { %v4982_v15 = vsel %vm2004_vm9, %v2008_v21, %v1988_v44 }
 0x411   :  { %2139 = vperm.xlu0 %2738, %v671_v49   ;;  %v6623_v49 = vld [vmem:[#allocation80_spill] sm:$0xff] }
 0x412   :  { %v1340_v21 = vsel %vm1244_vm1, %v6623_v49, %v4628_v5 }
 0x413   :  { %v4999_v44 = vpop.permute.xlu0 %1567 }
 0x416   :  { %2730 = vset.pattern.permute.xlu2 %v6400_v38 }
 0x417   :  { %2729 = vset.pattern.permute.xlu1 %v6400_v38  ;;  %v5007_v61 = vpop.permute.xlu1 %1955  ;;  %2211 = vperm.xlu2 %2730, %v810_v41   ;;  %v2023_v29 = vpop.permute.xlu2 %2022  ;;  %v5024_v38 = vld [vmem:[%s5886_s0 + $0x18] sm:$0xff]  ;;  %v1437_v41 = vsel %vm1341_vm2, %v6624_v54, %v1340_v21  ;;  %v6629_v21 = vld [vmem:[#allocation118_spill] sm:$0xff] }
 0x418   :  { %v5011_v58 = vsel %vm2004_vm9, %v2023_v29, %v1991_v11  ;;  %2206 = vperm.xlu1 %2729, %v809_v30   ;;  %v5027_v51 = vmul.f32 -0.4570458, %v5024_v38  ;;  %v6619_v11 = vld [vmem:[#allocation13_spill] sm:$0xff]  ;;  %v687_v30 = vmul.f32 -0.4570458, %v5051_v25  ;;  %v6625_v29 = vld [vmem:[#allocation70_spill] sm:$0xff] }
 0x419   :  { %2154 = vperm.xlu0 %2738, %v674_v36   ;;  %v661_v20 = vmul.f32 2.8906114, %v6619_v11  ;;  %v5060_v36 = vmul.f32 -0.4570458, %v5057_v17  ;;  %v1518_v11 = vsel %vm1438_vm4, %v6625_v29, %v1437_v41  ;;  %v6630_v41 = vld [vmem:[#allocation154_spill] sm:$0xff] }
 0x41a   :  { %v811_v24 = vmul.f32 %v6621_v53, %v5027_v51  ;;  %v1050_v29 = vmul.f32 %v6630_v41, %v682_v9 }
 0x41b   :  { %v5030_v59 = vpop.permute.xlu0 %1582  ;;  %v677_v55 = vmul.f32 %v661_v20, %v6622_v37  ;;  %v814_v54 = vmul.f32 %v6629_v21, %v5060_v36  ;;  %v6634_v21 = vld [vmem:[#allocation65_spill] sm:$0xff] }
 0x41f   :  { %v5041_v0 = vpop.permute.xlu1 %1970  ;;  %2221 = vperm.xlu2 %2730, %v812_v33   ;;  %v5043_v56 = vpop.permute.xlu2 %2032  ;;  %v1326_v33 = vsel %vm1244_vm1, %v6626_v60, %v4628_v5  ;;  %v6631_v60 = vld [vmem:[#allocation212_spill] sm:$0xff] }
 0x420   :  { %2216 = vperm.xlu1 %2729, %v811_v24   ;;  %v6627_v24 = vld [vmem:[#allocation126_spill] sm:$0xff] }
 0x421   :  { %2169 = vperm.xlu0 %2738, %v677_v55   ;;  %v815_v37 = vmul.f32 %v6627_v24, %v687_v30  ;;  %v6628_v55 = vld [vmem:[#allocation62_spill] sm:$0xff] }
 0x422   :  { %v1423_v49 = vsel %vm1341_vm2, %v6628_v55, %v1326_v33  ;;  %v5094_v33 = vld [vmem:[%s5886_s0 + $0x50] sm:$0xff] }
 0x423   :  { %v1598_v20 = vpop.permute.xlu0 %1597  ;;  %v690_v9 = vmul.f32 -0.4570458, %v5094_v33 }
 0x424   :  { %v5071_v53 = vsel %vm1519_vm3, %v1598_v20, %v1518_v11  ;;  %v1331_v11 = vsel %vm1244_vm1, %v6631_v60, %v4628_v5  ;;  %v6632_v20 = vld [vmem:[#allocation227_spill] sm:$0xff]  ;;  %v6635_v60 = vld [vmem:[#allocation168_spill] sm:$0xff] }
 0x425   :  { %v1504_v24 = vsel %vm1438_vm4, %v6632_v20, %v1423_v49  ;;  %v5106_v49 = vld [vmem:[%s5886_s0 + $0x48] sm:$0xff]  ;;  %v1058_v16 = vmul.f32 %v6648_v7, %v690_v9 }
 0x426   :  { %v1601_v41 = vsel %vm1519_vm3, %v6634_v21, %v1504_v24  ;;  %v6638_v21 = vld [vmem:[#allocation129_spill] sm:$0xff] }
 0x427   :  { %v5080_v32 = vpop.permute.xlu1 %1985  ;;  %2236 = vperm.xlu2 %2730, %v815_v37   ;;  %v5082_v63 = vpop.permute.xlu2 %2047  ;;  %v6633_v37 = vld [vmem:[#allocation74_spill] sm:$0xff]  ;;  %v1698_v20 = vsel %vm1616_vm5, %v6635_v60, %v1601_v41  ;;  %v818_v3 = vmul.f32 %v6638_v21, %v690_v9 }
 0x428   :  { %2231 = vperm.xlu1 %2729, %v814_v54   ;;  %v1428_v55 = vsel %vm1341_vm2, %v6633_v37, %v1331_v11  ;;  %v5109_v54 = vmul.f32 -0.4570458, %v5106_v49  ;;  %v1795_v11 = vsel %vm1713_vm6, %v6636_v12, %v1698_v20  ;;  %v6639_v12 = vld [vmem:[#allocation120_spill] sm:$0xff]  ;;  %v5155_v21 = vld [vmem:[%s5886_s0 + $0x60] sm:$0xff] }
 0x429   :  { %2405 = vperm.xlu0 %2738, %v1050_v29   ;;  %v1509_v29 = vsel %vm1438_vm4, %v6637_v18, %v1428_v55  ;;  %v6640_v20 = vld [vmem:[#allocation164_spill] sm:$0xff]  ;;  %v6641_v55 = vld [vmem:[#allocation214_spill] sm:$0xff] }
 0x42a   :  { %v1606_v40 = vsel %vm1519_vm3, %v4972_v52, %v1509_v29  ;;  %v817_v60 = vmul.f32 %v6639_v12, %v5109_v54  ;;  %v1055_v31 = vmul.f32 %v6640_v20, %v687_v30  ;;  %v6643_v30 = vld [vmem:[#allocation82_spill] sm:$0xff]  ;;  %v6644_v12 = vld [vmem:[#allocation84_spill] sm:$0xff] }
 0x42b   :  { %v1819_v37 = vpop.permute.xlu0 %1818 }
 0x42c   :  { %v1892_v24 = vsel %vm1810_vm7, %v1819_v37, %v1795_v11  ;;  %v1334_v11 = vsel %vm1244_vm1, %v6641_v55, %v4628_v5  ;;  %v6642_v37 = vld [vmem:[#allocation6_spill] sm:$0xff]  ;;  %v6645_v55 = vld [vmem:[#allocation235_spill] sm:$0xff] }
 0x42d   :  { %v1989_v41 = vsel %vm1907_vm8, %v4813_v48, %v1892_v24  ;;  %v1703_v52 = vsel %vm1616_vm5, %v6642_v37, %v1606_v40  ;;  %v5146_v48 = vld [vmem:[%s5886_s0 + $0x68] sm:$0xff]  ;;  %v1431_v24 = vsel %vm1341_vm2, %v6643_v30, %v1334_v11  ;;  %v5158_v40 = vmul.f32 -0.4570458, %v5155_v21  ;;  %v6646_v11 = vld [vmem:[#allocation132_spill] sm:$0xff] }
 0x42e   :  { %v1512_v37 = vsel %vm1438_vm4, %v6645_v55, %v1431_v24 }
 0x42f   :  { %2251 = vperm.xlu2 %2730, %v818_v3   ;;  %v5132_v18 = vpop.permute.xlu2 %2062  ;;  %v693_v3 = vmul.f32 -0.4570458, %v5146_v48  ;;  %v1609_v39 = vsel %vm1519_vm3, %v4999_v44, %v1512_v37  ;;  %v6652_v37 = vld [vmem:[#allocation71_spill] sm:$0xff] }
 0x430   :  { %2246 = vperm.xlu1 %2729, %v817_v60   ;;  %v5141_v29 = vpop.permute.xlu1 %2017  ;;  %v1800_v60 = vsel %vm1713_vm6, %v6644_v12, %v1703_v52  ;;  %v6647_v52 = vld [vmem:[#allocation122_spill] sm:$0xff] }
 0x431   :  { %2430 = vperm.xlu0 %2738, %v1055_v31   ;;  %v821_v30 = vmul.f32 %v6646_v11, %v693_v3  ;;  %v820_v12 = vmul.f32 %v6647_v52, %v5158_v40  ;;  %v6651_v11 = vld [vmem:[#allocation218_spill] sm:$0xff]  ;;  %v6653_v52 = vld [vmem:[#allocation76_spill] sm:$0xff] }
 0x432   :  { %v1337_v44 = vsel %vm1244_vm1, %v6651_v11, %v4628_v5 }
 0x433   :  { %v1844_v20 = vpop.permute.xlu0 %1843  ;;  %v1434_v7 = vsel %vm1341_vm2, %v6653_v52, %v1337_v44  ;;  %v6656_v44 = vld [vmem:[#allocation145_spill] sm:$0xff] }
 0x434   :  { %v1897_v31 = vsel %vm1810_vm7, %v1844_v20, %v1800_v60  ;;  %v6649_v60 = vld [vmem:[#allocation135_spill] sm:$0xff]  ;;  %v6650_v20 = vld [vmem:[#allocation217_spill] sm:$0xff] }
 0x435   :  { %v5175_v45 = vsel %vm1907_vm8, %v4978_v46, %v1897_v31  ;;  %v904_v55 = vsub.f32 %v6650_v20, %v6649_v60  ;;  %v1706_v46 = vsel %vm1616_vm5, %v6652_v37, %v1609_v39  ;;  %v2768_v39 = vld [vmem:[%s5886_s0] sm:$0xff]  ;;  %v6655_v20 = vld [vmem:[#allocation139_spill] sm:$0xff]  ;;  %v1515_v37 = vsel %vm1438_vm4, %v6656_v44, %v1434_v7 }
 0x436   :  { %v1612_v52 = vsel %vm1519_vm3, %v5030_v59, %v1515_v37  ;;  %v6659_v7 = vld [vmem:[#allocation238_spill] sm:$0xff]  ;;  %v6663_v59 = vld [vmem:[#allocation148_spill] sm:$0xff] }
 0x437   :  { %2266 = vperm.xlu2 %2730, %v821_v30   ;;  %v5180_v24 = vpop.permute.xlu2 %2077  ;;  %v5200_v30 = vld [vmem:[%s5886_s0 + $0x78] sm:$0xff]  ;;  %v968_v11 = vsub.f32 %v904_v55, %v6655_v20  ;;  %v907_v37 = vsub.f32 %v6663_v59, %v6662_v27 }
 0x438   :  { %2261 = vperm.xlu1 %2729, %v820_v12   ;;  %v2028_v31 = vpop.permute.xlu1 %2027  ;;  %6654 = vst [vmem:[#allocation113_spill] sm:$0xff] %v5200_v30  ;;  %v5203_v60 = vmul.f32 -0.4570458, %v5200_v30  ;;  %v824_v12 = vmul.f32 0.37317634, %v2768_v39  ;;  %v6657_v39 = vld [vmem:[#allocation106_spill] sm:$0xff] }
 0x439   :  { %v2089_v9 = vsel %vm2004_vm9, %v2028_v31, %v4868_v42  ;;  %2445 = vperm.xlu0 %2738, %v1058_v16   ;;  %v1803_v42 = vsel %vm1713_vm6, %v4636_v1, %v1706_v46  ;;  %v6658_v20 = vld [vmem:[#allocation125_spill] sm:$0xff] }
 0x43a   :  { %v823_v1 = vmul.f32 %v6657_v39, %v5203_v60  ;;  %v984_v46 = vmul.f32 %v968_v11, %v824_v12  ;;  %v906_v44 = vsub.f32 %v6659_v7, %v6658_v20  ;;  %v6664_v30 = vld [vmem:[#allocation89_spill] sm:$0xff]  ;;  %v6665_v11 = vld [vmem:[#allocation59_spill] sm:$0xff] }
 0x43b   :  { %v1859_v16 = vpop.permute.xlu0 %1858  ;;  %v2086_v39 = vsel %vm2004_vm9, %v6665_v11, %v1989_v41  ;;  %v6668_v7 = vld [vmem:[#allocation173_spill] sm:$0xff]  ;;  %v6671_v11 = vld [vmem:[#allocation127_spill] sm:$0xff] }
 0x43c   :  { %v1900_v31 = vsel %vm1810_vm7, %v1859_v16, %v1803_v42  ;;  %v1061_v42 = vmul.f32 %v6660_v8, %v693_v3  ;;  %v6661_v16 = vmov 2   ;;  %v827_v3 = vmul.f32 0.37317634, %v5024_v38  ;;  %v6669_v41 = vld [vmem:[#allocation21_spill] sm:$0xff] }
 0x43d   :  { %v5223_v55 = vsel %vm1907_vm8, %v5007_v61, %v1900_v31  ;;  %v1709_v61 = vsel %vm1616_vm5, %v6664_v30, %v1612_v52  ;;  %v6666_v30 = vld [vmem:[#allocation141_spill] sm:$0xff]  ;;  %v1209_v59 = vsub.f32 %v6669_v41, %v6668_v7  ;;  %v6673_v7 = vld [vmem:[#allocation222_spill] sm:$0xff]  ;;  %v6674_v41 = vld [vmem:[#allocation16_spill] sm:$0xff] }
 0x43e   :  { %v971_v52 = vsub.f32 %v907_v37, %v6666_v30 }
 0x43f   :  { %2732 = vset.pattern.permute.xlu2 %v6661_v16 }
 0x440   :  { %2276 = vperm.xlu1 %2729, %v823_v1   ;;  %v2043_v31 = vpop.permute.xlu1 %2042  ;;  %2298 = vperm.xlu2 %2732, %v984_v46   ;;  %v2110_v12 = vpop.permute.xlu2 %2109  ;;  %v826_v1 = vmul.f32 0.37317634, %v4987_v4  ;;  %v6667_v46 = vld [vmem:[#allocation149_spill] sm:$0xff] }
 0x441   :  { %v5243_v8 = vsel %vm2004_vm9, %v2043_v31, %v4901_v6  ;;  %v5247_v27 = vsel %vm2101_vm10, %v2110_v12, %v2086_v39  ;;  %2460 = vperm.xlu0 %2738, %v1061_v42   ;;  %v970_v20 = vsub.f32 %v906_v44, %v6667_v46  ;;  %v1806_v6 = vsel %vm1713_vm6, %v4676_v50, %v1709_v61  ;;  %v6670_v42 = vld [vmem:[#allocation200_spill] sm:$0xff]  ;;  %v6672_v39 = vld [vmem:[#allocation219_spill] sm:$0xff] }
 0x442   :  { %v1327_v37 = vsel %vm1244_vm1, %v6670_v42, %v4628_v5  ;;  %v909_v30 = vsub.f32 %v6672_v39, %v6671_v11  ;;  %v987_v46 = vmul.f32 %v971_v52, %v827_v3  ;;  %v6676_v52 = vld [vmem:[#allocation128_spill] sm:$0xff]  ;;  %v6679_v39 = vld [vmem:[#allocation79_spill] sm:$0xff] }
 0x443   :  { %v1874_v31 = vpop.permute.xlu0 %1873  ;;  %v1424_v50 = vsel %vm1341_vm2, %v6673_v7, %v1327_v37  ;;  %v986_v61 = vmul.f32 %v970_v20, %v826_v1  ;;  %v6677_v42 = vld [vmem:[#allocation72_spill] sm:$0xff] }
 0x444   :  { %v1903_v12 = vsel %vm1810_vm7, %v1874_v31, %v1806_v6  ;;  %v1225_v6 = vmul.f32 %v1209_v59, %v6674_v41  ;;  %v1505_v5 = vsel %vm1438_vm4, %v4783_v34, %v1424_v50  ;;  %v6675_v31 = vld [vmem:[#allocation12_spill] sm:$0xff]  ;;  %v908_v37 = vsub.f32 %v6677_v42, %v6676_v52  ;;  %v6681_v41 = vld [vmem:[#allocation183_spill] sm:$0xff]  ;;  %v6684_v52 = vld [vmem:[#allocation130_spill] sm:$0xff] }
 0x445   :  { %v5267_v44 = vsel %vm1907_vm8, %v5041_v0, %v1903_v12  ;;  %v1712_v0 = vsel %vm1616_vm5, %v6675_v31, %v5071_v53  ;;  %v2769_v53 = vld [vmem:[%s5886_s0 + $0x28] sm:$0xff]  ;;  %v6678_v59 = vld [vmem:[#allocation152_spill] sm:$0xff]  ;;  %v6685_v42 = vld [vmem:[#allocation221_spill] sm:$0xff] }
 0x446   :  { %v829_v20 = vmul.f32 0.37317634, %v2769_v53  ;;  %v973_v11 = vsub.f32 %v909_v30, %v6678_v59  ;;  %v6680_v7 = vld [vmem:[#allocation140_spill] sm:$0xff]  ;;  %v6683_v30 = vld [vmem:[#allocation210_spill] sm:$0xff] }
 0x447   :  { %v972_v50 = vsub.f32 %v908_v37, %v6680_v7  ;;  %v912_v37 = vsub.f32 %v6685_v42, %v6684_v52  ;;  %v6693_v42 = vld [vmem:[#allocation188_spill] sm:$0xff] }
 0x448   :  { %2733 = vset.pattern.permute.xlu1 %v6661_v16  ;;  %v2058_v12 = vpop.permute.xlu1 %2057  ;;  %2313 = vperm.xlu2 %2732, %v987_v46   ;;  %v2125_v3 = vpop.permute.xlu2 %2124  ;;  %v1602_v46 = vsel %vm1519_vm3, %v6679_v39, %v1505_v5  ;;  %v989_v53 = vmul.f32 %v973_v11, %v829_v20  ;;  %v6686_v39 = vld [vmem:[#allocation17_spill] sm:$0xff] }
 0x449   :  { %v5288_v1 = vsel %vm2004_vm9, %v2058_v12, %v4929_v43  ;;  %v5292_v34 = vsel %vm2101_vm10, %v2125_v3, %v2089_v9  ;;  %2308 = vperm.xlu1 %2733, %v986_v61   ;;  %2594 = vperm.xlu0 %2738, %v1225_v6   ;;  %v828_v43 = vmul.f32 0.37317634, %v5016_v2  ;;  %v6682_v9 = vld [vmem:[#allocation24_spill] sm:$0xff]  ;;  %v1809_v61 = vsel %vm1713_vm6, %v4715_v10, %v1712_v0 }
 0x44a   :  { %v1214_v31 = vsub.f32 %v6682_v9, %v6681_v41  ;;  %v1699_v3 = vsel %vm1616_vm5, %v6683_v30, %v1602_v46  ;;  %v6687_v41 = vld [vmem:[#allocation220_spill] sm:$0xff]  ;;  %v6688_v9 = vld [vmem:[#allocation53_spill] sm:$0xff]  ;;  %v831_v30 = vmul.f32 0.37317634, %v5051_v25 }
 0x44b   :  { %v1889_v6 = vpop.permute.xlu0 %1888  ;;  %v988_v59 = vmul.f32 %v972_v50, %v828_v43  ;;  %v2091_v46 = vsel %vm2004_vm9, %v6687_v41, %v5175_v45  ;;  %v2770_v45 = vld [vmem:[%s5886_s0 + $0x40] sm:$0xff]  ;;  %v6691_v50 = vld [vmem:[#allocation155_spill] sm:$0xff] }
 0x44c   :  { %v1906_v12 = vsel %vm1810_vm7, %v1889_v6, %v1809_v61  ;;  %v1230_v10 = vmul.f32 %v1214_v31, %v6686_v39  ;;  %v6689_v61 = vld [vmem:[#allocation131_spill] sm:$0xff]  ;;  %v6690_v6 = vld [vmem:[#allocation146_spill] sm:$0xff]  ;;  %v832_v43 = vmul.f32 0.37317634, %v2770_v45  ;;  %v976_v31 = vsub.f32 %v912_v37, %v6691_v50  ;;  %v6695_v37 = vld [vmem:[#allocation133_spill] sm:$0xff] }
 0x44d   :  { %v5316_v5 = vsel %vm1907_vm8, %v5080_v32, %v1906_v12  ;;  %v1796_v32 = vsel %vm1713_vm6, %v6688_v9, %v1699_v3  ;;  %v911_v12 = vsub.f32 %v6690_v6, %v6689_v61  ;;  %v6692_v3 = vld [vmem:[#allocation142_spill] sm:$0xff]  ;;  %v6697_v61 = vld [vmem:[#allocation177_spill] sm:$0xff]  ;;  %v6700_v50 = vld [vmem:[#allocation151_spill] sm:$0xff] }
 0x44e   :  { %v1893_v39 = vsel %vm1810_vm7, %v4764_v23, %v1796_v32  ;;  %v6698_v23 = vld [vmem:[#allocation223_spill] sm:$0xff]  ;;  %v6699_v45 = vld [vmem:[#allocation134_spill] sm:$0xff] }
 0x44f   :  { %v975_v52 = vsub.f32 %v911_v12, %v6692_v3  ;;  %v2094_v32 = vsel %vm2004_vm9, %v6698_v23, %v5223_v55  ;;  %v914_v3 = vsub.f32 %v6700_v50, %v6699_v45  ;;  %v6707_v23 = vld [vmem:[#allocation181_spill] sm:$0xff]  ;;  %v6708_v50 = vld [vmem:[#allocation36_spill] sm:$0xff] }
 0x450   :  { %v2073_v0 = vpop.permute.xlu1 %2072  ;;  %2323 = vperm.xlu2 %2732, %v989_v53   ;;  %v2135_v7 = vpop.permute.xlu2 %2134 }
 0x451   :  { %v5333_v20 = vsel %vm2004_vm9, %v2073_v0, %v4962_v35  ;;  %v5337_v11 = vsel %vm2101_vm10, %v2135_v7, %v2091_v46  ;;  %2318 = vperm.xlu1 %2733, %v988_v59   ;;  %2619 = vperm.xlu0 %2738, %v1230_v10   ;;  %v6694_v35 = vld [vmem:[#allocation28_spill] sm:$0xff]  ;;  %v992_v46 = vmul.f32 %v976_v31, %v832_v43  ;;  %v2771_v43 = vld [vmem:[%s5886_s0 + $0x58] sm:$0xff] }
 0x452   :  { %v1217_v53 = vsub.f32 %v6694_v35, %v6693_v42  ;;  %v6696_v7 = vld [vmem:[#allocation224_spill] sm:$0xff]  ;;  %v991_v9 = vmul.f32 %v975_v52, %v831_v30  ;;  %v835_v31 = vmul.f32 0.37317634, %v2771_v43  ;;  %v6701_v30 = vld [vmem:[#allocation157_spill] sm:$0xff]  ;;  %v834_v35 = vmul.f32 0.37317634, %v5094_v33 }
 0x453   :  { %v1921_v59 = vpop.permute.xlu0 %1920  ;;  %v915_v41 = vsub.f32 %v6696_v7, %v6695_v37 }
 0x454   :  { %v1990_v10 = vsel %vm1907_vm8, %v1921_v59, %v1893_v39  ;;  %v1233_v6 = vmul.f32 %v1217_v53, %v6697_v61  ;;  %v6702_v53 = vld [vmem:[#allocation144_spill] sm:$0xff]  ;;  %v6703_v59 = vld [vmem:[#allocation193_spill] sm:$0xff]  ;;  %v6706_v61 = vld [vmem:[#allocation226_spill] sm:$0xff] }
 0x455   :  { %v5355_v0 = vsel %vm2004_vm9, %v5141_v29, %v1990_v10  ;;  %v979_v52 = vsub.f32 %v915_v41, %v6701_v30  ;;  %v978_v39 = vsub.f32 %v914_v3, %v6702_v53  ;;  %v6704_v10 = vld [vmem:[#allocation32_spill] sm:$0xff]  ;;  %v2097_v3 = vsel %vm2004_vm9, %v6708_v50, %v5267_v44 }
 0x456   :  { %v1220_v37 = vsub.f32 %v6704_v10, %v6703_v59  ;;  %v6712_v59 = vld [vmem:[#allocation147_spill] sm:$0xff] }
 0x458   :  { %2338 = vperm.xlu2 %2732, %v992_v46   ;;  %v2150_v12 = vpop.permute.xlu2 %2149 }
 0x459   :  { %v5368_v29 = vsel %vm2101_vm10, %v2150_v12, %v2094_v32  ;;  %2333 = vperm.xlu1 %2733, %v991_v9   ;;  %v2105_v42 = vpop.permute.xlu1 %2104  ;;  %2634 = vperm.xlu0 %2738, %v1233_v6   ;;  %v6705_v9 = vld [vmem:[#allocation136_spill] sm:$0xff]  ;;  %v995_v6 = vmul.f32 %v979_v52, %v835_v31  ;;  %v994_v12 = vmul.f32 %v978_v39, %v834_v35  ;;  %v6711_v35 = vld [vmem:[#allocation159_spill] sm:$0xff]  ;;  %v837_v39 = vmul.f32 0.37317634, %v5146_v48 }
 0x45a   :  { %v5377_v55 = vsel %vm2101_vm10, %v2105_v42, %v4982_v15  ;;  %v918_v15 = vsub.f32 %v6706_v61, %v6705_v9  ;;  %v1236_v32 = vmul.f32 %v1220_v37, %v6707_v23  ;;  %v6709_v42 = vld [vmem:[#allocation137_spill] sm:$0xff]  ;;  %v2772_v31 = vld [vmem:[%s5886_s0 + $0x70] sm:$0xff] }
 0x45b   :  { %v1936_v7 = vpop.permute.xlu0 %1935  ;;  %v838_v52 = vmul.f32 0.37317634, %v2772_v31  ;;  %v6713_v37 = vld [vmem:[#allocation196_spill] sm:$0xff]  ;;  %v6718_v31 = vld [vmem:[#allocation191_spill] sm:$0xff] }
 0x45c   :  { %v1993_v46 = vsel %vm1907_vm8, %v1936_v7, %v4686_v13  ;;  %v6710_v13 = vld [vmem:[#allocation81_spill] sm:$0xff]  ;;  %v982_v53 = vsub.f32 %v918_v15, %v6711_v35  ;;  %v6714_v7 = vld [vmem:[#allocation38_spill] sm:$0xff] }
 0x45d   :  { %v2090_v41 = vsel %vm2004_vm9, %v5043_v56, %v1993_v46  ;;  %v917_v43 = vsub.f32 %v6710_v13, %v6709_v42  ;;  %v1223_v46 = vsub.f32 %v6714_v7, %v6713_v37  ;;  %v6721_v37 = vld [vmem:[#allocation153_spill] sm:$0xff] }
 0x45e   :  { %v1051_v7 = vmul.f32 %v6721_v37, %v5027_v51 }
 0x45f   :  { %v981_v10 = vsub.f32 %v917_v43, %v6712_v59  ;;  %v6717_v43 = vld [vmem:[#allocation161_spill] sm:$0xff]  ;;  %v6720_v59 = vld [vmem:[#allocation163_spill] sm:$0xff] }
 0x460   :  { %2353 = vperm.xlu2 %2732, %v995_v6   ;;  %v2165_v45 = vpop.permute.xlu2 %2164  ;;  %v998_v6 = vmul.f32 %v982_v53, %v838_v52  ;;  %v6719_v52 = vld [vmem:[#allocation150_spill] sm:$0xff] }
 0x461   :  { %v5400_v56 = vsel %vm2101_vm10, %v2165_v45, %v2097_v3  ;;  %2348 = vperm.xlu1 %2733, %v994_v12   ;;  %v2120_v30 = vpop.permute.xlu1 %2119  ;;  %2649 = vperm.xlu0 %2738, %v1236_v32   ;;  %v997_v12 = vmul.f32 %v981_v10, %v837_v39  ;;  %v6716_v45 = vld [vmem:[#allocation228_spill] sm:$0xff]  ;;  %v1048_v35 = vmul.f32 %v6719_v52, %v6718_v31 }
 0x462   :  { %v5409_v44 = vsel %vm2101_vm10, %v2120_v30, %v5011_v58  ;;  %v6715_v58 = vld [vmem:[#allocation186_spill] sm:$0xff]  ;;  %v2100_v50 = vsel %vm2004_vm9, %v6716_v45, %v5316_v5  ;;  %v1049_v30 = vmul.f32 %v6717_v43, %v4996_v47  ;;  %v1052_v10 = vmul.f32 %v6720_v59, %v5019_v57 }
 0x463   :  { %v1951_v9 = vpop.permute.xlu0 %1950  ;;  %v1239_v23 = vmul.f32 %v1223_v46, %v6715_v58  ;;  %v6724_v58 = vld [vmem:[#allocation156_spill] sm:$0xff] }
 0x464   :  { %v1996_v61 = vsel %vm1907_vm8, %v1951_v9, %v4725_v14 }
 0x465   :  { %v2093_v15 = vsel %vm2004_vm9, %v5082_v63, %v1996_v61 }
 0x468   :  { %2368 = vperm.xlu2 %2732, %v998_v6   ;;  %v2180_v32 = vpop.permute.xlu2 %2179 }
 0x469   :  { %v5428_v3 = vsel %vm2101_vm10, %v2180_v32, %v2100_v50  ;;  %2363 = vperm.xlu1 %2733, %v997_v12   ;;  %v2130_v14 = vpop.permute.xlu1 %2129  ;;  %2664 = vperm.xlu0 %2738, %v1239_v23   ;;  %v6723_v12 = vld [vmem:[#allocation195_spill] sm:$0xff] }
 0x46a   :  { %v5432_v63 = vsel %vm2101_vm10, %v2130_v14, %v2090_v41  ;;  %v1053_v23 = vmul.f32 %v6724_v58, %v6723_v12  ;;  %v1066_v58 = vmul.f32 1.4453057, %v4987_v4 }
 0x46b   :  { %v1966_v42 = vpop.permute.xlu0 %1965 }
 0x46c   :  { %v1999_v13 = vsel %vm1907_vm8, %v1966_v42, %v4762_v26 }
 0x46d   :  { %v2096_v5 = vsel %vm2004_vm9, %v5132_v18, %v1999_v13  ;;  %v6726_v13 = vld [vmem:[#allocation199_spill] sm:$0xff] }
 0x470   :  { %2735 = vset.pattern.permute.xlu2 %v6482_v28 }
 0x471   :  { %2734 = vset.pattern.permute.xlu1 %v6482_v28  ;;  %v2145_v41 = vpop.permute.xlu1 %2144  ;;  %2400 = vperm.xlu2 %2735, %v1049_v30   ;;  %v2212_v53 = vpop.permute.xlu2 %2211 }
 0x472   :  { %v5448_v26 = vsel %vm2101_vm10, %v2145_v41, %v2093_v15  ;;  %2395 = vperm.xlu1 %2734, %v1048_v35   ;;  %v6722_v15 = vld [vmem:[#allocation4_spill] sm:$0xff] }
 0x473   :  { %v1981_v39 = vpop.permute.xlu0 %1980  ;;  %v1054_v6 = vmul.f32 %v6722_v15, %v5060_v36  ;;  %v6725_v36 = vld [vmem:[#allocation5_spill] sm:$0xff]  ;;  %v6728_v41 = vld [vmem:[#allocation8_spill] sm:$0xff] }
 0x474   :  { %v2002_v47 = vsel %vm1907_vm8, %v1981_v39, %v4793_v19  ;;  %v1057_v42 = vmul.f32 %v6725_v36, %v5109_v54  ;;  %v6729_v39 = vld [vmem:[#allocation202_spill] sm:$0xff] }
 0x475   :  { %v2099_v18 = vsel %vm2004_vm9, %v5180_v24, %v2002_v47  ;;  %v6730_v47 = vld [vmem:[#allocation160_spill] sm:$0xff] }
 0x479   :  { %v2160_v46 = vpop.permute.xlu1 %2159  ;;  %2415 = vperm.xlu2 %2735, %v1052_v10   ;;  %v2222_v9 = vpop.permute.xlu2 %2221 }
 0x47a   :  { %v5463_v61 = vsel %vm2101_vm10, %v2160_v46, %v2096_v5  ;;  %v5468_v19 = vsel %vm2198_vm11, %v2222_v9, %v5292_v34  ;;  %2410 = vperm.xlu1 %2734, %v1051_v7   ;;  %v6727_v5 = vld [vmem:[#allocation158_spill] sm:$0xff]  ;;  %v6732_v9 = vld [vmem:[#allocation205_spill] sm:$0xff] }
 0x47b   :  { %v2115_v24 = vpop.permute.xlu0 %2114  ;;  %v1056_v43 = vmul.f32 %v6727_v5, %v6726_v13  ;;  %v6737_v13 = vld [vmem:[#allocation9_spill] sm:$0xff] }
 0x47c   :  { %v2184_v57 = vsel %vm2101_vm10, %v2115_v24, %v5355_v0  ;;  %v6733_v24 = vld [vmem:[#allocation162_spill] sm:$0xff] }
 0x47d   :  { %v5475_v51 = vsel %vm2198_vm11, %v2212_v53, %v2184_v57  ;;  %v1060_v53 = vmul.f32 %v6728_v41, %v5158_v40  ;;  %v6731_v40 = vld [vmem:[#allocation11_spill] sm:$0xff]  ;;  %v1062_v57 = vmul.f32 %v6733_v24, %v6732_v9  ;;  %v1070_v41 = vmul.f32 1.4453057, %v5057_v17 }
 0x47e   :  { %v1063_v46 = vmul.f32 %v6731_v40, %v5203_v60  ;;  %v1074_v17 = vmul.f32 1.4453057, %v5094_v33  ;;  %v6745_v24 = vld [vmem:[#allocation143_spill] sm:$0xff] }
 0x481   :  { %v2175_v32 = vpop.permute.xlu1 %2174  ;;  %2425 = vperm.xlu2 %2735, %v1054_v6   ;;  %v2237_v34 = vpop.permute.xlu2 %2236  ;;  %v6734_v6 = vld [vmem:[#allocation231_spill] sm:$0xff] }
 0x482   :  { %v5483_v45 = vsel %vm2101_vm10, %v2175_v32, %v2099_v18  ;;  %2420 = vperm.xlu1 %2734, %v1053_v23   ;;  %v1059_v18 = vmul.f32 %v6730_v47, %v6729_v39  ;;  %v1065_v23 = vmul.f32 1.4453057, %v4993_v22  ;;  %v6735_v32 = vld [vmem:[#allocation7_spill] sm:$0xff]  ;;  %v1068_v22 = vmul.f32 1.4453057, %v5016_v2 }
 0x483   :  { %v2140_v50 = vpop.permute.xlu0 %2139  ;;  %v6741_v47 = vld [vmem:[#allocation175_spill] sm:$0xff] }
 0x484   :  { %v2189_v0 = vsel %vm2101_vm10, %v2140_v50, %v5243_v8  ;;  %v6736_v50 = vld [vmem:[#allocation35_spill] sm:$0xff]  ;;  %v1148_v5 = vmul.f32 %v6737_v13, %v1068_v22 }
 0x485   :  { %v5490_v14 = vsel %vm2198_vm11, %v2237_v34, %v2189_v0  ;;  %v1146_v34 = vmul.f32 %v6735_v32, %v1066_v58  ;;  %v1145_v0 = vmul.f32 %v6736_v50, %v1065_v23  ;;  %v6747_v23 = vld [vmem:[#allocation184_spill] sm:$0xff]  ;;  %v6748_v50 = vld [vmem:[#allocation75_spill] sm:$0xff] }
 0x489   :  { %2440 = vperm.xlu2 %2735, %v1057_v42   ;;  %v2252_v30 = vpop.permute.xlu2 %2251  ;;  %v1067_v42 = vmul.f32 1.4453057, %v5024_v38  ;;  %v1071_v38 = vmul.f32 1.4453057, %v5051_v25 }
 0x48a   :  { %2435 = vperm.xlu1 %2734, %v1056_v43   ;;  %v2207_v31 = vpop.permute.xlu1 %2206 }
 0x48b   :  { %v5499_v52 = vsel %vm2198_vm11, %v2207_v31, %v5247_v27  ;;  %v2155_v8 = vpop.permute.xlu0 %2154 }
 0x48c   :  { %v2192_v35 = vsel %vm2101_vm10, %v2155_v8, %v5288_v1  ;;  %v6739_v8 = vld [vmem:[#allocation234_spill] sm:$0xff] }
 0x48d   :  { %v5506_v54 = vsel %vm2198_vm11, %v2252_v30, %v2192_v35 }
 0x491   :  { %2455 = vperm.xlu2 %2735, %v1060_v53   ;;  %v2267_v59 = vpop.permute.xlu2 %2266  ;;  %v6740_v53 = vld [vmem:[#allocation46_spill] sm:$0xff] }
 0x492   :  { %2450 = vperm.xlu1 %2734, %v1059_v18   ;;  %v2217_v27 = vpop.permute.xlu1 %2216  ;;  %v1151_v39 = vmul.f32 %v6740_v53, %v1071_v38  ;;  %v1150_v18 = vmul.f32 %v6741_v47, %v1070_v41  ;;  %v6755_v53 = vld [vmem:[#allocation179_spill] sm:$0xff] }
 0x493   :  { %v2282_v10 = vsel %vm2198_vm11, %v2217_v27, %v5409_v44  ;;  %v2170_v37 = vpop.permute.xlu0 %2169  ;;  %v6742_v27 = vld [vmem:[#allocation236_spill] sm:$0xff] }
 0x494   :  { %v2195_v1 = vsel %vm2101_vm10, %v2170_v37, %v5333_v20  ;;  %v2279_v20 = vsel %vm2198_vm11, %v6734_v6, %v5377_v55  ;;  %v1073_v37 = vmul.f32 1.4453057, %v5106_v49  ;;  %v1077_v49 = vmul.f32 1.4453057, %v5146_v48 }
 0x495   :  { %v5520_v7 = vsel %vm2198_vm11, %v2267_v59, %v2195_v1  ;;  %v6743_v1 = vld [vmem:[#allocation49_spill] sm:$0xff]  ;;  %v1076_v6 = vmul.f32 1.4453057, %v5155_v21  ;;  %v2293_v48 = vsel %vm2198_vm11, %v6748_v50, %v5483_v45 }
 0x496   :  { %v1154_v40 = vmul.f32 %v6743_v1, %v1074_v17  ;;  %v6760_v17 = vld [vmem:[#allocation87_spill] sm:$0xff] }
 0x497   :  { %v1156_v32 = vmul.f32 %v6747_v23, %v1076_v6 }
 0x499   :  { %2470 = vperm.xlu2 %2735, %v1063_v46   ;;  %v6744_v46 = vld [vmem:[#allocation180_spill] sm:$0xff] }
 0x49a   :  { %2465 = vperm.xlu1 %2734, %v1062_v57   ;;  %v2232_v15 = vpop.permute.xlu1 %2231  ;;  %v2299_v44 = vpop.permute.xlu2 %2298  ;;  %v1153_v9 = vmul.f32 %v6744_v46, %v1073_v37 }
 0x49b   :  { %v5534_v12 = vsel %vm2198_vm11, %v2232_v15, %v5337_v11  ;;  %v5538_v60 = vsel %vm2295_vm12, %v2299_v44, %v2279_v20  ;;  %v2406_v15 = vpop.permute.xlu0 %2405  ;;  %v6746_v20 = vld [vmem:[#allocation171_spill] sm:$0xff] }
 0x49c   :  { %v1157_v58 = vmul.f32 %v6746_v20, %v1077_v49  ;;  %v6763_v49 = vld [vmem:[#allocation178_spill] sm:$0xff]  ;;  %v6766_v20 = vld [vmem:[#allocation99_spill] sm:$0xff] }
 0x4a1   :  { %2737 = vset.pattern.permute.xlu2 %v6661_v16 }
 0x4a2   :  { %2736 = vset.pattern.permute.xlu1 %v6661_v16  ;;  %v2247_v55 = vpop.permute.xlu1 %2246  ;;  %2502 = vperm.xlu2 %2737, %v1146_v34   ;;  %v2314_v11 = vpop.permute.xlu2 %2313  ;;  %v6738_v16 = vld [vmem:[#allocation172_spill] sm:$0xff] }
 0x4a3   :  { %v5549_v36 = vsel %vm2198_vm11, %v2247_v55, %v5368_v29  ;;  %v5553_v4 = vsel %vm2295_vm12, %v2314_v11, %v2282_v10  ;;  %2497 = vperm.xlu1 %2736, %v1145_v0   ;;  %v1147_v43 = vmul.f32 %v6738_v16, %v1067_v42  ;;  %v2284_v29 = vsel %vm2198_vm11, %v6739_v8, %v5432_v63  ;;  %v6749_v55 = vld [vmem:[#allocation174_spill] sm:$0xff]  ;;  %v6751_v42 = vld [vmem:[#allocation113_spill] sm:$0xff]  ;;  %v6752_v16 = vld [vmem:[#allocation167_spill] sm:$0xff] }
 0x4a4   :  { %v6750_v11 = vld [vmem:[#allocation18_spill] sm:$0xff]  ;;  %v1079_v13 = vmul.f32 1.4453057, %v6751_v42 }
 0x4a5   :  { %v1208_v22 = vsub.f32 %v6750_v11, %v6749_v55  ;;  %v6769_v55 = vld [vmem:[#allocation27_spill] sm:$0xff]  ;;  %v6770_v42 = vld [vmem:[#allocation182_spill] sm:$0xff] }
 0x4aa   :  { %v2262_v30 = vpop.permute.xlu1 %2261  ;;  %2512 = vperm.xlu2 %2737, %v1148_v5   ;;  %v2324_v31 = vpop.permute.xlu2 %2323 }
 0x4ab   :  { %v5566_v35 = vsel %vm2198_vm11, %v2262_v30, %v5400_v56  ;;  %v5570_v2 = vsel %vm2295_vm12, %v2324_v31, %v2284_v29  ;;  %2507 = vperm.xlu1 %2736, %v1147_v43   ;;  %v2287_v56 = vsel %vm2198_vm11, %v6742_v27, %v5448_v26  ;;  %v2431_v5 = vpop.permute.xlu0 %2430  ;;  %v1224_v43 = vmul.f32 %v1208_v22, %v6752_v16  ;;  %v6753_v30 = vld [vmem:[#allocation189_spill] sm:$0xff] }
 0x4ac   :  { %v1159_v45 = vmul.f32 %v6753_v30, %v1079_v13  ;;  %v6754_v29 = vld [vmem:[#allocation73_spill] sm:$0xff] }
 0x4ad   :  { %v6771_v13 = vld [vmem:[#allocation29_spill] sm:$0xff] }
 0x4ae   :  { %v6772_v16 = vld [vmem:[#allocation101_spill] sm:$0xff] }
 0x4b2   :  { %v2277_v59 = vpop.permute.xlu1 %2276  ;;  %2527 = vperm.xlu2 %2737, %v1151_v39   ;;  %v2339_v63 = vpop.permute.xlu2 %2338  ;;  %v6756_v39 = vld [vmem:[#allocation20_spill] sm:$0xff] }
 0x4b3   :  { %v5583_v10 = vsel %vm2198_vm11, %v2277_v59, %v5428_v3  ;;  %v5587_v25 = vsel %vm2295_vm12, %v2339_v63, %v2287_v56  ;;  %2522 = vperm.xlu1 %2736, %v1150_v18   ;;  %v2290_v3 = vsel %vm2198_vm11, %v6745_v24, %v5463_v61  ;;  %v1211_v47 = vsub.f32 %v6756_v39, %v6755_v53  ;;  %v6757_v59 = vld [vmem:[#allocation194_spill] sm:$0xff]  ;;  %v6758_v63 = vld [vmem:[#allocation19_spill] sm:$0xff]  ;;  %v6759_v56 = vld [vmem:[#allocation93_spill] sm:$0xff]  ;;  %v2446_v1 = vpop.permute.xlu0 %2445 }
 0x4b4   :  { %v1210_v27 = vsub.f32 %v6758_v63, %v6757_v59  ;;  %v6762_v24 = vld [vmem:[#allocation23_spill] sm:$0xff]  ;;  %v6779_v63 = vld [vmem:[#allocation44_spill] sm:$0xff] }
 0x4b5   :  { %v6777_v39 = vld [vmem:[#allocation187_spill] sm:$0xff] }
 0x4b6   :  { %v1226_v37 = vmul.f32 %v1210_v27, %v6760_v17 }
 0x4ba   :  { %2542 = vperm.xlu2 %2737, %v1154_v40   ;;  %v2354_v26 = vpop.permute.xlu2 %2353 }
 0x4bb   :  { %v5600_v57 = vsel %vm2295_vm12, %v2354_v26, %v2290_v3  ;;  %2537 = vperm.xlu1 %2736, %v1153_v9   ;;  %v2309_v33 = vpop.permute.xlu1 %2308  ;;  %v6761_v26 = vld [vmem:[#allocation198_spill] sm:$0xff]  ;;  %v2461_v50 = vpop.permute.xlu0 %2460 }
 0x4bc   :  { %v2378_v44 = vsel %vm2295_vm12, %v2309_v33, %v5475_v51  ;;  %v1213_v3 = vsub.f32 %v6762_v24, %v6761_v26  ;;  %v6784_v24 = vld [vmem:[#allocation192_spill] sm:$0xff] }
 0x4bd   :  { %v5609_v61 = vsel %vm2392_vm13, %v2406_v15, %v2378_v44  ;;  %v6764_v15 = vld [vmem:[#allocation25_spill] sm:$0xff]  ;;  %v6765_v44 = vld [vmem:[#allocation90_spill] sm:$0xff] }
 0x4be   :  { %v1229_v6 = vmul.f32 %v1213_v3, %v6765_v44  ;;  %v6785_v3 = vld [vmem:[#allocation39_spill] sm:$0xff]  ;;  %v6787_v44 = vld [vmem:[#allocation110_spill] sm:$0xff] }
 0x4c2   :  { %2557 = vperm.xlu2 %2737, %v1157_v58   ;;  %v2369_v34 = vpop.permute.xlu2 %2368 }
 0x4c3   :  { %v5619_v51 = vsel %vm2295_vm12, %v2369_v34, %v2293_v48  ;;  %2552 = vperm.xlu1 %2736, %v1156_v32   ;;  %v2319_v21 = vpop.permute.xlu1 %2318  ;;  %v6767_v32 = vld [vmem:[#allocation95_spill] sm:$0xff] }
 0x4c4   :  { %v2380_v0 = vsel %vm2295_vm12, %v2319_v21, %v5468_v19  ;;  %v2377_v19 = vsel %vm2295_vm12, %v6754_v29, %v5499_v52  ;;  %v1227_v52 = vmul.f32 %v1211_v47, %v6759_v56  ;;  %v2382_v34 = vsel %vm2295_vm12, %v6767_v32, %v5534_v12  ;;  %v6778_v47 = vld [vmem:[#allocation33_spill] sm:$0xff] }
 0x4c5   :  { %v1218_v59 = vsub.f32 %v6778_v47, %v6777_v39  ;;  %v6780_v56 = vld [vmem:[#allocation105_spill] sm:$0xff] }
 0x4ca   :  { %2739 = vset.pattern.permute.xlu2 %v6482_v28 }
 0x4cb   :  { %2567 = vperm.xlu1 %2736, %v1159_v45   ;;  %v2334_v31 = vpop.permute.xlu1 %2333  ;;  %2589 = vperm.xlu2 %2739, %v1224_v43   ;;  %v2401_v8 = vpop.permute.xlu2 %2400  ;;  %v6773_v43 = vld [vmem:[#allocation97_spill] sm:$0xff] }
 0x4cc   :  { %v2383_v38 = vsel %vm2295_vm12, %v2334_v31, %v5490_v14  ;;  %v5639_v41 = vsel %vm2392_vm13, %v2401_v8, %v2377_v19  ;;  %v6775_v19 = vld [vmem:[#allocation204_spill] sm:$0xff] }
 0x4cd   :  { %v5645_v18 = vsel %vm2392_vm13, %v2431_v5, %v2383_v38  ;;  %v1215_v5 = vsub.f32 %v6771_v13, %v6770_v42  ;;  %v6776_v38 = vld [vmem:[#allocation31_spill] sm:$0xff] }
 0x4ce   :  { %v1219_v53 = vsub.f32 %v6776_v38, %v6775_v19 }
 0x4cf   :  { %v1231_v30 = vmul.f32 %v1215_v5, %v6773_v43 }
 0x4d0   :  { %v1235_v27 = vmul.f32 %v1219_v53, %v6779_v63 }
 0x4d3   :  { %2740 = vset.pattern.permute.xlu1 %v6482_v28  ;;  %v2349_v14 = vpop.permute.xlu1 %2348  ;;  %2604 = vperm.xlu2 %2739, %v1227_v52   ;;  %v2416_v40 = vpop.permute.xlu2 %2415  ;;  %v1212_v28 = vsub.f32 %v6764_v15, %v6763_v49  ;;  %v1234_v52 = vmul.f32 %v1218_v59, %v6780_v56  ;;  %v1221_v49 = vsub.f32 %v6785_v3, %v6784_v24  ;;  %v6786_v15 = vld [vmem:[#allocation58_spill] sm:$0xff] }
 0x4d4   :  { %v2386_v46 = vsel %vm2295_vm12, %v2349_v14, %v5506_v54  ;;  %v2477_v9 = vsel %vm2392_vm13, %v2416_v40, %v2380_v0  ;;  %2599 = vperm.xlu1 %2740, %v1226_v37   ;;  %v6768_v0 = vld [vmem:[#allocation201_spill] sm:$0xff]  ;;  %v6781_v37 = vld [vmem:[#allocation3_spill] sm:$0xff]  ;;  %v6782_v40 = vld [vmem:[#allocation206_spill] sm:$0xff] }
 0x4d5   :  { %v2483_v33 = vsel %vm2392_vm13, %v2446_v1, %v2386_v46  ;;  %v1228_v58 = vmul.f32 %v1212_v28, %v6766_v20  ;;  %v1216_v11 = vsub.f32 %v6769_v55, %v6768_v0  ;;  %v6783_v46 = vld [vmem:[#allocation37_spill] sm:$0xff] }
 0x4d6   :  { %v1222_v26 = vsub.f32 %v6783_v46, %v6782_v40 }
 0x4d7   :  { %v1232_v12 = vmul.f32 %v1216_v11, %v6772_v16  ;;  %v2595_v16 = vpop.permute.xlu0 %2594 }
 0x4d8   :  { %v1238_v28 = vmul.f32 %v1222_v26, %v6786_v15  ;;  %v6791_v26 = vld [vmem:[#allocation94_spill] sm:$0xff] }
 0x4db   :  { %v2364_v23 = vpop.permute.xlu1 %2363  ;;  %2614 = vperm.xlu2 %2739, %v1229_v6   ;;  %v2426_v54 = vpop.permute.xlu2 %2425  ;;  %v1237_v6 = vmul.f32 %v1221_v49, %v6787_v44 }
 0x4dc   :  { %v2389_v48 = vsel %vm2295_vm12, %v2364_v23, %v5520_v7  ;;  %v2479_v21 = vsel %vm2392_vm13, %v2426_v54, %v2382_v34  ;;  %2609 = vperm.xlu1 %2740, %v1228_v58   ;;  %v6774_v7 = vld [vmem:[#allocation170_spill] sm:$0xff]  ;;  %v6788_v58 = vld [vmem:[#allocation165_spill] sm:$0xff] }
 0x4dd   :  { %v2486_v22 = vsel %vm2392_vm13, %v2461_v50, %v2389_v48  ;;  %v2385_v31 = vsel %vm2295_vm12, %v6774_v7, %v5549_v36  ;;  %v2388_v36 = vsel %vm2295_vm12, %v6781_v37, %v5566_v35  ;;  %v2391_v35 = vsel %vm2295_vm12, %v6788_v58, %v5583_v10 }
 0x4e3   :  { %2629 = vperm.xlu2 %2739, %v1232_v12   ;;  %v2441_v45 = vpop.permute.xlu2 %2440 }
 0x4e4   :  { %v2482_v8 = vsel %vm2392_vm13, %v2441_v45, %v2385_v31  ;;  %2624 = vperm.xlu1 %2740, %v1231_v30   ;;  %v2396_v29 = vpop.permute.xlu1 %2395  ;;  %v2620_v30 = vpop.permute.xlu0 %2619  ;;  %v6789_v31 = vld [vmem:[#allocation169_spill] sm:$0xff] }
 0x4e5   :  { %v2473_v45 = vsel %vm2392_vm13, %v2396_v29, %v5538_v60 }
 0x4e6   :  { %v2570_v19 = vsel %vm2489_vm14, %v6789_v31, %v2473_v45 }
 0x4eb   :  { %2644 = vperm.xlu2 %2739, %v1235_v27   ;;  %v2456_v17 = vpop.permute.xlu2 %2455 }
 0x4ec   :  { %v2485_v1 = vsel %vm2392_vm13, %v2456_v17, %v2388_v36  ;;  %2639 = vperm.xlu1 %2740, %v1234_v52   ;;  %v2411_v14 = vpop.permute.xlu1 %2410  ;;  %v2635_v60 = vpop.permute.xlu0 %2634  ;;  %v6790_v17 = vld [vmem:[#allocation96_spill] sm:$0xff] }
 0x4f3   :  { %2659 = vperm.xlu2 %2739, %v1238_v28   ;;  %v2471_v20 = vpop.permute.xlu2 %2470 }
 0x4f4   :  { %v2488_v23 = vsel %vm2392_vm13, %v2471_v20, %v2391_v35  ;;  %2654 = vperm.xlu1 %2740, %v1237_v6   ;;  %v2421_v54 = vpop.permute.xlu1 %2420  ;;  %v6792_v6 = vld [vmem:[#allocation103_spill] sm:$0xff] }
 0x4fc   :  { %v2436_v32 = vpop.permute.xlu1 %2435  ;;  %v2503_v34 = vpop.permute.xlu2 %2502 }
 0x4fd   :  { %v5716_v50 = vsel %vm2489_vm14, %v2503_v34, %v5609_v61 }
 0x504   :  { %v2451_v48 = vpop.permute.xlu1 %2450  ;;  %v2513_v0 = vpop.permute.xlu2 %2512 }
 0x505   :  { %v5720_v55 = vsel %vm2489_vm14, %v2513_v0, %v2477_v9 }
 0x50c   :  { %v5722_v10 = vpop.permute.xlu1 %2465  ;;  %v2528_v11 = vpop.permute.xlu2 %2527 }
 0x50d   :  { %v5727_v42 = vsel %vm2489_vm14, %v2528_v11, %v5645_v18 }
 0x514   :  { %v2543_v13 = vpop.permute.xlu2 %2542 }
 0x515   :  { %v5732_v61 = vsel %vm2489_vm14, %v2543_v13, %v2483_v33  ;;  %v2498_v5 = vpop.permute.xlu1 %2497 }
 0x516   :  { %v2571_v9 = vsel %vm2489_vm14, %v2498_v5, %v5639_v41 }
 0x517   :  { %v2668_v12 = vsel %vm2586_vm15, %v2595_v16, %v2571_v9 }
 0x518   :  { %2685 = vst.msk [vmem:[%s5887_s1 + $0x8] sm:$0xff] %vm2683_vm0, %v2668_v12 }
 0x51c   :  { %v2558_v18 = vpop.permute.xlu2 %2557 }
 0x51d   :  { %v5745_v33 = vsel %vm2489_vm14, %v2558_v18, %v2486_v22  ;;  %v2508_v43 = vpop.permute.xlu1 %2507 }
 0x525   :  { %v2523_v41 = vpop.permute.xlu1 %2522  ;;  %v2590_v7 = vpop.permute.xlu2 %2589 }
 0x526   :  { %v2576_v38 = vsel %vm2489_vm14, %v2523_v41, %v2479_v21  ;;  %v2667_v53 = vsel %vm2586_vm15, %v2590_v7, %v2570_v19  ;;  %v2476_v21 = vsel %vm2392_vm13, %v2411_v14, %v5553_v4  ;;  %v2478_v4 = vsel %vm2392_vm13, %v2421_v54, %v5570_v2 }
 0x527   :  { %v2673_v22 = vsel %vm2586_vm15, %v2620_v30, %v2576_v38  ;;  %2684 = vst.msk [vmem:[%s5887_s1] sm:$0xff] %vm2683_vm0, %v2667_v53  ;;  %v2573_v29 = vsel %vm2489_vm14, %v2508_v43, %v2476_v21  ;;  %v2575_v37 = vsel %vm2489_vm14, %v6790_v17, %v2478_v4  ;;  %v2481_v2 = vsel %vm2392_vm13, %v2436_v32, %v5587_v25  ;;  %v6793_v32 = vld [vmem:[#allocation108_spill] sm:$0xff] }
 0x528   :  { %2690 = vst.msk [vmem:[%s5887_s1 + $0x30] sm:$0xff] %vm2683_vm0, %v2673_v22  ;;  %v2578_v24 = vsel %vm2489_vm14, %v6791_v26, %v2481_v2  ;;  %v2484_v25 = vsel %vm2392_vm13, %v2451_v48, %v5600_v57  ;;  %v2487_v57 = vsel %vm2392_vm13, %v5722_v10, %v5619_v51 }
 0x529   :  { %v2581_v20 = vsel %vm2489_vm14, %v6792_v6, %v2484_v25  ;;  %v2584_v34 = vsel %vm2489_vm14, %v6793_v32, %v2487_v57 }
 0x52d   :  { %v2538_v39 = vpop.permute.xlu1 %2537  ;;  %v2605_v47 = vpop.permute.xlu2 %2604 }
 0x52e   :  { %v2579_v59 = vsel %vm2489_vm14, %v2538_v39, %v2482_v8  ;;  %v2670_v63 = vsel %vm2586_vm15, %v2605_v47, %v2573_v29  ;;  %v2650_v8 = vpop.permute.xlu0 %2649 }
 0x52f   :  { %v2676_v27 = vsel %vm2586_vm15, %v2635_v60, %v2579_v59  ;;  %2687 = vst.msk [vmem:[%s5887_s1 + $0x18] sm:$0xff] %vm2683_vm0, %v2670_v63 }
 0x530   :  { %2693 = vst.msk [vmem:[%s5887_s1 + $0x48] sm:$0xff] %vm2683_vm0, %v2676_v27 }
 0x535   :  { %v2553_v56 = vpop.permute.xlu1 %2552  ;;  %v2615_v52 = vpop.permute.xlu2 %2614 }
 0x536   :  { %v2582_v36 = vsel %vm2489_vm14, %v2553_v56, %v2485_v1  ;;  %v2672_v14 = vsel %vm2586_vm15, %v2615_v52, %v2575_v37  ;;  %v2665_v3 = vpop.permute.xlu0 %2664 }
 0x537   :  { %v2679_v40 = vsel %vm2586_vm15, %v2650_v8, %v2582_v36  ;;  %2689 = vst.msk [vmem:[%s5887_s1 + $0x28] sm:$0xff] %vm2683_vm0, %v2672_v14 }
 0x538   :  { %2696 = vst.msk [vmem:[%s5887_s1 + $0x60] sm:$0xff] %vm2683_vm0, %v2679_v40 }
 0x53d   :  { %v2568_v1 = vpop.permute.xlu1 %2567  ;;  %v2630_v46 = vpop.permute.xlu2 %2629 }
 0x53e   :  { %v2585_v49 = vsel %vm2489_vm14, %v2568_v1, %v2488_v23  ;;  %v2675_v15 = vsel %vm2586_vm15, %v2630_v46, %v2578_v24 }
 0x53f   :  { %v2682_v28 = vsel %vm2586_vm15, %v2665_v3, %v2585_v49  ;;  %2692 = vst.msk [vmem:[%s5887_s1 + $0x40] sm:$0xff] %vm2683_vm0, %v2675_v15 }
 0x540   :  { %2699 = vst.msk [vmem:[%s5887_s1 + $0x78] sm:$0xff] %vm2683_vm0, %v2682_v28 }
 0x545   :  { %v2645_v44 = vpop.permute.xlu2 %2644 }
 0x546   :  { %v2678_v58 = vsel %vm2586_vm15, %v2645_v44, %v2581_v20  ;;  %v2600_v35 = vpop.permute.xlu1 %2599 }
 0x547   :  { %2695 = vst.msk [vmem:[%s5887_s1 + $0x58] sm:$0xff] %vm2683_vm0, %v2678_v58  ;;  %v2669_v23 = vsel %vm2586_vm15, %v2600_v35, %v5716_v50 }
 0x548   :  { %2686 = vst.msk [vmem:[%s5887_s1 + $0x10] sm:$0xff] %vm2683_vm0, %v2669_v23 }
 0x54d   :  { %v2660_v54 = vpop.permute.xlu2 %2659 }
 0x54e   :  { %v2681_v48 = vsel %vm2586_vm15, %v2660_v54, %v2584_v34  ;;  %v2610_v0 = vpop.permute.xlu1 %2609 }
 0x54f   :  { %2698 = vst.msk [vmem:[%s5887_s1 + $0x70] sm:$0xff] %vm2683_vm0, %v2681_v48  ;;  %v2671_v50 = vsel %vm2586_vm15, %v2610_v0, %v5720_v55 }
 0x550   :  { %2688 = vst.msk [vmem:[%s5887_s1 + $0x20] sm:$0xff] %vm2683_vm0, %v2671_v50 }
 0x556   :  { %v2625_v51 = vpop.permute.xlu1 %2624 }
 0x557   :  { %v2674_v10 = vsel %vm2586_vm15, %v2625_v51, %v5727_v42 }
 0x558   :  { %2691 = vst.msk [vmem:[%s5887_s1 + $0x38] sm:$0xff] %vm2683_vm0, %v2674_v10 }
 0x55e   :  { %v2640_v11 = vpop.permute.xlu1 %2639 }
 0x55f   :  { %v2677_v55 = vsel %vm2586_vm15, %v2640_v11, %v5732_v61 }
 0x560   :  { %2694 = vst.msk [vmem:[%s5887_s1 + $0x50] sm:$0xff] %vm2683_vm0, %v2677_v55 }
 0x566   :  { %v2655_v13 = vpop.permute.xlu1 %2654 }
 0x567   :  { %v2680_v42 = vsel %vm2586_vm15, %v2655_v13, %v5745_v33 }
 0x568   :  { %2697 = vst.msk [vmem:[%s5887_s1 + $0x68] sm:$0xff] %vm2683_vm0, %v2680_v42 }

</bundles_post_ra>
